<compile_context>
chip_gen: v6e
topology: v6e:2x2x1
jax: 0.10.0
libtpu: 0.0.40
codegen_flags: <defaults>
</compile_context>

<pallas_src>
import functools

import jax
import jax.numpy as jnp
from jax import lax
from jax.experimental import pallas as pl
from jax.experimental.pallas import tpu as pltpu


# ----------------------------------------------------------------- in-kernel helpers

def _leaky_relu(x, slope):
    return jnp.where(x >= 0.0, x, slope * x)


def _layer_norm(x, eps):
    mu = jnp.mean(x, axis=-1, keepdims=True)
    c = x - mu
    var = jnp.mean(c * c, axis=-1, keepdims=True)
    return c * lax.rsqrt(var + eps)


def _gat_attention(h, adj_m, w, a_src, a_dst_t, heads, hid, slope, mask_val):
    """One GraphAttentionLayer (no bias); concat-over-heads output (n, heads*hid).

    Additive score decomposition e[i,j,h] = LeakyReLU(g[i,h]·a_src_h + g[j,h]·a_dst_h)
    so the O(n^2 * heads * 2*hid) concat tensor of the PyTorch code is never built.
      a_src   : (heads*hid, heads) block-diagonal expansion of the source half.
      a_dst_t : (heads, heads*hid) block-diagonal expansion of the dest half (dest
                scores come out directly as (heads, n); no transpose through the XLU).
    All head score matrices are stacked along the sublane axis -> (heads*n, n) so ONE
    LeakyReLU / mask / softmax pass covers every head.
    """
    n = h.shape[0]
    g = jnp.dot(h, w, preferred_element_type=jnp.float32)              # (n, heads*hid)
    e_src = jnp.dot(g, a_src, preferred_element_type=jnp.float32)      # (n, heads)
    e_dst_t = lax.dot_general(a_dst_t, g, (((1,), (1,)), ((), ())),
                              preferred_element_type=jnp.float32)      # (heads, n)

    if heads == 1:
        e = e_src + e_dst_t                                            # (n, n)
        adj_all = adj_m
    else:
        e = jnp.concatenate(
            [e_src[:, hh:hh + 1] + e_dst_t[hh:hh + 1, :] for hh in range(heads)],
            axis=0)                                                     # (heads*n, n)
        adj_all = jnp.concatenate([adj_m] * heads, axis=0)              # (heads*n, n)

    e = _leaky_relu(e, slope)                                           # LeakyReLU(0.2)
    e = jnp.where(adj_all == 0.0, mask_val, e)                          # masked_fill
    m = jnp.max(e, axis=1, keepdims=True)                               # softmax(dim=1)
    p = jnp.exp(e - m)
    a = p * pl.reciprocal(jnp.sum(p, axis=1, keepdims=True), approx=False)

    if heads == 1:
        return jnp.dot(a, g, preferred_element_type=jnp.float32)        # (n, hid)
    outs = [jnp.dot(a[hh * n:(hh + 1) * n, :], g[:, hh * hid:(hh + 1) * hid],
                    preferred_element_type=jnp.float32) for hh in range(heads)]
    return jnp.concatenate(outs, axis=-1)                               # (n, heads*hid)


def _gat_block(h, adj_m, prm, heads, hid1, feat_dim, attn_slope, ln_eps, mask_val):
    """GAT (2 attention layers + ELU + isolated-node masking) + residual + LayerNorm."""
    w1, a1s, a1dT, w2, a2s, a2dT = prm
    x1 = _gat_attention(h, adj_m, w1, a1s, a1dT, heads, hid1, attn_slope, mask_val)
    x1 = jnp.where(x1 > 0.0, x1, jnp.exp(jnp.minimum(x1, 0.0)) - 1.0)   # ELU
    x2 = _gat_attention(x1, adj_m, w2, a2s, a2dT, 1, feat_dim, attn_slope, mask_val)
    deg = jnp.sum(adj_m, axis=1, keepdims=True)
    x2 = jnp.where(deg == 0.0, 0.0, x2)              # masked_fill(adj_x == 0, 0)
    return _layer_norm(x2 + h, ln_eps)               # layer_norm(gat(x) + x)


# ------------------------------------------------------------------ fused kernel body

def _fused_forward_kernel(
        x_ref, adj_ref,
        sw1, sa1s, sa1d, sw2, sa2s, sa2d,            # gat_sen
        cw1, ca1s, ca1d, cw2, ca2s, ca2d,            # gat_sec
        dw1, da1s, da1d, dw2, da2s, da2d,            # gat_doc
        fw1, fb1, fw2, fb2, fw3, fb3,                # out_ffn (3 layers)
        pw1, pb1, pw2, pb2, hw, hb,                  # out_proj (2 layers) + head
        out_ref, *,
        heads, hid1, feat_dim, s, sec_end, attn_slope, ln_eps, mask_val):
    x = x_ref[...]                                   # (n, F)
    adj = adj_ref[...]                               # (n, n) 0/1 float
    n = x.shape[0]

    # --- step-wise adjacency masks, built in-kernel (a few VPU compares; no DMAs)
    row = lax.broadcasted_iota(jnp.int32, (n, n), 0)
    col = lax.broadcasted_iota(jnp.int32, (n, n), 1)
    sen_adj = jnp.where((row >= s) | (col >= s), 0.0, adj)
    sec_adj = jnp.where((row < s) | (row >= sec_end) | (col >= sec_end), 0.0, adj)
    doc_adj = jnp.where(row < sec_end, 0.0, adj)

    # --- 3 GAT (+residual+LN) stages, all VMEM-resident
    gat_args = dict(heads=heads, hid1=hid1, feat_dim=feat_dim,
                    attn_slope=attn_slope, ln_eps=ln_eps, mask_val=mask_val)
    f_sen = _gat_block(
        x, sen_adj,
        (sw1[...], sa1s[...], sa1d[...], sw2[...], sa2s[...], sa2d[...]), **gat_args)
    f_sec = _gat_block(
        f_sen, sec_adj,
        (cw1[...], ca1s[...], ca1d[...], cw2[...], ca2s[...], ca2d[...]), **gat_args)
    f_doc = _gat_block(
        f_sec, doc_adj,
        (dw1[...], da1s[...], da1d[...], dw2[...], da2s[...], da2d[...]), **gat_args)

    # --- sentence<-section / section<-doc propagation as full-width masked matmuls
    #     + row selects (tile-aligned, preserves the PyTorch in-place update order).
    P_ss = jnp.where((row < s) & (col >= s) & (col < sec_end), adj, 0.0)
    P_sd = jnp.where((row >= s) & (row < sec_end) & (col >= sec_end), adj, 0.0)
    row1 = lax.broadcasted_iota(jnp.int32, (n, 1), 0)

    sec_top = jnp.dot(P_ss, f_sec, preferred_element_type=jnp.float32)
    f_sec = jnp.where(row1 < s, sec_top, f_sec)

    doc_mid = jnp.dot(P_sd, f_doc, preferred_element_type=jnp.float32)
    f_doc = jnp.where((row1 >= s) & (row1 < sec_end), doc_mid, f_doc)
    doc_top = jnp.dot(P_ss, f_doc, preferred_element_type=jnp.float32)
    f_doc = jnp.where(row1 < s, doc_top, f_doc)

    feat = jnp.concatenate([f_doc, f_sec, f_sen], axis=-1)              # (n, 3F)

    # --- out_ffn (3x Linear + LeakyReLU(0.01)) + residual + LayerNorm
    y = _leaky_relu(jnp.dot(feat, fw1[...], preferred_element_type=jnp.float32) + fb1[...], 0.01)
    y = _leaky_relu(jnp.dot(y, fw2[...], preferred_element_type=jnp.float32) + fb2[...], 0.01)
    y = _leaky_relu(jnp.dot(y, fw3[...], preferred_element_type=jnp.float32) + fb3[...], 0.01)
    feat_out = _layer_norm(y + x, ln_eps)

    # --- head: out_proj (2x Linear + LeakyReLU(0.1)) + Linear(->1).  Computed on all
    #     n rows (same sublane tiles either way); only the s sentence rows are stored.
    z = _leaky_relu(jnp.dot(feat_out, pw1[...], preferred_element_type=jnp.float32) + pb1[...], 0.1)
    z = _leaky_relu(jnp.dot(z, pw2[...], preferred_element_type=jnp.float32) + pb2[...], 0.1)
    z = jnp.dot(z, hw[...], preferred_element_type=jnp.float32) + hb[...]
    out_ref[...] = z[:s, :]


# ------------------------------------------------------------------------ wrapper

def _full_spec(shape):
    nd = len(shape)
    return pl.BlockSpec(shape, lambda *_args, _nd=nd: (0,) * _nd)


def end2end_forward(x, doc_lens, adj, docnum, secnum, params):
    """Single fused Pallas launch for End2End_Encoder.forward.  x: (1,n,F), adj: (1,n,n)."""
    del doc_lens                                     # unused by the PyTorch forward too
    x2, adj2 = x[0], adj[0]
    n, feat_dim = x2.shape
    s = n - docnum - secnum - 1                      # number of sentence nodes
    sec_end = n - docnum - 1

    inputs = [x2, adj2]
    for key in ("gat_sen", "gat_sec", "gat_doc"):
        p = params[key]
        inputs += [p["w1"], p["a1_src"], p["a1_dst_t"],
                   p["w2"], p["a2_src"], p["a2_dst_t"]]
    for w, b in params["out_ffn"] + params["out_proj"] + params["head"]:
        inputs += [w, b]

    kernel = functools.partial(
        _fused_forward_kernel,
        heads=params["gat_sen"]["heads"], hid1=params["gat_sen"]["hid1"],
        feat_dim=feat_dim, s=s, sec_end=sec_end,
        attn_slope=0.2, ln_eps=1e-5, mask_val=-1e9)

    # Single launch, no grid: every operand is one full-array VMEM block (~120 KB of
    # weights + activations), so nothing round-trips through HBM between stages.
    out = pl.pallas_call(
        kernel,
        out_shape=jax.ShapeDtypeStruct((s, 1), jnp.float32),
        in_specs=[_full_spec(a.shape) for a in inputs],
        out_specs=_full_spec((s, 1)),
        compiler_params=pltpu.CompilerParams(),
    )(*inputs)
    return out[None]                                 # (1, s, 1)


# ------------------------------------------------------------------------ params

def make_params(key, input_dim, hidden_dim, heads):
    kit = iter(jax.random.split(key, 40))

    def dense(fan_in, fan_out):
        w = jax.random.normal(next(kit), (fan_in, fan_out), jnp.float32) / (fan_in ** 0.5)
        b = jax.random.normal(next(kit), (1, fan_out), jnp.float32) * 0.05
        return w, b

    def gat_params(fin):
        hid1 = hidden_dim // heads
        w1 = jax.random.normal(next(kit), (fin, hidden_dim), jnp.float32) / (fin ** 0.5)
        attn1 = jax.random.normal(next(kit), (2 * hid1,), jnp.float32) / ((2 * hid1) ** 0.5)
        w2 = jax.random.normal(next(kit), (hidden_dim, fin), jnp.float32) / (hidden_dim ** 0.5)
        attn2 = jax.random.normal(next(kit), (2 * fin,), jnp.float32) / ((2 * fin) ** 0.5)
        eye_h = jnp.eye(heads, dtype=jnp.float32)
        return dict(
            heads=heads, hid1=hid1, hid2=fin,
            w1=w1, attn1=attn1, w2=w2, attn2=attn2,
            a1_src=jnp.kron(eye_h, attn1[:hid1].reshape(hid1, 1)),     # (heads*hid1, heads)
            a1_dst_t=jnp.kron(eye_h, attn1[hid1:].reshape(1, hid1)),   # (heads, heads*hid1)
            a2_src=attn2[:fin].reshape(fin, 1),                        # (fin, 1)
            a2_dst_t=attn2[fin:].reshape(1, fin),                      # (1, fin)
        )

    return {
        "gat_sen": gat_params(input_dim),
        "gat_sec": gat_params(input_dim),
        "gat_doc": gat_params(input_dim),
        "out_ffn": [dense(3 * input_dim, hidden_dim),
                    dense(hidden_dim, hidden_dim),
                    dense(hidden_dim, input_dim)],
        "out_proj": [dense(input_dim, hidden_dim),
                     dense(hidden_dim, input_dim)],
        "head": [dense(input_dim, 1)],
    }


# ---------------------------------------------------------------------- pure-JAX ref

_HP = lax.Precision.HIGHEST


def _ref_ln(x, eps=1e-5):
    mu = jnp.mean(x, axis=-1, keepdims=True)
    c = x - mu
    return c * lax.rsqrt(jnp.mean(c * c, axis=-1, keepdims=True) + eps)


def _ref_attn_layer(h, adj, w, attn_w, heads, hid, concat, slope=0.2):
    n = h.shape[0]
    g = jnp.matmul(h, w, precision=_HP).reshape(n, heads, hid)
    e_src = jnp.einsum("nhf,f->nh", g, attn_w[:hid], precision=_HP)
    e_dst = jnp.einsum("nhf,f->nh", g, attn_w[hid:], precision=_HP)
    e = e_src[:, None, :] + e_dst[None, :, :]
    e = jnp.where(e >= 0, e, slope * e)
    e = jnp.where(adj[:, :, None] == 0, -1e9, e)
    a = jax.nn.softmax(e, axis=1)
    out = jnp.einsum("ijh,jhf->ihf", a, g, precision=_HP)
    return out.reshape(n, heads * hid) if concat else jnp.mean(out, axis=1)


def _ref_gat(x, adj, p):
    x1 = _ref_attn_layer(x, adj, p["w1"], p["attn1"], p["heads"], p["hid1"], True)
    x1 = jnp.where(x1 > 0.0, x1, jnp.exp(jnp.minimum(x1, 0.0)) - 1.0)
    x2 = _ref_attn_layer(x1, adj, p["w2"], p["attn2"], 1, p["hid2"], False)
    deg = jnp.sum(adj, axis=1, keepdims=True)
    return jnp.where(deg == 0.0, 0.0, x2)


def _ref_mlp(x, layers, slopes):
    y = x
    for (w, b), sl in zip(layers, slopes):
        y = jnp.matmul(y, w, precision=_HP) + b
        if sl is not None:
            y = jnp.where(y >= 0.0, y, sl * y)
    return y


def reference_forward(x, adj, docnum, secnum, params):
    x2, adj2 = x[0], adj[0]
    n = x2.shape[0]
    s = n - docnum - secnum - 1
    sec_end = n - docnum - 1
    sen_adj = adj2.at[s:, :].set(0.0).at[:, s:].set(0.0)
    sec_adj = adj2.at[:s, :].set(0.0).at[sec_end:, :].set(0.0).at[:, sec_end:].set(0.0)
    doc_adj = adj2.at[:sec_end, :].set(0.0)

    f_sen = _ref_ln(_ref_gat(x2, sen_adj, params["gat_sen"]) + x2)
    f_sec = _ref_ln(_ref_gat(f_sen, sec_adj, params["gat_sec"]) + f_sen)
    f_doc = _ref_ln(_ref_gat(f_sec, doc_adj, params["gat_doc"]) + f_sec)

    A_ss = adj2[:s, s:sec_end]
    A_sd = adj2[s:sec_end, sec_end:]
    f_sec = f_sec.at[:s].set(jnp.matmul(A_ss, f_sec[s:sec_end], precision=_HP))
    f_doc = f_doc.at[s:sec_end].set(jnp.matmul(A_sd, f_doc[sec_end:], precision=_HP))
    f_doc = f_doc.at[:s].set(jnp.matmul(A_ss, f_doc[s:sec_end], precision=_HP))

    feat = jnp.concatenate([f_doc, f_sec, f_sen], axis=-1)
    feat_out = _ref_ln(_ref_mlp(feat, params["out_ffn"], (0.01, 0.01, 0.01)) + x2)

    z = _ref_mlp(feat_out[:s], params["out_proj"] + params["head"], (0.1, 0.1, None))
    return z[None]


# ---------------------------------------------------------------------------- main

if __name__ == "__main__":
    key = jax.random.PRNGKey(0)
    input_dim, hidden_dim, heads = 32, 64, 4
    n_sent, secnum, docnum = 10, 3, 2
    n_nodes = n_sent + secnum + docnum + 1           # sentences + sections + docs + global

    k_feat, k_adj, k_par = jax.random.split(key, 3)
    x = jax.random.normal(k_feat, (1, n_nodes, input_dim), jnp.float32)
    adj_rand = jax.random.bernoulli(k_adj, 0.45, (n_nodes, n_nodes))
    adj = (adj_rand | jnp.eye(n_nodes, dtype=bool)).astype(jnp.float32)[None]
    doc_lens = jnp.array([n_sent], jnp.int32)         # unused by the forward

    params = make_params(k_par, input_dim, hidden_dim, heads)

    out = end2end_forward(x, doc_lens, adj, docnum, secnum, params)
    out = jax.block_until_ready(out)

    ref = reference_forward(x, adj, docnum, secnum, params)

    assert out.shape == (1, n_sent, 1), out.shape
    assert bool(jnp.all(jnp.isfinite(out))), "non-finite output"
    assert jnp.allclose(out, ref, rtol=2e-3, atol=2e-3), (out.ravel(), ref.ravel())

    print("KERNEL_OK")
</pallas_src>

<mosaic_0001>
module attributes {stable_mosaic.version = 11 : i64} {
  func.func @_fused_forward_kernel(%arg0: memref<16x32xf32, #tpu.memory_space<vmem>>, %arg1: memref<16x16xf32, #tpu.memory_space<vmem>>, %arg2: memref<32x64xf32, #tpu.memory_space<vmem>>, %arg3: memref<64x4xf32, #tpu.memory_space<vmem>>, %arg4: memref<4x64xf32, #tpu.memory_space<vmem>>, %arg5: memref<64x32xf32, #tpu.memory_space<vmem>>, %arg6: memref<32x1xf32, #tpu.memory_space<vmem>>, %arg7: memref<1x32xf32, #tpu.memory_space<vmem>>, %arg8: memref<32x64xf32, #tpu.memory_space<vmem>>, %arg9: memref<64x4xf32, #tpu.memory_space<vmem>>, %arg10: memref<4x64xf32, #tpu.memory_space<vmem>>, %arg11: memref<64x32xf32, #tpu.memory_space<vmem>>, %arg12: memref<32x1xf32, #tpu.memory_space<vmem>>, %arg13: memref<1x32xf32, #tpu.memory_space<vmem>>, %arg14: memref<32x64xf32, #tpu.memory_space<vmem>>, %arg15: memref<64x4xf32, #tpu.memory_space<vmem>>, %arg16: memref<4x64xf32, #tpu.memory_space<vmem>>, %arg17: memref<64x32xf32, #tpu.memory_space<vmem>>, %arg18: memref<32x1xf32, #tpu.memory_space<vmem>>, %arg19: memref<1x32xf32, #tpu.memory_space<vmem>>, %arg20: memref<96x64xf32, #tpu.memory_space<vmem>>, %arg21: memref<1x64xf32, #tpu.memory_space<vmem>>, %arg22: memref<64x64xf32, #tpu.memory_space<vmem>>, %arg23: memref<1x64xf32, #tpu.memory_space<vmem>>, %arg24: memref<64x32xf32, #tpu.memory_space<vmem>>, %arg25: memref<1x32xf32, #tpu.memory_space<vmem>>, %arg26: memref<32x64xf32, #tpu.memory_space<vmem>>, %arg27: memref<1x64xf32, #tpu.memory_space<vmem>>, %arg28: memref<64x32xf32, #tpu.memory_space<vmem>>, %arg29: memref<1x32xf32, #tpu.memory_space<vmem>>, %arg30: memref<32x1xf32, #tpu.memory_space<vmem>>, %arg31: memref<1x1xf32, #tpu.memory_space<vmem>>, %arg32: memref<10x1xf32, #tpu.memory_space<vmem>>) attributes {dimension_semantics = [], scalar_prefetch = 0 : i64, scratch_operands = 0 : i64, tpu.core_type = #tpu.core_type<tc>} {
    %c0 = arith.constant 0 : index
    %c0_0 = arith.constant 0 : index
    %0 = vector.load %arg0[%c0, %c0_0] : memref<16x32xf32, #tpu.memory_space<vmem>>, vector<16x32xf32>
    %c0_1 = arith.constant 0 : index
    %c0_2 = arith.constant 0 : index
    %1 = vector.load %arg1[%c0_1, %c0_2] : memref<16x16xf32, #tpu.memory_space<vmem>>, vector<16x16xf32>
    %2 = tpu.iota {dimensions = array<i32: 0>} : vector<16x16xi32>
    %3 = tpu.iota {dimensions = array<i32: 1>} : vector<16x16xi32>
    %c10_i32 = arith.constant 10 : i32
    %4 = vector.broadcast %c10_i32 : i32 to vector<16x16xi32>
    %5 = arith.cmpi sge, %2, %4 : vector<16x16xi32>
    %c10_i32_3 = arith.constant 10 : i32
    %6 = vector.broadcast %c10_i32_3 : i32 to vector<16x16xi32>
    %7 = arith.cmpi sge, %3, %6 : vector<16x16xi32>
    %8 = arith.ori %5, %7 : vector<16x16xi1>
    %cst = arith.constant 0.000000e+00 : f32
    %9 = vector.broadcast %cst : f32 to vector<16x16xf32>
    %10 = arith.select %8, %9, %1 : vector<16x16xi1>, vector<16x16xf32>
    %c10_i32_4 = arith.constant 10 : i32
    %11 = vector.broadcast %c10_i32_4 : i32 to vector<16x16xi32>
    %12 = arith.cmpi slt, %2, %11 : vector<16x16xi32>
    %c13_i32 = arith.constant 13 : i32
    %13 = vector.broadcast %c13_i32 : i32 to vector<16x16xi32>
    %14 = arith.cmpi sge, %2, %13 : vector<16x16xi32>
    %15 = arith.ori %12, %14 : vector<16x16xi1>
    %c13_i32_5 = arith.constant 13 : i32
    %16 = vector.broadcast %c13_i32_5 : i32 to vector<16x16xi32>
    %17 = arith.cmpi sge, %3, %16 : vector<16x16xi32>
    %18 = arith.ori %15, %17 : vector<16x16xi1>
    %cst_6 = arith.constant 0.000000e+00 : f32
    %19 = vector.broadcast %cst_6 : f32 to vector<16x16xf32>
    %20 = arith.select %18, %19, %1 : vector<16x16xi1>, vector<16x16xf32>
    %c13_i32_7 = arith.constant 13 : i32
    %21 = vector.broadcast %c13_i32_7 : i32 to vector<16x16xi32>
    %22 = arith.cmpi slt, %2, %21 : vector<16x16xi32>
    %cst_8 = arith.constant 0.000000e+00 : f32
    %23 = vector.broadcast %cst_8 : f32 to vector<16x16xf32>
    %24 = arith.select %22, %23, %1 : vector<16x16xi1>, vector<16x16xf32>
    %c0_9 = arith.constant 0 : index
    %c0_10 = arith.constant 0 : index
    %25 = vector.load %arg2[%c0_9, %c0_10] : memref<32x64xf32, #tpu.memory_space<vmem>>, vector<32x64xf32>
    %c0_11 = arith.constant 0 : index
    %c0_12 = arith.constant 0 : index
    %26 = vector.load %arg3[%c0_11, %c0_12] : memref<64x4xf32, #tpu.memory_space<vmem>>, vector<64x4xf32>
    %c0_13 = arith.constant 0 : index
    %c0_14 = arith.constant 0 : index
    %27 = vector.load %arg4[%c0_13, %c0_14] : memref<4x64xf32, #tpu.memory_space<vmem>>, vector<4x64xf32>
    %c0_15 = arith.constant 0 : index
    %c0_16 = arith.constant 0 : index
    %28 = vector.load %arg5[%c0_15, %c0_16] : memref<64x32xf32, #tpu.memory_space<vmem>>, vector<64x32xf32>
    %c0_17 = arith.constant 0 : index
    %c0_18 = arith.constant 0 : index
    %29 = vector.load %arg6[%c0_17, %c0_18] : memref<32x1xf32, #tpu.memory_space<vmem>>, vector<32x1xf32>
    %c0_19 = arith.constant 0 : index
    %c0_20 = arith.constant 0 : index
    %30 = vector.load %arg7[%c0_19, %c0_20] : memref<1x32xf32, #tpu.memory_space<vmem>>, vector<1x32xf32>
    %cst_21 = arith.constant dense<0.000000e+00> : vector<16x64xf32>
    %31 = tpu.matmul %0, %25, %cst_21 {dimension_numbers = #tpu.dot_dimension_numbers<[1], [0], [0], [1], [0, 0, 1, 1], [], []>} : vector<16x32xf32>, vector<32x64xf32>, vector<16x64xf32> -> vector<16x64xf32>
    %cst_22 = arith.constant dense<0.000000e+00> : vector<16x4xf32>
    %32 = tpu.matmul %31, %26, %cst_22 {dimension_numbers = #tpu.dot_dimension_numbers<[1], [0], [0], [1], [0, 0, 1, 1], [], []>} : vector<16x64xf32>, vector<64x4xf32>, vector<16x4xf32> -> vector<16x4xf32>
    %cst_23 = arith.constant dense<0.000000e+00> : vector<4x16xf32>
    %33 = tpu.matmul %27, %31, %cst_23 {dimension_numbers = #tpu.dot_dimension_numbers<[1], [1], [0], [0], [0, 0, 1, 0], [], []>} : vector<4x64xf32>, vector<16x64xf32>, vector<4x16xf32> -> vector<4x16xf32>
    %34 = vector.extract_strided_slice %32 {offsets = [0, 0], sizes = [16, 1], strides = [1, 1]} : vector<16x4xf32> to vector<16x1xf32>
    %35 = vector.extract_strided_slice %33 {offsets = [0, 0], sizes = [1, 16], strides = [1, 1]} : vector<4x16xf32> to vector<1x16xf32>
    %36 = vector.broadcast %34 : vector<16x1xf32> to vector<16x16xf32>
    %37 = vector.broadcast %35 : vector<1x16xf32> to vector<16x16xf32>
    %38 = arith.addf %36, %37 : vector<16x16xf32>
    %39 = vector.extract_strided_slice %32 {offsets = [0, 1], sizes = [16, 1], strides = [1, 1]} : vector<16x4xf32> to vector<16x1xf32>
    %40 = vector.extract_strided_slice %33 {offsets = [1, 0], sizes = [1, 16], strides = [1, 1]} : vector<4x16xf32> to vector<1x16xf32>
    %41 = vector.broadcast %39 : vector<16x1xf32> to vector<16x16xf32>
    %42 = vector.broadcast %40 : vector<1x16xf32> to vector<16x16xf32>
    %43 = arith.addf %41, %42 : vector<16x16xf32>
    %44 = vector.extract_strided_slice %32 {offsets = [0, 2], sizes = [16, 1], strides = [1, 1]} : vector<16x4xf32> to vector<16x1xf32>
    %45 = vector.extract_strided_slice %33 {offsets = [2, 0], sizes = [1, 16], strides = [1, 1]} : vector<4x16xf32> to vector<1x16xf32>
    %46 = vector.broadcast %44 : vector<16x1xf32> to vector<16x16xf32>
    %47 = vector.broadcast %45 : vector<1x16xf32> to vector<16x16xf32>
    %48 = arith.addf %46, %47 : vector<16x16xf32>
    %49 = vector.extract_strided_slice %32 {offsets = [0, 3], sizes = [16, 1], strides = [1, 1]} : vector<16x4xf32> to vector<16x1xf32>
    %50 = vector.extract_strided_slice %33 {offsets = [3, 0], sizes = [1, 16], strides = [1, 1]} : vector<4x16xf32> to vector<1x16xf32>
    %51 = vector.broadcast %49 : vector<16x1xf32> to vector<16x16xf32>
    %52 = vector.broadcast %50 : vector<1x16xf32> to vector<16x16xf32>
    %53 = arith.addf %51, %52 : vector<16x16xf32>
    %54 = tpu.concatenate %38, %43, %48, %53 in 0 : vector<16x16xf32>, vector<16x16xf32>, vector<16x16xf32>, vector<16x16xf32> -> vector<64x16xf32>
    %55 = tpu.concatenate %10, %10, %10, %10 in 0 : vector<16x16xf32>, vector<16x16xf32>, vector<16x16xf32>, vector<16x16xf32> -> vector<64x16xf32>
    %cst_24 = arith.constant 0.000000e+00 : f32
    %56 = vector.broadcast %cst_24 : f32 to vector<64x16xf32>
    %57 = arith.cmpf oge, %54, %56 : vector<64x16xf32>
    %cst_25 = arith.constant 2.000000e-01 : f32
    %58 = vector.broadcast %cst_25 : f32 to vector<64x16xf32>
    %59 = arith.mulf %58, %54 : vector<64x16xf32>
    %60 = arith.select %57, %54, %59 : vector<64x16xi1>, vector<64x16xf32>
    %cst_26 = arith.constant 0.000000e+00 : f32
    %61 = vector.broadcast %cst_26 : f32 to vector<64x16xf32>
    %62 = arith.cmpf oeq, %55, %61 : vector<64x16xf32>
    %cst_27 = arith.constant -1.000000e+09 : f32
    %63 = vector.broadcast %cst_27 : f32 to vector<64x16xf32>
    %64 = arith.select %62, %63, %60 : vector<64x16xi1>, vector<64x16xf32>
    %cst_28 = arith.constant dense<0xFF800000> : vector<64xf32>
    %65 = vector.multi_reduction <maximumf>, %64, %cst_28 [1] : vector<64x16xf32> to vector<64xf32>
    %66 = vector.shape_cast %65 : vector<64xf32> to vector<64x1xf32>
    %67 = vector.broadcast %66 : vector<64x1xf32> to vector<64x16xf32>
    %68 = arith.subf %64, %67 : vector<64x16xf32>
    %69 = math.exp %68 : vector<64x16xf32>
    %cst_29 = arith.constant dense<0.000000e+00> : vector<64xf32>
    %70 = vector.multi_reduction <add>, %69, %cst_29 [1] : vector<64x16xf32> to vector<64xf32>
    %71 = vector.shape_cast %70 : vector<64xf32> to vector<64x1xf32>
    %72 = tpu.reciprocal %71 : vector<64x1xf32> -> vector<64x1xf32>
    %73 = vector.broadcast %72 : vector<64x1xf32> to vector<64x16xf32>
    %74 = arith.mulf %69, %73 : vector<64x16xf32>
    %75 = vector.extract_strided_slice %74 {offsets = [0, 0], sizes = [16, 16], strides = [1, 1]} : vector<64x16xf32> to vector<16x16xf32>
    %76 = vector.extract_strided_slice %31 {offsets = [0, 0], sizes = [16, 16], strides = [1, 1]} : vector<16x64xf32> to vector<16x16xf32>
    %cst_30 = arith.constant dense<0.000000e+00> : vector<16x16xf32>
    %77 = tpu.matmul %75, %76, %cst_30 {dimension_numbers = #tpu.dot_dimension_numbers<[1], [0], [0], [1], [0, 0, 1, 1], [], []>} : vector<16x16xf32>, vector<16x16xf32>, vector<16x16xf32> -> vector<16x16xf32>
    %78 = vector.extract_strided_slice %74 {offsets = [16, 0], sizes = [16, 16], strides = [1, 1]} : vector<64x16xf32> to vector<16x16xf32>
    %79 = vector.extract_strided_slice %31 {offsets = [0, 16], sizes = [16, 16], strides = [1, 1]} : vector<16x64xf32> to vector<16x16xf32>
    %cst_31 = arith.constant dense<0.000000e+00> : vector<16x16xf32>
    %80 = tpu.matmul %78, %79, %cst_31 {dimension_numbers = #tpu.dot_dimension_numbers<[1], [0], [0], [1], [0, 0, 1, 1], [], []>} : vector<16x16xf32>, vector<16x16xf32>, vector<16x16xf32> -> vector<16x16xf32>
    %81 = vector.extract_strided_slice %74 {offsets = [32, 0], sizes = [16, 16], strides = [1, 1]} : vector<64x16xf32> to vector<16x16xf32>
    %82 = vector.extract_strided_slice %31 {offsets = [0, 32], sizes = [16, 16], strides = [1, 1]} : vector<16x64xf32> to vector<16x16xf32>
    %cst_32 = arith.constant dense<0.000000e+00> : vector<16x16xf32>
    %83 = tpu.matmul %81, %82, %cst_32 {dimension_numbers = #tpu.dot_dimension_numbers<[1], [0], [0], [1], [0, 0, 1, 1], [], []>} : vector<16x16xf32>, vector<16x16xf32>, vector<16x16xf32> -> vector<16x16xf32>
    %84 = vector.extract_strided_slice %74 {offsets = [48, 0], sizes = [16, 16], strides = [1, 1]} : vector<64x16xf32> to vector<16x16xf32>
    %85 = vector.extract_strided_slice %31 {offsets = [0, 48], sizes = [16, 16], strides = [1, 1]} : vector<16x64xf32> to vector<16x16xf32>
    %cst_33 = arith.constant dense<0.000000e+00> : vector<16x16xf32>
    %86 = tpu.matmul %84, %85, %cst_33 {dimension_numbers = #tpu.dot_dimension_numbers<[1], [0], [0], [1], [0, 0, 1, 1], [], []>} : vector<16x16xf32>, vector<16x16xf32>, vector<16x16xf32> -> vector<16x16xf32>
    %87 = tpu.concatenate %77, %80, %83, %86 in 1 : vector<16x16xf32>, vector<16x16xf32>, vector<16x16xf32>, vector<16x16xf32> -> vector<16x64xf32>
    %cst_34 = arith.constant 0.000000e+00 : f32
    %88 = vector.broadcast %cst_34 : f32 to vector<16x64xf32>
    %89 = arith.cmpf ogt, %87, %88 : vector<16x64xf32>
    %cst_35 = arith.constant 0.000000e+00 : f32
    %90 = vector.broadcast %cst_35 : f32 to vector<16x64xf32>
    %91 = arith.minimumf %87, %90 : vector<16x64xf32>
    %92 = math.exp %91 : vector<16x64xf32>
    %cst_36 = arith.constant 1.000000e+00 : f32
    %93 = vector.broadcast %cst_36 : f32 to vector<16x64xf32>
    %94 = arith.subf %92, %93 : vector<16x64xf32>
    %95 = arith.select %89, %87, %94 : vector<16x64xi1>, vector<16x64xf32>
    %cst_37 = arith.constant dense<0.000000e+00> : vector<16x32xf32>
    %96 = tpu.matmul %95, %28, %cst_37 {dimension_numbers = #tpu.dot_dimension_numbers<[1], [0], [0], [1], [0, 0, 1, 1], [], []>} : vector<16x64xf32>, vector<64x32xf32>, vector<16x32xf32> -> vector<16x32xf32>
    %cst_38 = arith.constant dense<0.000000e+00> : vector<16x1xf32>
    %97 = tpu.matmul %96, %29, %cst_38 {dimension_numbers = #tpu.dot_dimension_numbers<[1], [0], [0], [1], [0, 0, 1, 1], [], []>} : vector<16x32xf32>, vector<32x1xf32>, vector<16x1xf32> -> vector<16x1xf32>
    %cst_39 = arith.constant dense<0.000000e+00> : vector<1x16xf32>
    %98 = tpu.matmul %30, %96, %cst_39 {dimension_numbers = #tpu.dot_dimension_numbers<[1], [1], [0], [0], [0, 0, 1, 0], [], []>} : vector<1x32xf32>, vector<16x32xf32>, vector<1x16xf32> -> vector<1x16xf32>
    %99 = vector.broadcast %97 : vector<16x1xf32> to vector<16x16xf32>
    %100 = vector.broadcast %98 : vector<1x16xf32> to vector<16x16xf32>
    %101 = arith.addf %99, %100 : vector<16x16xf32>
    %cst_40 = arith.constant 0.000000e+00 : f32
    %102 = vector.broadcast %cst_40 : f32 to vector<16x16xf32>
    %103 = arith.cmpf oge, %101, %102 : vector<16x16xf32>
    %cst_41 = arith.constant 2.000000e-01 : f32
    %104 = vector.broadcast %cst_41 : f32 to vector<16x16xf32>
    %105 = arith.mulf %104, %101 : vector<16x16xf32>
    %106 = arith.select %103, %101, %105 : vector<16x16xi1>, vector<16x16xf32>
    %cst_42 = arith.constant 0.000000e+00 : f32
    %107 = vector.broadcast %cst_42 : f32 to vector<16x16xf32>
    %108 = arith.cmpf oeq, %10, %107 : vector<16x16xf32>
    %cst_43 = arith.constant -1.000000e+09 : f32
    %109 = vector.broadcast %cst_43 : f32 to vector<16x16xf32>
    %110 = arith.select %108, %109, %106 : vector<16x16xi1>, vector<16x16xf32>
    %cst_44 = arith.constant dense<0xFF800000> : vector<16xf32>
    %111 = vector.multi_reduction <maximumf>, %110, %cst_44 [1] : vector<16x16xf32> to vector<16xf32>
    %112 = vector.shape_cast %111 : vector<16xf32> to vector<16x1xf32>
    %113 = vector.broadcast %112 : vector<16x1xf32> to vector<16x16xf32>
    %114 = arith.subf %110, %113 : vector<16x16xf32>
    %115 = math.exp %114 : vector<16x16xf32>
    %cst_45 = arith.constant dense<0.000000e+00> : vector<16xf32>
    %116 = vector.multi_reduction <add>, %115, %cst_45 [1] : vector<16x16xf32> to vector<16xf32>
    %117 = vector.shape_cast %116 : vector<16xf32> to vector<16x1xf32>
    %118 = tpu.reciprocal %117 : vector<16x1xf32> -> vector<16x1xf32>
    %119 = vector.broadcast %118 : vector<16x1xf32> to vector<16x16xf32>
    %120 = arith.mulf %115, %119 : vector<16x16xf32>
    %cst_46 = arith.constant dense<0.000000e+00> : vector<16x32xf32>
    %121 = tpu.matmul %120, %96, %cst_46 {dimension_numbers = #tpu.dot_dimension_numbers<[1], [0], [0], [1], [0, 0, 1, 1], [], []>} : vector<16x16xf32>, vector<16x32xf32>, vector<16x32xf32> -> vector<16x32xf32>
    %cst_47 = arith.constant dense<0.000000e+00> : vector<16xf32>
    %122 = vector.multi_reduction <add>, %10, %cst_47 [1] : vector<16x16xf32> to vector<16xf32>
    %123 = vector.shape_cast %122 : vector<16xf32> to vector<16x1xf32>
    %cst_48 = arith.constant 0.000000e+00 : f32
    %124 = vector.broadcast %cst_48 : f32 to vector<16x1xf32>
    %125 = arith.cmpf oeq, %123, %124 : vector<16x1xf32>
    %cst_49 = arith.constant 0.000000e+00 : f32
    %126 = vector.shape_cast %125 : vector<16x1xi1> to vector<16x1xi1>
    %127 = vector.broadcast %126 : vector<16x1xi1> to vector<16x32xi1>
    %128 = vector.broadcast %cst_49 : f32 to vector<16x32xf32>
    %129 = arith.select %127, %128, %121 : vector<16x32xi1>, vector<16x32xf32>
    %130 = arith.addf %129, %0 : vector<16x32xf32>
    %cst_50 = arith.constant dense<0.000000e+00> : vector<16xf32>
    %131 = vector.multi_reduction <add>, %130, %cst_50 [1] : vector<16x32xf32> to vector<16xf32>
    %132 = vector.shape_cast %131 : vector<16xf32> to vector<16x1xf32>
    %cst_51 = arith.constant 3.200000e+01 : f32
    %133 = vector.broadcast %cst_51 : f32 to vector<16x1xf32>
    %134 = arith.divf %132, %133 : vector<16x1xf32>
    %135 = vector.broadcast %134 : vector<16x1xf32> to vector<16x32xf32>
    %136 = arith.subf %130, %135 : vector<16x32xf32>
    %137 = arith.mulf %136, %136 : vector<16x32xf32>
    %cst_52 = arith.constant dense<0.000000e+00> : vector<16xf32>
    %138 = vector.multi_reduction <add>, %137, %cst_52 [1] : vector<16x32xf32> to vector<16xf32>
    %139 = vector.shape_cast %138 : vector<16xf32> to vector<16x1xf32>
    %cst_53 = arith.constant 3.200000e+01 : f32
    %140 = vector.broadcast %cst_53 : f32 to vector<16x1xf32>
    %141 = arith.divf %139, %140 : vector<16x1xf32>
    %cst_54 = arith.constant 9.99999974E-6 : f32
    %142 = vector.broadcast %cst_54 : f32 to vector<16x1xf32>
    %143 = arith.addf %141, %142 : vector<16x1xf32>
    %144 = math.rsqrt %143 : vector<16x1xf32>
    %145 = vector.broadcast %144 : vector<16x1xf32> to vector<16x32xf32>
    %146 = arith.mulf %136, %145 : vector<16x32xf32>
    %c0_55 = arith.constant 0 : index
    %c0_56 = arith.constant 0 : index
    %147 = vector.load %arg8[%c0_55, %c0_56] : memref<32x64xf32, #tpu.memory_space<vmem>>, vector<32x64xf32>
    %c0_57 = arith.constant 0 : index
    %c0_58 = arith.constant 0 : index
    %148 = vector.load %arg9[%c0_57, %c0_58] : memref<64x4xf32, #tpu.memory_space<vmem>>, vector<64x4xf32>
    %c0_59 = arith.constant 0 : index
    %c0_60 = arith.constant 0 : index
    %149 = vector.load %arg10[%c0_59, %c0_60] : memref<4x64xf32, #tpu.memory_space<vmem>>, vector<4x64xf32>
    %c0_61 = arith.constant 0 : index
    %c0_62 = arith.constant 0 : index
    %150 = vector.load %arg11[%c0_61, %c0_62] : memref<64x32xf32, #tpu.memory_space<vmem>>, vector<64x32xf32>
    %c0_63 = arith.constant 0 : index
    %c0_64 = arith.constant 0 : index
    %151 = vector.load %arg12[%c0_63, %c0_64] : memref<32x1xf32, #tpu.memory_space<vmem>>, vector<32x1xf32>
    %c0_65 = arith.constant 0 : index
    %c0_66 = arith.constant 0 : index
    %152 = vector.load %arg13[%c0_65, %c0_66] : memref<1x32xf32, #tpu.memory_space<vmem>>, vector<1x32xf32>
    %cst_67 = arith.constant dense<0.000000e+00> : vector<16x64xf32>
    %153 = tpu.matmul %146, %147, %cst_67 {dimension_numbers = #tpu.dot_dimension_numbers<[1], [0], [0], [1], [0, 0, 1, 1], [], []>} : vector<16x32xf32>, vector<32x64xf32>, vector<16x64xf32> -> vector<16x64xf32>
    %cst_68 = arith.constant dense<0.000000e+00> : vector<16x4xf32>
    %154 = tpu.matmul %153, %148, %cst_68 {dimension_numbers = #tpu.dot_dimension_numbers<[1], [0], [0], [1], [0, 0, 1, 1], [], []>} : vector<16x64xf32>, vector<64x4xf32>, vector<16x4xf32> -> vector<16x4xf32>
    %cst_69 = arith.constant dense<0.000000e+00> : vector<4x16xf32>
    %155 = tpu.matmul %149, %153, %cst_69 {dimension_numbers = #tpu.dot_dimension_numbers<[1], [1], [0], [0], [0, 0, 1, 0], [], []>} : vector<4x64xf32>, vector<16x64xf32>, vector<4x16xf32> -> vector<4x16xf32>
    %156 = vector.extract_strided_slice %154 {offsets = [0, 0], sizes = [16, 1], strides = [1, 1]} : vector<16x4xf32> to vector<16x1xf32>
    %157 = vector.extract_strided_slice %155 {offsets = [0, 0], sizes = [1, 16], strides = [1, 1]} : vector<4x16xf32> to vector<1x16xf32>
    %158 = vector.broadcast %156 : vector<16x1xf32> to vector<16x16xf32>
    %159 = vector.broadcast %157 : vector<1x16xf32> to vector<16x16xf32>
    %160 = arith.addf %158, %159 : vector<16x16xf32>
    %161 = vector.extract_strided_slice %154 {offsets = [0, 1], sizes = [16, 1], strides = [1, 1]} : vector<16x4xf32> to vector<16x1xf32>
    %162 = vector.extract_strided_slice %155 {offsets = [1, 0], sizes = [1, 16], strides = [1, 1]} : vector<4x16xf32> to vector<1x16xf32>
    %163 = vector.broadcast %161 : vector<16x1xf32> to vector<16x16xf32>
    %164 = vector.broadcast %162 : vector<1x16xf32> to vector<16x16xf32>
    %165 = arith.addf %163, %164 : vector<16x16xf32>
    %166 = vector.extract_strided_slice %154 {offsets = [0, 2], sizes = [16, 1], strides = [1, 1]} : vector<16x4xf32> to vector<16x1xf32>
    %167 = vector.extract_strided_slice %155 {offsets = [2, 0], sizes = [1, 16], strides = [1, 1]} : vector<4x16xf32> to vector<1x16xf32>
    %168 = vector.broadcast %166 : vector<16x1xf32> to vector<16x16xf32>
    %169 = vector.broadcast %167 : vector<1x16xf32> to vector<16x16xf32>
    %170 = arith.addf %168, %169 : vector<16x16xf32>
    %171 = vector.extract_strided_slice %154 {offsets = [0, 3], sizes = [16, 1], strides = [1, 1]} : vector<16x4xf32> to vector<16x1xf32>
    %172 = vector.extract_strided_slice %155 {offsets = [3, 0], sizes = [1, 16], strides = [1, 1]} : vector<4x16xf32> to vector<1x16xf32>
    %173 = vector.broadcast %171 : vector<16x1xf32> to vector<16x16xf32>
    %174 = vector.broadcast %172 : vector<1x16xf32> to vector<16x16xf32>
    %175 = arith.addf %173, %174 : vector<16x16xf32>
    %176 = tpu.concatenate %160, %165, %170, %175 in 0 : vector<16x16xf32>, vector<16x16xf32>, vector<16x16xf32>, vector<16x16xf32> -> vector<64x16xf32>
    %177 = tpu.concatenate %20, %20, %20, %20 in 0 : vector<16x16xf32>, vector<16x16xf32>, vector<16x16xf32>, vector<16x16xf32> -> vector<64x16xf32>
    %cst_70 = arith.constant 0.000000e+00 : f32
    %178 = vector.broadcast %cst_70 : f32 to vector<64x16xf32>
    %179 = arith.cmpf oge, %176, %178 : vector<64x16xf32>
    %cst_71 = arith.constant 2.000000e-01 : f32
    %180 = vector.broadcast %cst_71 : f32 to vector<64x16xf32>
    %181 = arith.mulf %180, %176 : vector<64x16xf32>
    %182 = arith.select %179, %176, %181 : vector<64x16xi1>, vector<64x16xf32>
    %cst_72 = arith.constant 0.000000e+00 : f32
    %183 = vector.broadcast %cst_72 : f32 to vector<64x16xf32>
    %184 = arith.cmpf oeq, %177, %183 : vector<64x16xf32>
    %cst_73 = arith.constant -1.000000e+09 : f32
    %185 = vector.broadcast %cst_73 : f32 to vector<64x16xf32>
    %186 = arith.select %184, %185, %182 : vector<64x16xi1>, vector<64x16xf32>
    %cst_74 = arith.constant dense<0xFF800000> : vector<64xf32>
    %187 = vector.multi_reduction <maximumf>, %186, %cst_74 [1] : vector<64x16xf32> to vector<64xf32>
    %188 = vector.shape_cast %187 : vector<64xf32> to vector<64x1xf32>
    %189 = vector.broadcast %188 : vector<64x1xf32> to vector<64x16xf32>
    %190 = arith.subf %186, %189 : vector<64x16xf32>
    %191 = math.exp %190 : vector<64x16xf32>
    %cst_75 = arith.constant dense<0.000000e+00> : vector<64xf32>
    %192 = vector.multi_reduction <add>, %191, %cst_75 [1] : vector<64x16xf32> to vector<64xf32>
    %193 = vector.shape_cast %192 : vector<64xf32> to vector<64x1xf32>
    %194 = tpu.reciprocal %193 : vector<64x1xf32> -> vector<64x1xf32>
    %195 = vector.broadcast %194 : vector<64x1xf32> to vector<64x16xf32>
    %196 = arith.mulf %191, %195 : vector<64x16xf32>
    %197 = vector.extract_strided_slice %196 {offsets = [0, 0], sizes = [16, 16], strides = [1, 1]} : vector<64x16xf32> to vector<16x16xf32>
    %198 = vector.extract_strided_slice %153 {offsets = [0, 0], sizes = [16, 16], strides = [1, 1]} : vector<16x64xf32> to vector<16x16xf32>
    %cst_76 = arith.constant dense<0.000000e+00> : vector<16x16xf32>
    %199 = tpu.matmul %197, %198, %cst_76 {dimension_numbers = #tpu.dot_dimension_numbers<[1], [0], [0], [1], [0, 0, 1, 1], [], []>} : vector<16x16xf32>, vector<16x16xf32>, vector<16x16xf32> -> vector<16x16xf32>
    %200 = vector.extract_strided_slice %196 {offsets = [16, 0], sizes = [16, 16], strides = [1, 1]} : vector<64x16xf32> to vector<16x16xf32>
    %201 = vector.extract_strided_slice %153 {offsets = [0, 16], sizes = [16, 16], strides = [1, 1]} : vector<16x64xf32> to vector<16x16xf32>
    %cst_77 = arith.constant dense<0.000000e+00> : vector<16x16xf32>
    %202 = tpu.matmul %200, %201, %cst_77 {dimension_numbers = #tpu.dot_dimension_numbers<[1], [0], [0], [1], [0, 0, 1, 1], [], []>} : vector<16x16xf32>, vector<16x16xf32>, vector<16x16xf32> -> vector<16x16xf32>
    %203 = vector.extract_strided_slice %196 {offsets = [32, 0], sizes = [16, 16], strides = [1, 1]} : vector<64x16xf32> to vector<16x16xf32>
    %204 = vector.extract_strided_slice %153 {offsets = [0, 32], sizes = [16, 16], strides = [1, 1]} : vector<16x64xf32> to vector<16x16xf32>
    %cst_78 = arith.constant dense<0.000000e+00> : vector<16x16xf32>
    %205 = tpu.matmul %203, %204, %cst_78 {dimension_numbers = #tpu.dot_dimension_numbers<[1], [0], [0], [1], [0, 0, 1, 1], [], []>} : vector<16x16xf32>, vector<16x16xf32>, vector<16x16xf32> -> vector<16x16xf32>
    %206 = vector.extract_strided_slice %196 {offsets = [48, 0], sizes = [16, 16], strides = [1, 1]} : vector<64x16xf32> to vector<16x16xf32>
    %207 = vector.extract_strided_slice %153 {offsets = [0, 48], sizes = [16, 16], strides = [1, 1]} : vector<16x64xf32> to vector<16x16xf32>
    %cst_79 = arith.constant dense<0.000000e+00> : vector<16x16xf32>
    %208 = tpu.matmul %206, %207, %cst_79 {dimension_numbers = #tpu.dot_dimension_numbers<[1], [0], [0], [1], [0, 0, 1, 1], [], []>} : vector<16x16xf32>, vector<16x16xf32>, vector<16x16xf32> -> vector<16x16xf32>
    %209 = tpu.concatenate %199, %202, %205, %208 in 1 : vector<16x16xf32>, vector<16x16xf32>, vector<16x16xf32>, vector<16x16xf32> -> vector<16x64xf32>
    %cst_80 = arith.constant 0.000000e+00 : f32
    %210 = vector.broadcast %cst_80 : f32 to vector<16x64xf32>
    %211 = arith.cmpf ogt, %209, %210 : vector<16x64xf32>
    %cst_81 = arith.constant 0.000000e+00 : f32
    %212 = vector.broadcast %cst_81 : f32 to vector<16x64xf32>
    %213 = arith.minimumf %209, %212 : vector<16x64xf32>
    %214 = math.exp %213 : vector<16x64xf32>
    %cst_82 = arith.constant 1.000000e+00 : f32
    %215 = vector.broadcast %cst_82 : f32 to vector<16x64xf32>
    %216 = arith.subf %214, %215 : vector<16x64xf32>
    %217 = arith.select %211, %209, %216 : vector<16x64xi1>, vector<16x64xf32>
    %cst_83 = arith.constant dense<0.000000e+00> : vector<16x32xf32>
    %218 = tpu.matmul %217, %150, %cst_83 {dimension_numbers = #tpu.dot_dimension_numbers<[1], [0], [0], [1], [0, 0, 1, 1], [], []>} : vector<16x64xf32>, vector<64x32xf32>, vector<16x32xf32> -> vector<16x32xf32>
    %cst_84 = arith.constant dense<0.000000e+00> : vector<16x1xf32>
    %219 = tpu.matmul %218, %151, %cst_84 {dimension_numbers = #tpu.dot_dimension_numbers<[1], [0], [0], [1], [0, 0, 1, 1], [], []>} : vector<16x32xf32>, vector<32x1xf32>, vector<16x1xf32> -> vector<16x1xf32>
    %cst_85 = arith.constant dense<0.000000e+00> : vector<1x16xf32>
    %220 = tpu.matmul %152, %218, %cst_85 {dimension_numbers = #tpu.dot_dimension_numbers<[1], [1], [0], [0], [0, 0, 1, 0], [], []>} : vector<1x32xf32>, vector<16x32xf32>, vector<1x16xf32> -> vector<1x16xf32>
    %221 = vector.broadcast %219 : vector<16x1xf32> to vector<16x16xf32>
    %222 = vector.broadcast %220 : vector<1x16xf32> to vector<16x16xf32>
    %223 = arith.addf %221, %222 : vector<16x16xf32>
    %cst_86 = arith.constant 0.000000e+00 : f32
    %224 = vector.broadcast %cst_86 : f32 to vector<16x16xf32>
    %225 = arith.cmpf oge, %223, %224 : vector<16x16xf32>
    %cst_87 = arith.constant 2.000000e-01 : f32
    %226 = vector.broadcast %cst_87 : f32 to vector<16x16xf32>
    %227 = arith.mulf %226, %223 : vector<16x16xf32>
    %228 = arith.select %225, %223, %227 : vector<16x16xi1>, vector<16x16xf32>
    %cst_88 = arith.constant 0.000000e+00 : f32
    %229 = vector.broadcast %cst_88 : f32 to vector<16x16xf32>
    %230 = arith.cmpf oeq, %20, %229 : vector<16x16xf32>
    %cst_89 = arith.constant -1.000000e+09 : f32
    %231 = vector.broadcast %cst_89 : f32 to vector<16x16xf32>
    %232 = arith.select %230, %231, %228 : vector<16x16xi1>, vector<16x16xf32>
    %cst_90 = arith.constant dense<0xFF800000> : vector<16xf32>
    %233 = vector.multi_reduction <maximumf>, %232, %cst_90 [1] : vector<16x16xf32> to vector<16xf32>
    %234 = vector.shape_cast %233 : vector<16xf32> to vector<16x1xf32>
    %235 = vector.broadcast %234 : vector<16x1xf32> to vector<16x16xf32>
    %236 = arith.subf %232, %235 : vector<16x16xf32>
    %237 = math.exp %236 : vector<16x16xf32>
    %cst_91 = arith.constant dense<0.000000e+00> : vector<16xf32>
    %238 = vector.multi_reduction <add>, %237, %cst_91 [1] : vector<16x16xf32> to vector<16xf32>
    %239 = vector.shape_cast %238 : vector<16xf32> to vector<16x1xf32>
    %240 = tpu.reciprocal %239 : vector<16x1xf32> -> vector<16x1xf32>
    %241 = vector.broadcast %240 : vector<16x1xf32> to vector<16x16xf32>
    %242 = arith.mulf %237, %241 : vector<16x16xf32>
    %cst_92 = arith.constant dense<0.000000e+00> : vector<16x32xf32>
    %243 = tpu.matmul %242, %218, %cst_92 {dimension_numbers = #tpu.dot_dimension_numbers<[1], [0], [0], [1], [0, 0, 1, 1], [], []>} : vector<16x16xf32>, vector<16x32xf32>, vector<16x32xf32> -> vector<16x32xf32>
    %cst_93 = arith.constant dense<0.000000e+00> : vector<16xf32>
    %244 = vector.multi_reduction <add>, %20, %cst_93 [1] : vector<16x16xf32> to vector<16xf32>
    %245 = vector.shape_cast %244 : vector<16xf32> to vector<16x1xf32>
    %cst_94 = arith.constant 0.000000e+00 : f32
    %246 = vector.broadcast %cst_94 : f32 to vector<16x1xf32>
    %247 = arith.cmpf oeq, %245, %246 : vector<16x1xf32>
    %cst_95 = arith.constant 0.000000e+00 : f32
    %248 = vector.shape_cast %247 : vector<16x1xi1> to vector<16x1xi1>
    %249 = vector.broadcast %248 : vector<16x1xi1> to vector<16x32xi1>
    %250 = vector.broadcast %cst_95 : f32 to vector<16x32xf32>
    %251 = arith.select %249, %250, %243 : vector<16x32xi1>, vector<16x32xf32>
    %252 = arith.addf %251, %146 : vector<16x32xf32>
    %cst_96 = arith.constant dense<0.000000e+00> : vector<16xf32>
    %253 = vector.multi_reduction <add>, %252, %cst_96 [1] : vector<16x32xf32> to vector<16xf32>
    %254 = vector.shape_cast %253 : vector<16xf32> to vector<16x1xf32>
    %cst_97 = arith.constant 3.200000e+01 : f32
    %255 = vector.broadcast %cst_97 : f32 to vector<16x1xf32>
    %256 = arith.divf %254, %255 : vector<16x1xf32>
    %257 = vector.broadcast %256 : vector<16x1xf32> to vector<16x32xf32>
    %258 = arith.subf %252, %257 : vector<16x32xf32>
    %259 = arith.mulf %258, %258 : vector<16x32xf32>
    %cst_98 = arith.constant dense<0.000000e+00> : vector<16xf32>
    %260 = vector.multi_reduction <add>, %259, %cst_98 [1] : vector<16x32xf32> to vector<16xf32>
    %261 = vector.shape_cast %260 : vector<16xf32> to vector<16x1xf32>
    %cst_99 = arith.constant 3.200000e+01 : f32
    %262 = vector.broadcast %cst_99 : f32 to vector<16x1xf32>
    %263 = arith.divf %261, %262 : vector<16x1xf32>
    %cst_100 = arith.constant 9.99999974E-6 : f32
    %264 = vector.broadcast %cst_100 : f32 to vector<16x1xf32>
    %265 = arith.addf %263, %264 : vector<16x1xf32>
    %266 = math.rsqrt %265 : vector<16x1xf32>
    %267 = vector.broadcast %266 : vector<16x1xf32> to vector<16x32xf32>
    %268 = arith.mulf %258, %267 : vector<16x32xf32>
    %c0_101 = arith.constant 0 : index
    %c0_102 = arith.constant 0 : index
    %269 = vector.load %arg14[%c0_101, %c0_102] : memref<32x64xf32, #tpu.memory_space<vmem>>, vector<32x64xf32>
    %c0_103 = arith.constant 0 : index
    %c0_104 = arith.constant 0 : index
    %270 = vector.load %arg15[%c0_103, %c0_104] : memref<64x4xf32, #tpu.memory_space<vmem>>, vector<64x4xf32>
    %c0_105 = arith.constant 0 : index
    %c0_106 = arith.constant 0 : index
    %271 = vector.load %arg16[%c0_105, %c0_106] : memref<4x64xf32, #tpu.memory_space<vmem>>, vector<4x64xf32>
    %c0_107 = arith.constant 0 : index
    %c0_108 = arith.constant 0 : index
    %272 = vector.load %arg17[%c0_107, %c0_108] : memref<64x32xf32, #tpu.memory_space<vmem>>, vector<64x32xf32>
    %c0_109 = arith.constant 0 : index
    %c0_110 = arith.constant 0 : index
    %273 = vector.load %arg18[%c0_109, %c0_110] : memref<32x1xf32, #tpu.memory_space<vmem>>, vector<32x1xf32>
    %c0_111 = arith.constant 0 : index
    %c0_112 = arith.constant 0 : index
    %274 = vector.load %arg19[%c0_111, %c0_112] : memref<1x32xf32, #tpu.memory_space<vmem>>, vector<1x32xf32>
    %cst_113 = arith.constant dense<0.000000e+00> : vector<16x64xf32>
    %275 = tpu.matmul %268, %269, %cst_113 {dimension_numbers = #tpu.dot_dimension_numbers<[1], [0], [0], [1], [0, 0, 1, 1], [], []>} : vector<16x32xf32>, vector<32x64xf32>, vector<16x64xf32> -> vector<16x64xf32>
    %cst_114 = arith.constant dense<0.000000e+00> : vector<16x4xf32>
    %276 = tpu.matmul %275, %270, %cst_114 {dimension_numbers = #tpu.dot_dimension_numbers<[1], [0], [0], [1], [0, 0, 1, 1], [], []>} : vector<16x64xf32>, vector<64x4xf32>, vector<16x4xf32> -> vector<16x4xf32>
    %cst_115 = arith.constant dense<0.000000e+00> : vector<4x16xf32>
    %277 = tpu.matmul %271, %275, %cst_115 {dimension_numbers = #tpu.dot_dimension_numbers<[1], [1], [0], [0], [0, 0, 1, 0], [], []>} : vector<4x64xf32>, vector<16x64xf32>, vector<4x16xf32> -> vector<4x16xf32>
    %278 = vector.extract_strided_slice %276 {offsets = [0, 0], sizes = [16, 1], strides = [1, 1]} : vector<16x4xf32> to vector<16x1xf32>
    %279 = vector.extract_strided_slice %277 {offsets = [0, 0], sizes = [1, 16], strides = [1, 1]} : vector<4x16xf32> to vector<1x16xf32>
    %280 = vector.broadcast %278 : vector<16x1xf32> to vector<16x16xf32>
    %281 = vector.broadcast %279 : vector<1x16xf32> to vector<16x16xf32>
    %282 = arith.addf %280, %281 : vector<16x16xf32>
    %283 = vector.extract_strided_slice %276 {offsets = [0, 1], sizes = [16, 1], strides = [1, 1]} : vector<16x4xf32> to vector<16x1xf32>
    %284 = vector.extract_strided_slice %277 {offsets = [1, 0], sizes = [1, 16], strides = [1, 1]} : vector<4x16xf32> to vector<1x16xf32>
    %285 = vector.broadcast %283 : vector<16x1xf32> to vector<16x16xf32>
    %286 = vector.broadcast %284 : vector<1x16xf32> to vector<16x16xf32>
    %287 = arith.addf %285, %286 : vector<16x16xf32>
    %288 = vector.extract_strided_slice %276 {offsets = [0, 2], sizes = [16, 1], strides = [1, 1]} : vector<16x4xf32> to vector<16x1xf32>
    %289 = vector.extract_strided_slice %277 {offsets = [2, 0], sizes = [1, 16], strides = [1, 1]} : vector<4x16xf32> to vector<1x16xf32>
    %290 = vector.broadcast %288 : vector<16x1xf32> to vector<16x16xf32>
    %291 = vector.broadcast %289 : vector<1x16xf32> to vector<16x16xf32>
    %292 = arith.addf %290, %291 : vector<16x16xf32>
    %293 = vector.extract_strided_slice %276 {offsets = [0, 3], sizes = [16, 1], strides = [1, 1]} : vector<16x4xf32> to vector<16x1xf32>
    %294 = vector.extract_strided_slice %277 {offsets = [3, 0], sizes = [1, 16], strides = [1, 1]} : vector<4x16xf32> to vector<1x16xf32>
    %295 = vector.broadcast %293 : vector<16x1xf32> to vector<16x16xf32>
    %296 = vector.broadcast %294 : vector<1x16xf32> to vector<16x16xf32>
    %297 = arith.addf %295, %296 : vector<16x16xf32>
    %298 = tpu.concatenate %282, %287, %292, %297 in 0 : vector<16x16xf32>, vector<16x16xf32>, vector<16x16xf32>, vector<16x16xf32> -> vector<64x16xf32>
    %299 = tpu.concatenate %24, %24, %24, %24 in 0 : vector<16x16xf32>, vector<16x16xf32>, vector<16x16xf32>, vector<16x16xf32> -> vector<64x16xf32>
    %cst_116 = arith.constant 0.000000e+00 : f32
    %300 = vector.broadcast %cst_116 : f32 to vector<64x16xf32>
    %301 = arith.cmpf oge, %298, %300 : vector<64x16xf32>
    %cst_117 = arith.constant 2.000000e-01 : f32
    %302 = vector.broadcast %cst_117 : f32 to vector<64x16xf32>
    %303 = arith.mulf %302, %298 : vector<64x16xf32>
    %304 = arith.select %301, %298, %303 : vector<64x16xi1>, vector<64x16xf32>
    %cst_118 = arith.constant 0.000000e+00 : f32
    %305 = vector.broadcast %cst_118 : f32 to vector<64x16xf32>
    %306 = arith.cmpf oeq, %299, %305 : vector<64x16xf32>
    %cst_119 = arith.constant -1.000000e+09 : f32
    %307 = vector.broadcast %cst_119 : f32 to vector<64x16xf32>
    %308 = arith.select %306, %307, %304 : vector<64x16xi1>, vector<64x16xf32>
    %cst_120 = arith.constant dense<0xFF800000> : vector<64xf32>
    %309 = vector.multi_reduction <maximumf>, %308, %cst_120 [1] : vector<64x16xf32> to vector<64xf32>
    %310 = vector.shape_cast %309 : vector<64xf32> to vector<64x1xf32>
    %311 = vector.broadcast %310 : vector<64x1xf32> to vector<64x16xf32>
    %312 = arith.subf %308, %311 : vector<64x16xf32>
    %313 = math.exp %312 : vector<64x16xf32>
    %cst_121 = arith.constant dense<0.000000e+00> : vector<64xf32>
    %314 = vector.multi_reduction <add>, %313, %cst_121 [1] : vector<64x16xf32> to vector<64xf32>
    %315 = vector.shape_cast %314 : vector<64xf32> to vector<64x1xf32>
    %316 = tpu.reciprocal %315 : vector<64x1xf32> -> vector<64x1xf32>
    %317 = vector.broadcast %316 : vector<64x1xf32> to vector<64x16xf32>
    %318 = arith.mulf %313, %317 : vector<64x16xf32>
    %319 = vector.extract_strided_slice %318 {offsets = [0, 0], sizes = [16, 16], strides = [1, 1]} : vector<64x16xf32> to vector<16x16xf32>
    %320 = vector.extract_strided_slice %275 {offsets = [0, 0], sizes = [16, 16], strides = [1, 1]} : vector<16x64xf32> to vector<16x16xf32>
    %cst_122 = arith.constant dense<0.000000e+00> : vector<16x16xf32>
    %321 = tpu.matmul %319, %320, %cst_122 {dimension_numbers = #tpu.dot_dimension_numbers<[1], [0], [0], [1], [0, 0, 1, 1], [], []>} : vector<16x16xf32>, vector<16x16xf32>, vector<16x16xf32> -> vector<16x16xf32>
    %322 = vector.extract_strided_slice %318 {offsets = [16, 0], sizes = [16, 16], strides = [1, 1]} : vector<64x16xf32> to vector<16x16xf32>
    %323 = vector.extract_strided_slice %275 {offsets = [0, 16], sizes = [16, 16], strides = [1, 1]} : vector<16x64xf32> to vector<16x16xf32>
    %cst_123 = arith.constant dense<0.000000e+00> : vector<16x16xf32>
    %324 = tpu.matmul %322, %323, %cst_123 {dimension_numbers = #tpu.dot_dimension_numbers<[1], [0], [0], [1], [0, 0, 1, 1], [], []>} : vector<16x16xf32>, vector<16x16xf32>, vector<16x16xf32> -> vector<16x16xf32>
    %325 = vector.extract_strided_slice %318 {offsets = [32, 0], sizes = [16, 16], strides = [1, 1]} : vector<64x16xf32> to vector<16x16xf32>
    %326 = vector.extract_strided_slice %275 {offsets = [0, 32], sizes = [16, 16], strides = [1, 1]} : vector<16x64xf32> to vector<16x16xf32>
    %cst_124 = arith.constant dense<0.000000e+00> : vector<16x16xf32>
    %327 = tpu.matmul %325, %326, %cst_124 {dimension_numbers = #tpu.dot_dimension_numbers<[1], [0], [0], [1], [0, 0, 1, 1], [], []>} : vector<16x16xf32>, vector<16x16xf32>, vector<16x16xf32> -> vector<16x16xf32>
    %328 = vector.extract_strided_slice %318 {offsets = [48, 0], sizes = [16, 16], strides = [1, 1]} : vector<64x16xf32> to vector<16x16xf32>
    %329 = vector.extract_strided_slice %275 {offsets = [0, 48], sizes = [16, 16], strides = [1, 1]} : vector<16x64xf32> to vector<16x16xf32>
    %cst_125 = arith.constant dense<0.000000e+00> : vector<16x16xf32>
    %330 = tpu.matmul %328, %329, %cst_125 {dimension_numbers = #tpu.dot_dimension_numbers<[1], [0], [0], [1], [0, 0, 1, 1], [], []>} : vector<16x16xf32>, vector<16x16xf32>, vector<16x16xf32> -> vector<16x16xf32>
    %331 = tpu.concatenate %321, %324, %327, %330 in 1 : vector<16x16xf32>, vector<16x16xf32>, vector<16x16xf32>, vector<16x16xf32> -> vector<16x64xf32>
    %cst_126 = arith.constant 0.000000e+00 : f32
    %332 = vector.broadcast %cst_126 : f32 to vector<16x64xf32>
    %333 = arith.cmpf ogt, %331, %332 : vector<16x64xf32>
    %cst_127 = arith.constant 0.000000e+00 : f32
    %334 = vector.broadcast %cst_127 : f32 to vector<16x64xf32>
    %335 = arith.minimumf %331, %334 : vector<16x64xf32>
    %336 = math.exp %335 : vector<16x64xf32>
    %cst_128 = arith.constant 1.000000e+00 : f32
    %337 = vector.broadcast %cst_128 : f32 to vector<16x64xf32>
    %338 = arith.subf %336, %337 : vector<16x64xf32>
    %339 = arith.select %333, %331, %338 : vector<16x64xi1>, vector<16x64xf32>
    %cst_129 = arith.constant dense<0.000000e+00> : vector<16x32xf32>
    %340 = tpu.matmul %339, %272, %cst_129 {dimension_numbers = #tpu.dot_dimension_numbers<[1], [0], [0], [1], [0, 0, 1, 1], [], []>} : vector<16x64xf32>, vector<64x32xf32>, vector<16x32xf32> -> vector<16x32xf32>
    %cst_130 = arith.constant dense<0.000000e+00> : vector<16x1xf32>
    %341 = tpu.matmul %340, %273, %cst_130 {dimension_numbers = #tpu.dot_dimension_numbers<[1], [0], [0], [1], [0, 0, 1, 1], [], []>} : vector<16x32xf32>, vector<32x1xf32>, vector<16x1xf32> -> vector<16x1xf32>
    %cst_131 = arith.constant dense<0.000000e+00> : vector<1x16xf32>
    %342 = tpu.matmul %274, %340, %cst_131 {dimension_numbers = #tpu.dot_dimension_numbers<[1], [1], [0], [0], [0, 0, 1, 0], [], []>} : vector<1x32xf32>, vector<16x32xf32>, vector<1x16xf32> -> vector<1x16xf32>
    %343 = vector.broadcast %341 : vector<16x1xf32> to vector<16x16xf32>
    %344 = vector.broadcast %342 : vector<1x16xf32> to vector<16x16xf32>
    %345 = arith.addf %343, %344 : vector<16x16xf32>
    %cst_132 = arith.constant 0.000000e+00 : f32
    %346 = vector.broadcast %cst_132 : f32 to vector<16x16xf32>
    %347 = arith.cmpf oge, %345, %346 : vector<16x16xf32>
    %cst_133 = arith.constant 2.000000e-01 : f32
    %348 = vector.broadcast %cst_133 : f32 to vector<16x16xf32>
    %349 = arith.mulf %348, %345 : vector<16x16xf32>
    %350 = arith.select %347, %345, %349 : vector<16x16xi1>, vector<16x16xf32>
    %cst_134 = arith.constant 0.000000e+00 : f32
    %351 = vector.broadcast %cst_134 : f32 to vector<16x16xf32>
    %352 = arith.cmpf oeq, %24, %351 : vector<16x16xf32>
    %cst_135 = arith.constant -1.000000e+09 : f32
    %353 = vector.broadcast %cst_135 : f32 to vector<16x16xf32>
    %354 = arith.select %352, %353, %350 : vector<16x16xi1>, vector<16x16xf32>
    %cst_136 = arith.constant dense<0xFF800000> : vector<16xf32>
    %355 = vector.multi_reduction <maximumf>, %354, %cst_136 [1] : vector<16x16xf32> to vector<16xf32>
    %356 = vector.shape_cast %355 : vector<16xf32> to vector<16x1xf32>
    %357 = vector.broadcast %356 : vector<16x1xf32> to vector<16x16xf32>
    %358 = arith.subf %354, %357 : vector<16x16xf32>
    %359 = math.exp %358 : vector<16x16xf32>
    %cst_137 = arith.constant dense<0.000000e+00> : vector<16xf32>
    %360 = vector.multi_reduction <add>, %359, %cst_137 [1] : vector<16x16xf32> to vector<16xf32>
    %361 = vector.shape_cast %360 : vector<16xf32> to vector<16x1xf32>
    %362 = tpu.reciprocal %361 : vector<16x1xf32> -> vector<16x1xf32>
    %363 = vector.broadcast %362 : vector<16x1xf32> to vector<16x16xf32>
    %364 = arith.mulf %359, %363 : vector<16x16xf32>
    %cst_138 = arith.constant dense<0.000000e+00> : vector<16x32xf32>
    %365 = tpu.matmul %364, %340, %cst_138 {dimension_numbers = #tpu.dot_dimension_numbers<[1], [0], [0], [1], [0, 0, 1, 1], [], []>} : vector<16x16xf32>, vector<16x32xf32>, vector<16x32xf32> -> vector<16x32xf32>
    %cst_139 = arith.constant dense<0.000000e+00> : vector<16xf32>
    %366 = vector.multi_reduction <add>, %24, %cst_139 [1] : vector<16x16xf32> to vector<16xf32>
    %367 = vector.shape_cast %366 : vector<16xf32> to vector<16x1xf32>
    %cst_140 = arith.constant 0.000000e+00 : f32
    %368 = vector.broadcast %cst_140 : f32 to vector<16x1xf32>
    %369 = arith.cmpf oeq, %367, %368 : vector<16x1xf32>
    %cst_141 = arith.constant 0.000000e+00 : f32
    %370 = vector.shape_cast %369 : vector<16x1xi1> to vector<16x1xi1>
    %371 = vector.broadcast %370 : vector<16x1xi1> to vector<16x32xi1>
    %372 = vector.broadcast %cst_141 : f32 to vector<16x32xf32>
    %373 = arith.select %371, %372, %365 : vector<16x32xi1>, vector<16x32xf32>
    %374 = arith.addf %373, %268 : vector<16x32xf32>
    %cst_142 = arith.constant dense<0.000000e+00> : vector<16xf32>
    %375 = vector.multi_reduction <add>, %374, %cst_142 [1] : vector<16x32xf32> to vector<16xf32>
    %376 = vector.shape_cast %375 : vector<16xf32> to vector<16x1xf32>
    %cst_143 = arith.constant 3.200000e+01 : f32
    %377 = vector.broadcast %cst_143 : f32 to vector<16x1xf32>
    %378 = arith.divf %376, %377 : vector<16x1xf32>
    %379 = vector.broadcast %378 : vector<16x1xf32> to vector<16x32xf32>
    %380 = arith.subf %374, %379 : vector<16x32xf32>
    %381 = arith.mulf %380, %380 : vector<16x32xf32>
    %cst_144 = arith.constant dense<0.000000e+00> : vector<16xf32>
    %382 = vector.multi_reduction <add>, %381, %cst_144 [1] : vector<16x32xf32> to vector<16xf32>
    %383 = vector.shape_cast %382 : vector<16xf32> to vector<16x1xf32>
    %cst_145 = arith.constant 3.200000e+01 : f32
    %384 = vector.broadcast %cst_145 : f32 to vector<16x1xf32>
    %385 = arith.divf %383, %384 : vector<16x1xf32>
    %cst_146 = arith.constant 9.99999974E-6 : f32
    %386 = vector.broadcast %cst_146 : f32 to vector<16x1xf32>
    %387 = arith.addf %385, %386 : vector<16x1xf32>
    %388 = math.rsqrt %387 : vector<16x1xf32>
    %389 = vector.broadcast %388 : vector<16x1xf32> to vector<16x32xf32>
    %390 = arith.mulf %380, %389 : vector<16x32xf32>
    %c10_i32_147 = arith.constant 10 : i32
    %391 = vector.broadcast %c10_i32_147 : i32 to vector<16x16xi32>
    %392 = arith.cmpi slt, %2, %391 : vector<16x16xi32>
    %c10_i32_148 = arith.constant 10 : i32
    %393 = vector.broadcast %c10_i32_148 : i32 to vector<16x16xi32>
    %394 = arith.cmpi sge, %3, %393 : vector<16x16xi32>
    %395 = arith.andi %392, %394 : vector<16x16xi1>
    %c13_i32_149 = arith.constant 13 : i32
    %396 = vector.broadcast %c13_i32_149 : i32 to vector<16x16xi32>
    %397 = arith.cmpi slt, %3, %396 : vector<16x16xi32>
    %398 = arith.andi %395, %397 : vector<16x16xi1>
    %cst_150 = arith.constant 0.000000e+00 : f32
    %399 = vector.broadcast %cst_150 : f32 to vector<16x16xf32>
    %400 = arith.select %398, %1, %399 : vector<16x16xi1>, vector<16x16xf32>
    %c10_i32_151 = arith.constant 10 : i32
    %401 = vector.broadcast %c10_i32_151 : i32 to vector<16x16xi32>
    %402 = arith.cmpi sge, %2, %401 : vector<16x16xi32>
    %c13_i32_152 = arith.constant 13 : i32
    %403 = vector.broadcast %c13_i32_152 : i32 to vector<16x16xi32>
    %404 = arith.cmpi slt, %2, %403 : vector<16x16xi32>
    %405 = arith.andi %402, %404 : vector<16x16xi1>
    %c13_i32_153 = arith.constant 13 : i32
    %406 = vector.broadcast %c13_i32_153 : i32 to vector<16x16xi32>
    %407 = arith.cmpi sge, %3, %406 : vector<16x16xi32>
    %408 = arith.andi %405, %407 : vector<16x16xi1>
    %cst_154 = arith.constant 0.000000e+00 : f32
    %409 = vector.broadcast %cst_154 : f32 to vector<16x16xf32>
    %410 = arith.select %408, %1, %409 : vector<16x16xi1>, vector<16x16xf32>
    %411 = tpu.iota {dimensions = array<i32: 0>} : vector<16x1xi32>
    %cst_155 = arith.constant dense<0.000000e+00> : vector<16x32xf32>
    %412 = tpu.matmul %400, %268, %cst_155 {dimension_numbers = #tpu.dot_dimension_numbers<[1], [0], [0], [1], [0, 0, 1, 1], [], []>} : vector<16x16xf32>, vector<16x32xf32>, vector<16x32xf32> -> vector<16x32xf32>
    %c10_i32_156 = arith.constant 10 : i32
    %413 = vector.broadcast %c10_i32_156 : i32 to vector<16x1xi32>
    %414 = arith.cmpi slt, %411, %413 : vector<16x1xi32>
    %415 = vector.shape_cast %414 : vector<16x1xi1> to vector<16x1xi1>
    %416 = vector.broadcast %415 : vector<16x1xi1> to vector<16x32xi1>
    %417 = arith.select %416, %412, %268 : vector<16x32xi1>, vector<16x32xf32>
    %cst_157 = arith.constant dense<0.000000e+00> : vector<16x32xf32>
    %418 = tpu.matmul %410, %390, %cst_157 {dimension_numbers = #tpu.dot_dimension_numbers<[1], [0], [0], [1], [0, 0, 1, 1], [], []>} : vector<16x16xf32>, vector<16x32xf32>, vector<16x32xf32> -> vector<16x32xf32>
    %c10_i32_158 = arith.constant 10 : i32
    %419 = vector.broadcast %c10_i32_158 : i32 to vector<16x1xi32>
    %420 = arith.cmpi sge, %411, %419 : vector<16x1xi32>
    %c13_i32_159 = arith.constant 13 : i32
    %421 = vector.broadcast %c13_i32_159 : i32 to vector<16x1xi32>
    %422 = arith.cmpi slt, %411, %421 : vector<16x1xi32>
    %423 = arith.andi %420, %422 : vector<16x1xi1>
    %424 = vector.shape_cast %423 : vector<16x1xi1> to vector<16x1xi1>
    %425 = vector.broadcast %424 : vector<16x1xi1> to vector<16x32xi1>
    %426 = arith.select %425, %418, %390 : vector<16x32xi1>, vector<16x32xf32>
    %cst_160 = arith.constant dense<0.000000e+00> : vector<16x32xf32>
    %427 = tpu.matmul %400, %426, %cst_160 {dimension_numbers = #tpu.dot_dimension_numbers<[1], [0], [0], [1], [0, 0, 1, 1], [], []>} : vector<16x16xf32>, vector<16x32xf32>, vector<16x32xf32> -> vector<16x32xf32>
    %c10_i32_161 = arith.constant 10 : i32
    %428 = vector.broadcast %c10_i32_161 : i32 to vector<16x1xi32>
    %429 = arith.cmpi slt, %411, %428 : vector<16x1xi32>
    %430 = vector.shape_cast %429 : vector<16x1xi1> to vector<16x1xi1>
    %431 = vector.broadcast %430 : vector<16x1xi1> to vector<16x32xi1>
    %432 = arith.select %431, %427, %426 : vector<16x32xi1>, vector<16x32xf32>
    %433 = tpu.concatenate %432, %417, %146 in 1 : vector<16x32xf32>, vector<16x32xf32>, vector<16x32xf32> -> vector<16x96xf32>
    %c0_162 = arith.constant 0 : index
    %c0_163 = arith.constant 0 : index
    %434 = vector.load %arg20[%c0_162, %c0_163] : memref<96x64xf32, #tpu.memory_space<vmem>>, vector<96x64xf32>
    %cst_164 = arith.constant dense<0.000000e+00> : vector<16x64xf32>
    %435 = tpu.matmul %433, %434, %cst_164 {dimension_numbers = #tpu.dot_dimension_numbers<[1], [0], [0], [1], [0, 0, 1, 1], [], []>} : vector<16x96xf32>, vector<96x64xf32>, vector<16x64xf32> -> vector<16x64xf32>
    %c0_165 = arith.constant 0 : index
    %c0_166 = arith.constant 0 : index
    %436 = vector.load %arg21[%c0_165, %c0_166] : memref<1x64xf32, #tpu.memory_space<vmem>>, vector<1x64xf32>
    %437 = vector.broadcast %436 : vector<1x64xf32> to vector<16x64xf32>
    %438 = arith.addf %435, %437 : vector<16x64xf32>
    %cst_167 = arith.constant 0.000000e+00 : f32
    %439 = vector.broadcast %cst_167 : f32 to vector<16x64xf32>
    %440 = arith.cmpf oge, %438, %439 : vector<16x64xf32>
    %cst_168 = arith.constant 0.00999999977 : f32
    %441 = vector.broadcast %cst_168 : f32 to vector<16x64xf32>
    %442 = arith.mulf %441, %438 : vector<16x64xf32>
    %443 = arith.select %440, %438, %442 : vector<16x64xi1>, vector<16x64xf32>
    %c0_169 = arith.constant 0 : index
    %c0_170 = arith.constant 0 : index
    %444 = vector.load %arg22[%c0_169, %c0_170] : memref<64x64xf32, #tpu.memory_space<vmem>>, vector<64x64xf32>
    %cst_171 = arith.constant dense<0.000000e+00> : vector<16x64xf32>
    %445 = tpu.matmul %443, %444, %cst_171 {dimension_numbers = #tpu.dot_dimension_numbers<[1], [0], [0], [1], [0, 0, 1, 1], [], []>} : vector<16x64xf32>, vector<64x64xf32>, vector<16x64xf32> -> vector<16x64xf32>
    %c0_172 = arith.constant 0 : index
    %c0_173 = arith.constant 0 : index
    %446 = vector.load %arg23[%c0_172, %c0_173] : memref<1x64xf32, #tpu.memory_space<vmem>>, vector<1x64xf32>
    %447 = vector.broadcast %446 : vector<1x64xf32> to vector<16x64xf32>
    %448 = arith.addf %445, %447 : vector<16x64xf32>
    %cst_174 = arith.constant 0.000000e+00 : f32
    %449 = vector.broadcast %cst_174 : f32 to vector<16x64xf32>
    %450 = arith.cmpf oge, %448, %449 : vector<16x64xf32>
    %cst_175 = arith.constant 0.00999999977 : f32
    %451 = vector.broadcast %cst_175 : f32 to vector<16x64xf32>
    %452 = arith.mulf %451, %448 : vector<16x64xf32>
    %453 = arith.select %450, %448, %452 : vector<16x64xi1>, vector<16x64xf32>
    %c0_176 = arith.constant 0 : index
    %c0_177 = arith.constant 0 : index
    %454 = vector.load %arg24[%c0_176, %c0_177] : memref<64x32xf32, #tpu.memory_space<vmem>>, vector<64x32xf32>
    %cst_178 = arith.constant dense<0.000000e+00> : vector<16x32xf32>
    %455 = tpu.matmul %453, %454, %cst_178 {dimension_numbers = #tpu.dot_dimension_numbers<[1], [0], [0], [1], [0, 0, 1, 1], [], []>} : vector<16x64xf32>, vector<64x32xf32>, vector<16x32xf32> -> vector<16x32xf32>
    %c0_179 = arith.constant 0 : index
    %c0_180 = arith.constant 0 : index
    %456 = vector.load %arg25[%c0_179, %c0_180] : memref<1x32xf32, #tpu.memory_space<vmem>>, vector<1x32xf32>
    %457 = vector.broadcast %456 : vector<1x32xf32> to vector<16x32xf32>
    %458 = arith.addf %455, %457 : vector<16x32xf32>
    %cst_181 = arith.constant 0.000000e+00 : f32
    %459 = vector.broadcast %cst_181 : f32 to vector<16x32xf32>
    %460 = arith.cmpf oge, %458, %459 : vector<16x32xf32>
    %cst_182 = arith.constant 0.00999999977 : f32
    %461 = vector.broadcast %cst_182 : f32 to vector<16x32xf32>
    %462 = arith.mulf %461, %458 : vector<16x32xf32>
    %463 = arith.select %460, %458, %462 : vector<16x32xi1>, vector<16x32xf32>
    %464 = arith.addf %463, %0 : vector<16x32xf32>
    %cst_183 = arith.constant dense<0.000000e+00> : vector<16xf32>
    %465 = vector.multi_reduction <add>, %464, %cst_183 [1] : vector<16x32xf32> to vector<16xf32>
    %466 = vector.shape_cast %465 : vector<16xf32> to vector<16x1xf32>
    %cst_184 = arith.constant 3.200000e+01 : f32
    %467 = vector.broadcast %cst_184 : f32 to vector<16x1xf32>
    %468 = arith.divf %466, %467 : vector<16x1xf32>
    %469 = vector.broadcast %468 : vector<16x1xf32> to vector<16x32xf32>
    %470 = arith.subf %464, %469 : vector<16x32xf32>
    %471 = arith.mulf %470, %470 : vector<16x32xf32>
    %cst_185 = arith.constant dense<0.000000e+00> : vector<16xf32>
    %472 = vector.multi_reduction <add>, %471, %cst_185 [1] : vector<16x32xf32> to vector<16xf32>
    %473 = vector.shape_cast %472 : vector<16xf32> to vector<16x1xf32>
    %cst_186 = arith.constant 3.200000e+01 : f32
    %474 = vector.broadcast %cst_186 : f32 to vector<16x1xf32>
    %475 = arith.divf %473, %474 : vector<16x1xf32>
    %cst_187 = arith.constant 9.99999974E-6 : f32
    %476 = vector.broadcast %cst_187 : f32 to vector<16x1xf32>
    %477 = arith.addf %475, %476 : vector<16x1xf32>
    %478 = math.rsqrt %477 : vector<16x1xf32>
    %479 = vector.broadcast %478 : vector<16x1xf32> to vector<16x32xf32>
    %480 = arith.mulf %470, %479 : vector<16x32xf32>
    %c0_188 = arith.constant 0 : index
    %c0_189 = arith.constant 0 : index
    %481 = vector.load %arg26[%c0_188, %c0_189] : memref<32x64xf32, #tpu.memory_space<vmem>>, vector<32x64xf32>
    %cst_190 = arith.constant dense<0.000000e+00> : vector<16x64xf32>
    %482 = tpu.matmul %480, %481, %cst_190 {dimension_numbers = #tpu.dot_dimension_numbers<[1], [0], [0], [1], [0, 0, 1, 1], [], []>} : vector<16x32xf32>, vector<32x64xf32>, vector<16x64xf32> -> vector<16x64xf32>
    %c0_191 = arith.constant 0 : index
    %c0_192 = arith.constant 0 : index
    %483 = vector.load %arg27[%c0_191, %c0_192] : memref<1x64xf32, #tpu.memory_space<vmem>>, vector<1x64xf32>
    %484 = vector.broadcast %483 : vector<1x64xf32> to vector<16x64xf32>
    %485 = arith.addf %482, %484 : vector<16x64xf32>
    %cst_193 = arith.constant 0.000000e+00 : f32
    %486 = vector.broadcast %cst_193 : f32 to vector<16x64xf32>
    %487 = arith.cmpf oge, %485, %486 : vector<16x64xf32>
    %cst_194 = arith.constant 1.000000e-01 : f32
    %488 = vector.broadcast %cst_194 : f32 to vector<16x64xf32>
    %489 = arith.mulf %488, %485 : vector<16x64xf32>
    %490 = arith.select %487, %485, %489 : vector<16x64xi1>, vector<16x64xf32>
    %c0_195 = arith.constant 0 : index
    %c0_196 = arith.constant 0 : index
    %491 = vector.load %arg28[%c0_195, %c0_196] : memref<64x32xf32, #tpu.memory_space<vmem>>, vector<64x32xf32>
    %cst_197 = arith.constant dense<0.000000e+00> : vector<16x32xf32>
    %492 = tpu.matmul %490, %491, %cst_197 {dimension_numbers = #tpu.dot_dimension_numbers<[1], [0], [0], [1], [0, 0, 1, 1], [], []>} : vector<16x64xf32>, vector<64x32xf32>, vector<16x32xf32> -> vector<16x32xf32>
    %c0_198 = arith.constant 0 : index
    %c0_199 = arith.constant 0 : index
    %493 = vector.load %arg29[%c0_198, %c0_199] : memref<1x32xf32, #tpu.memory_space<vmem>>, vector<1x32xf32>
    %494 = vector.broadcast %493 : vector<1x32xf32> to vector<16x32xf32>
    %495 = arith.addf %492, %494 : vector<16x32xf32>
    %cst_200 = arith.constant 0.000000e+00 : f32
    %496 = vector.broadcast %cst_200 : f32 to vector<16x32xf32>
    %497 = arith.cmpf oge, %495, %496 : vector<16x32xf32>
    %cst_201 = arith.constant 1.000000e-01 : f32
    %498 = vector.broadcast %cst_201 : f32 to vector<16x32xf32>
    %499 = arith.mulf %498, %495 : vector<16x32xf32>
    %500 = arith.select %497, %495, %499 : vector<16x32xi1>, vector<16x32xf32>
    %c0_202 = arith.constant 0 : index
    %c0_203 = arith.constant 0 : index
    %501 = vector.load %arg30[%c0_202, %c0_203] : memref<32x1xf32, #tpu.memory_space<vmem>>, vector<32x1xf32>
    %cst_204 = arith.constant dense<0.000000e+00> : vector<16x1xf32>
    %502 = tpu.matmul %500, %501, %cst_204 {dimension_numbers = #tpu.dot_dimension_numbers<[1], [0], [0], [1], [0, 0, 1, 1], [], []>} : vector<16x32xf32>, vector<32x1xf32>, vector<16x1xf32> -> vector<16x1xf32>
    %c0_205 = arith.constant 0 : index
    %c0_206 = arith.constant 0 : index
    %503 = vector.load %arg31[%c0_205, %c0_206] : memref<1x1xf32, #tpu.memory_space<vmem>>, vector<1x1xf32>
    %504 = vector.broadcast %503 : vector<1x1xf32> to vector<16x1xf32>
    %505 = arith.addf %502, %504 : vector<16x1xf32>
    %506 = vector.extract_strided_slice %505 {offsets = [0, 0], sizes = [10, 1], strides = [1, 1]} : vector<16x1xf32> to vector<10x1xf32>
    %c0_207 = arith.constant 0 : index
    %c0_208 = arith.constant 0 : index
    %507 = vector.load %arg32[%c0_207, %c0_208] : memref<10x1xf32, #tpu.memory_space<vmem>>, vector<10x1xf32>
    tpu.vector_store %arg32[%c0_207, %c0_208], %506 {strides = array<i32>} : memref<10x1xf32, #tpu.memory_space<vmem>>, vector<10x1xf32>,
    return
  }
}

</mosaic_0001>

<bundles_post_ra>
// kernel: tpu_custom_call.1
= control target key start
LH: loop header
LB: loop body
LE: loop exit
PB: predicated region body
PF: predicated region fallthrough
CT: control target
= control target key end

     0   :  { %s5823_s3 = smov 2   ;;  %s5824_s10 = smov 3   ;;  %vm193_vm0 = vcmask 261120   ;;  %v5825_v14 = vmov 0.0   ;;  %vm5826_vm1 = vmmov 0   ;;  %v5827_v15 = vmov 1   ;;  %s6636_s0 = inlined_call_operand.smem [shape: u32[33], index: -1, kind: input, shape index: {}] }
   0x1   :  { %s4781_s6 = sld [smem:[%s6636_s0 + %s5823_s3]]   ;;  %5654 = vset.pattern.permute.xlu1 %v5827_v15  ;;  %v5828_v16 = vmov 0   ;;  %s5829_s14 = smov 4   ;;  %vm275_vm2 = vcmask 523264   ;;  %v5830_v23 = vmov 2   ;;  %v5831_v25 = vmov 3  }
   0x2   :  { %s5878_s9 = sld [smem:[%s6636_s0]]   ;;  %5653 = vset.pattern.permute.xlu0 %v5828_v16  ;;  %v140_v26 = vlaneseq  ;;  %s5832_s18 = smov 1   ;;  %vm522_vm9 = vcmask 130048  }
   0x3   :  { %s5883_s13 = sld [smem:[%s6636_s0 + %s5824_s10]]   ;;  %s5833_s22 = smov 112  }
   0x4   :  { %s4783_s17 = sld [smem:[%s6636_s0 + %s5829_s14]]   ;;  %v141_v27 = vshrl.u32 %v140_v26, 7  ;;  %v5945_v29 = vand.u32 127, %v140_v26  ;;  %s5834_s23 = smov 96  }
   0x5   :  { %s5941_s21 = sld [smem:[%s6636_s0 + %s5832_s18]]   ;;  %s5835_s24 = smov 80  }
   0x6   :  { %v5943_v28 = vadd.s32 8, %v141_v27  ;;  %v5947_v30 = vsub.s32 1, %v141_v27  ;;  %v5949_v31 = vsub.s32 0, %v141_v27  ;;  %vm147_vm4 = vcmp.ge.s32.totalorder %v5945_v29, 10  ;;  %s5836_s25 = smov 5   ;;  %s5837_s29 = smov 32  }
   0x7   :  { %v170_v0 = vld [vmem:[%s4781_s6 + $0x18] sm:$0xff]  ;;  %v169_v1 = vld [vmem:[%s4781_s6 + $0x10] sm:$0xff]  ;;  %v168_v3 = vld [vmem:[%s4781_s6 + $0x8] sm:$0xff]  ;;  %v5964_v35 = vsub.s32 2, %v141_v27  ;;  %v5983_v59 = vsub.s32 3, %v141_v27  ;;  %s6041_s28 = sld [smem:[%s6636_s0 + %s5836_s25]]   ;;  %s5838_s30 = smov 16  }
   0x8   :  { %5155 = vmatprep.subr.mxu0 %v170_v0  ;;  %v5886_v2 = vld [vmem:[%s5878_s9] sm:$0xff]  ;;  %v5894_v8 = vld [vmem:[%s5878_s9 + $0x8] sm:$0xff]  ;;  %vm146_vm3 = vcmp.ge.s32.totalorder %v5943_v28, 10  ;;  %s5839_s1 = smov 48   ;;  %s5840_s2 = smov 6  }
   0x9   :  { %5156 = vmatpush3.msra.mxu0 %v170_v0  ;;  %5163 = vmatprep.mubr.msk.f32.mxu0 %vm193_vm0, %v5886_v2  ;;  %v178_v4 = vld [vmem:[%s5883_s13 + $0x38] sm:$0xff]  ;;  %v177_v5 = vld [vmem:[%s5883_s13 + $0x30] sm:$0xff]  ;;  %v167_v6 = vld [vmem:[%s4781_s6] sm:$0xff]  ;;  %s6060_s5 = sld [smem:[%s6636_s0 + %s5840_s2]]   ;;  %s5841_s6 = smov 7  }
   0xa   :  { %5157 = vmatprep.subr.mxu0 %v169_v1  ;;  %5166 = vmatprep.subr.mxu1 %v178_v4  ;;  %v176_v7 = vld [vmem:[%s5883_s13 + $0x28] sm:$0xff]  ;;  %v175_v9 = vld [vmem:[%s5883_s13 + $0x20] sm:$0xff]  ;;  %v174_v10 = vld [vmem:[%s5883_s13 + $0x18] sm:$0xff]  ;;  %s4786_s10 = sld [smem:[%s6636_s0 + %s5841_s6]]   ;;  %s5842_s11 = smov 8  }
   0xb   :  { %5158 = vmatpush3.msra.mxu0 %v169_v1  ;;  %5167 = vmatpush3.msra.mxu1 %v178_v4  ;;  %v173_v11 = vld [vmem:[%s5883_s13 + $0x10] sm:$0xff]  ;;  %v172_v12 = vld [vmem:[%s5883_s13 + $0x8] sm:$0xff]  ;;  %v171_v13 = vld [vmem:[%s5883_s13] sm:$0xff]  ;;  %s4787_s14 = sld [smem:[%s6636_s0 + %s5842_s11]]   ;;  %s5843_s15 = smov 9  }
   0xc   :  { %5159 = vmatprep.subr.mxu0 %v168_v3  ;;  %5168 = vmatprep.subr.mxu1 %v177_v5  ;;  %v179_v19 = vld [vmem:[%s4783_s17] sm:$0xf]  ;;  %v5954_v32 = vld [vmem:[%s5941_s21 + $0x8] sm:$0xff]  ;;  %vm149_vm5 = vmor %vm146_vm3, %vm147_vm4  ;;  %s6115_s18 = sld [smem:[%s6636_s0 + %s5843_s15]]   ;;  %s5844_s19 = smov 10  }
   0xd   :  { %5160 = vmatpush3.msra.mxu0 %v168_v3  ;;  %5169 = vmatpush3.msra.mxu1 %v177_v5  ;;  %v5967_v36 = vsel %vm149_vm5, 0.0, %v5954_v32  ;;  %v138_v41 = vld [vmem:[%s5941_s21] sm:$0xff]  ;;  %s4789_s26 = sld [smem:[%s6636_s0 + %s5844_s19]]   ;;  %s5846_s27 = smov 11  }
   0xe   :  { %5161 = vmatprep.subr.mxu0 %v167_v6  ;;  %5170 = vmatprep.subr.mxu1 %v176_v7  ;;  %vm513_vm6 = vcmp.eq.f32.partialorder %v5967_v36, 0.0  ;;  %v5975_v46 = vsel %vm147_vm4, 0.0, %v138_v41  ;;  %s6233_s3 = sld [smem:[%s6636_s0 + %s5846_s27]]   ;;  %s5847_s4 = smov 12  }
   0xf   :  { %5162 = vmatpush3.msra.mxu0 %v167_v6  ;;  %5171 = vmatpush3.msra.mxu1 %v176_v7  ;;  %vm512_vm11 = vcmp.eq.f32.partialorder %v5975_v46, 0.0  ;;  %s6252_s7 = sld [smem:[%s6636_s0 + %s5847_s4]]   ;;  %s5848_s8 = smov 13  }
  0x10   :  { %5164 = vmatmul.mubr.msk.f32.vlgmr.msra.gmra.mxu0 %vm193_vm0, %v5894_v8  ;;  %5172 = vmatprep.subr.mxu1 %v175_v9  ;;  %s4792_s12 = sld [smem:[%s6636_s0 + %s5848_s8]]   ;;  %s5849_s13 = smov 14  }
  0x11   :  { %5173 = vmatpush3.msra.mxu1 %v175_v9  ;;  %5185 = vmatprep.subr.mxu0 %v5825_v14  ;;  %s4793_s16 = sld [smem:[%s6636_s0 + %s5849_s13]]   ;;  %s5850_s17 = smov 15  }
  0x12   :  { %5174 = vmatprep.subr.mxu1 %v174_v10  ;;  %5189 = vmatprep.mubr.msk.f32.mxu0 %vm5826_vm1, %v5825_v14  ;;  %s6304_s20 = sld [smem:[%s6636_s0 + %s5850_s17]]   ;;  %s5853_s4 = smov 19  }
  0x13   :  { %5175 = vmatpush3.msra.mxu1 %v174_v10  ;;  %s4795_s27 = sld [smem:[%s6636_s0 + %s5838_s30]]   ;;  %s5855_s8 = smov 20  }
  0x14   :  { %5176 = vmatprep.subr.mxu1 %v173_v11  ;;  %s5856_s13 = smov 22   ;;  %s5857_s17 = smov 24  }
  0x15   :  { %5177 = vmatpush3.msra.mxu1 %v173_v11  ;;  %s5858_s25 = smov 21   ;;  %s5860_s2 = smov 25  }
  0x16   :  { %5178 = vmatprep.subr.mxu1 %v172_v12 }
  0x17   :  { %5179 = vmatpush3.msra.mxu1 %v172_v12 }
  0x18   :  { %5180 = vmatprep.subr.mxu1 %v171_v13 }
  0x19   :  { %5181 = vmatpush3.msra.mxu1 %v171_v13 }
  0xd0   :  { %v5911_v17 = vpop.f32.mrf.mxu0 }
  0xd1   :  { %5186 = vmatpush3.xpose.msk.msra.mxu0 %vm275_vm2, %v5911_v17  ;;  %5192 = vmatprep.subr.mxu1 %v5911_v17 }
  0xd2   :  { %v5916_v18 = vpop.f32.mrf.mxu0  ;;  %5187 = vmatprep.subr.mxu0 %v5825_v14 }
  0xd3   :  { %5182 = vmatprep.mubr.msk.f32.mxu1 %vm275_vm2, %v5916_v18 }
  0xd4   :  { %5183 = vmatmul.mubr.msk.f32.vlgmr.msra.gmra.mxu1 %vm275_vm2, %v5911_v17 }
  0xd5   :  { %5193 = vmatpush3.msra.mxu1 %v5911_v17  ;;  %5188 = vmatpush3.xpose.msk.msra.mxu0 %vm275_vm2, %v5916_v18 }
  0xd6   :  { %5194 = vmatprep.subr.mxu1 %v5916_v18 }
  0xd7   :  { %5195 = vmatpush3.msra.mxu1 %v5916_v18 }
  0xd8   :  { %5190 = vmatmul.mubr.msk.f32.vlgmr.msra.gmra.mxu0 %vm275_vm2, %v179_v19 }
 0x194   :  { %v5184_v20 = vpop.f32.mrf.mxu1 }
 0x195   :  { %451 = vperm.xlu1 %5654, %v5184_v20   ;;  %437 = vperm.xlu0 %5653, %v5184_v20  }
 0x196   :  { %v348_v21 = vpop.f32.mrf.mxu1 }
 0x198   :  { %v5929_v22 = vpop.f32.mrf.mxu0 }
 0x199   :  { %5655 = vset.pattern.permute.xlu1 %v5830_v23  ;;  %432 = vperm.xlu0 %5653, %v348_v21   ;;  %v457_v33 = vrot.slane %v5929_v22, %v5947_v30  ;;  %v443_v34 = vrot.slane %v5929_v22, %v5949_v31  ;;  %v471_v42 = vrot.slane %v5929_v22, %v5964_v35 }
 0x19a   :  { %465 = vperm.xlu1 %5655, %v5184_v20   ;;  %v5191_v24 = vpop.f32.mrf.mxu0  ;;  %v485_v7 = vrot.slane %v5929_v22, %v5983_v59 }
 0x19d   :  { %5657 = vset.pattern.permute.xlu0 %v5830_v23 }
 0x19e   :  { %5656 = vset.pattern.permute.xlu1 %v5827_v15  ;;  %461 = vperm.xlu0 %5657, %v348_v21  }
 0x19f   :  { %447 = vperm.xlu1 %5656, %v348_v21  }
 0x1a2   :  { %5659 = vset.pattern.permute.xlu0 %v5831_v25 }
 0x1a3   :  { %5658 = vset.pattern.permute.xlu1 %v5831_v25  ;;  %479 = vperm.xlu0 %5659, %v5184_v20  }
 0x1a4   :  { %475 = vperm.xlu1 %5658, %v348_v21  }
 0x1a7   :  { %5660 = vset.pattern.permute.xlu0 %v5828_v16 }
 0x1a8   :  { %5661 = vset.pattern.permute.xlu1 %v5828_v16 }
 0x210   :  { %v452_v37 = vpop.permute.xlu1 %451  ;;  %v438_v38 = vpop.permute.xlu0 %437 }
 0x211   :  { %v459_v39 = vadd.f32 %v457_v33, %v452_v37  ;;  %v445_v40 = vadd.f32 %v443_v34, %v438_v38 }
 0x213   :  { %v499_v43 = vmul.f32 0.2, %v459_v39  ;;  %v497_v44 = vmul.f32 0.2, %v445_v40  ;;  %vm489_vm7 = vcmp.ge.f32.partialorder %v445_v40, 0.0  ;;  %vm491_vm8 = vcmp.ge.f32.partialorder %v459_v39, 0.0 }
 0x214   :  { %v433_v45 = vpop.permute.xlu0 %432 }
 0x215   :  { %v444_v47 = vadd.f32 %v443_v34, %v433_v45  ;;  %v466_v48 = vpop.permute.xlu1 %465  ;;  %v505_v49 = vsel %vm489_vm7, %v445_v40, %v497_v44  ;;  %v507_v50 = vsel %vm491_vm8, %v459_v39, %v499_v43  ;;  %vm981_vm7 = vcmask 392192  }
 0x216   :  { %v473_v51 = vadd.f32 %v471_v42, %v466_v48  ;;  %v515_v52 = vsel %vm513_vm6, -1e+09, %v505_v49  ;;  %v517_v56 = vsel %vm513_vm6, -1e+09, %v507_v50 }
 0x217   :  { %v496_v53 = vmul.f32 0.2, %v444_v47  ;;  %v526_v54 = vsel %vm522_vm9, %v515_v52, -inf  ;;  %vm488_vm10 = vcmp.ge.f32.partialorder %v444_v47, 0.0  ;;  %v532_v1 = vsel %vm522_vm9, %v517_v56, -inf }
 0x218   :  { %v501_v55 = vmul.f32 0.2, %v473_v51  ;;  %527 = vmax.xlane.f32.xlu0 %v526_v54  ;;  %vm493_vm12 = vcmp.ge.f32.partialorder %v473_v51, 0.0 }
 0x219   :  { %v462_v57 = vpop.permute.xlu0 %461  ;;  %v504_v58 = vsel %vm488_vm10, %v444_v47, %v496_v53 }
 0x21a   :  { %v472_v60 = vadd.f32 %v471_v42, %v462_v57  ;;  %v448_v61 = vpop.permute.xlu1 %447  ;;  %v514_v62 = vsel %vm512_vm11, -1e+09, %v504_v58  ;;  %v509_v63 = vsel %vm493_vm12, %v473_v51, %v501_v55 }
 0x21b   :  { %v458_v0 = vadd.f32 %v457_v33, %v448_v61  ;;  %v523_v3 = vsel %vm522_vm9, %v514_v62, -inf  ;;  %v519_v5 = vsel %vm513_vm6, -1e+09, %v509_v63 }
 0x21c   :  { %v500_v4 = vmul.f32 0.2, %v472_v60  ;;  %533 = vmax.xlane.f32.xlu0 %v532_v1  ;;  %524 = vmax.xlane.f32.xlu1 %v523_v3  ;;  %vm492_vm13 = vcmp.ge.f32.partialorder %v472_v60, 0.0  ;;  %v538_v12 = vsel %vm522_vm9, %v519_v5, -inf }
 0x21d   :  { %v498_v6 = vmul.f32 0.2, %v458_v0  ;;  %vm490_vm14 = vcmp.ge.f32.partialorder %v458_v0, 0.0 }
 0x21e   :  { %v480_v9 = vpop.permute.xlu0 %479  ;;  %v508_v19 = vsel %vm492_vm13, %v472_v60, %v500_v4 }
 0x21f   :  { %v487_v10 = vadd.f32 %v485_v7, %v480_v9  ;;  %v476_v11 = vpop.permute.xlu1 %475  ;;  %v506_v13 = vsel %vm490_vm14, %v458_v0, %v498_v6  ;;  %v518_v22 = vsel %vm512_vm11, -1e+09, %v508_v19  ;;  %vm153_vm14 = vcmp.lt.s32.totalorder %v5943_v28, 10 }
 0x220   :  { %v486_v20 = vadd.f32 %v485_v7, %v476_v11  ;;  %539 = vmax.xlane.f32.xlu0 %v538_v12  ;;  %v516_v21 = vsel %vm512_vm11, -1e+09, %v506_v13  ;;  %v535_v38 = vsel %vm522_vm9, %v518_v22, -inf }
 0x221   :  { %v503_v24 = vmul.f32 0.2, %v487_v10  ;;  %v529_v26 = vsel %vm522_vm9, %v516_v21, -inf  ;;  %vm495_vm15 = vcmp.ge.f32.partialorder %v487_v10, 0.0 }
 0x222   :  { %v502_v27 = vmul.f32 0.2, %v486_v20  ;;  %530 = vmax.xlane.f32.xlu1 %v529_v26  ;;  %vm494_vm5 = vcmp.ge.f32.partialorder %v486_v20, 0.0 }
 0x223   :  { %v511_v33 = vsel %vm495_vm15, %v487_v10, %v503_v24  ;;  %vm155_vm15 = vcmp.ge.s32.totalorder %v5943_v28, 13 }
 0x224   :  { %v521_v34 = vsel %vm513_vm6, -1e+09, %v511_v33  ;;  %v510_v37 = vsel %vm494_vm5, %v486_v20, %v502_v27  ;;  %vm157_vm5 = vmor %vm153_vm14, %vm155_vm15 }
 0x225   :  { %v544_v39 = vsel %vm522_vm9, %v521_v34, -inf  ;;  %v520_v40 = vsel %vm512_vm11, -1e+09, %v510_v37 }
 0x226   :  { %536 = vmax.xlane.f32.xlu1 %v535_v38  ;;  %545 = vmax.xlane.f32.xlu0 %v544_v39  ;;  %v541_v41 = vsel %vm522_vm9, %v520_v40, -inf }
 0x22a   :  { %542 = vmax.xlane.f32.xlu1 %v541_v41 }
 0x23b   :  { %694 = vrot.lane.b32.xlu1 %v5911_v17, %s5833_s22 }
 0x23c   :  { %692 = vrot.lane.b32.xlu0 %v5916_v18, %s5833_s22 }
 0x23f   :  { %781 = vrot.lane.b32.xlu1 %v5911_v17, %s5834_s23 }
 0x243   :  { %868 = vrot.lane.b32.xlu1 %v5911_v17, %s5835_s24 }
 0x2a1   :  { %v528_v42 = vpop.xlane.xlu0 %527 }
 0x2a2   :  { %v548_v43 = vsub.f32 %v515_v52, %v528_v42 }
 0x2a4   :  { %v557_v44 = vmul.f32 1.442695, %v548_v43 }
 0x2a5   :  { %v525_v45 = vpop.xlane.xlu1 %524  ;;  %v534_v47 = vpop.xlane.xlu0 %533 }
 0x2a6   :  { %5671 = vpow2.f32 %v557_v44  ;;  %v547_v48 = vsub.f32 %v514_v62, %v525_v45  ;;  %v550_v49 = vsub.f32 %v517_v56, %v534_v47 }
 0x2a8   :  { %v555_v50 = vmul.f32 1.442695, %v547_v48  ;;  %v561_v51 = vmul.f32 1.442695, %v550_v49 }
 0x2a9   :  { %v540_v53 = vpop.xlane.xlu0 %539 }
 0x2aa   :  { %5673 = vpow2.f32 %v555_v50  ;;  %v552_v54 = vsub.f32 %v519_v5, %v540_v53 }
 0x2ab   :  { %5675 = vpow2.f32 %v561_v51  ;;  %v531_v55 = vpop.xlane.xlu1 %530 }
 0x2ac   :  { %v565_v57 = vmul.f32 1.442695, %v552_v54  ;;  %v549_v58 = vsub.f32 %v516_v21, %v531_v55 }
 0x2ae   :  { %5677 = vpow2.f32 %v565_v57  ;;  %v559_v60 = vmul.f32 1.442695, %v549_v58 }
 0x2af   :  { %v537_v17 = vpop.xlane.xlu1 %536  ;;  %v546_v61 = vpop.xlane.xlu0 %545 }
 0x2b0   :  { %5679 = vpow2.f32 %v559_v60  ;;  %v551_v52 = vsub.f32 %v518_v22, %v537_v17  ;;  %v554_v63 = vsub.f32 %v521_v34, %v546_v61 }
 0x2b2   :  { %v563_v0 = vmul.f32 1.442695, %v551_v52  ;;  %v569_v1 = vmul.f32 1.442695, %v554_v63 }
 0x2b3   :  { %v5672_v62 = vpop.eup %5671  ;;  %v543_v56 = vpop.xlane.xlu1 %542 }
 0x2b4   :  { %5681 = vpow2.f32 %v563_v0  ;;  %v553_v3 = vsub.f32 %v520_v40, %v543_v56  ;;  %v574_v4 = vsel %vm522_vm9, %v5672_v62, 0.0  ;;  %v693_v37 = vpop.permute.xlu0 %692 }
 0x2b5   :  { %5683 = vpow2.f32 %v569_v1  ;;  %575 = vadd.xlane.f32.xlu0 %v574_v4 }
 0x2b6   :  { %v567_v5 = vmul.f32 1.442695, %v553_v3 }
 0x2b7   :  { %v5674_v6 = vpop.eup %5673  ;;  %v695_v7 = vpop.permute.xlu1 %694 }
 0x2b8   :  { %v5676_v9 = vpop.eup %5675  ;;  %5685 = vpow2.f32 %v567_v5  ;;  %5199 = vmatprep.subr.mxu1 %v695_v7  ;;  %v571_v10 = vsel %vm522_vm9, %v5674_v6, 0.0 }
 0x2b9   :  { %572 = vadd.xlane.f32.xlu1 %v571_v10  ;;  %v580_v11 = vsel %vm522_vm9, %v5676_v9, 0.0 }
 0x2ba   :  { %581 = vadd.xlane.f32.xlu0 %v580_v11  ;;  %v186_v11 = vld [vmem:[%s6041_s28 + $0x30] sm:$0xff] }
 0x2bb   :  { %v6017_v12 = vpop.eup %5677  ;;  %v782_v13 = vpop.permute.xlu1 %781 }
 0x2bc   :  { %5206 = vmatprep.subr.mxu0 %v782_v13  ;;  %v586_v19 = vsel %vm522_vm9, %v6017_v12, 0.0 }
 0x2bd   :  { %v5680_v20 = vpop.eup %5679  ;;  %5207 = vmatpush3.msra.mxu0 %v782_v13 }
 0x2be   :  { %587 = vadd.xlane.f32.xlu0 %v586_v19  ;;  %v577_v21 = vsel %vm522_vm9, %v5680_v20, 0.0  ;;  %v184_v19 = vld [vmem:[%s6041_s28 + $0x20] sm:$0xff] }
 0x2bf   :  { %578 = vadd.xlane.f32.xlu1 %v577_v21  ;;  %v869_v38 = vpop.permute.xlu1 %868  ;;  %v182_v21 = vld [vmem:[%s6041_s28 + $0x10] sm:$0xff] }
 0x2c1   :  { %v5682_v24 = vpop.eup %5681 }
 0x2c2   :  { %v5684_v26 = vpop.eup %5683  ;;  %v583_v27 = vsel %vm522_vm9, %v5682_v24, 0.0 }
 0x2c3   :  { %584 = vadd.xlane.f32.xlu1 %v583_v27  ;;  %v592_v22 = vsel %vm522_vm9, %v5684_v26, 0.0  ;;  %v191_v27 = vld [vmem:[%s6060_s5 + $0x18] sm:$0xff] }
 0x2c4   :  { %593 = vadd.xlane.f32.xlu0 %v592_v22  ;;  %v190_v22 = vld [vmem:[%s6060_s5 + $0x10] sm:$0xff] }
 0x2c5   :  { %v5686_v33 = vpop.eup %5685 }
 0x2c6   :  { %v589_v34 = vsel %vm522_vm9, %v5686_v33, 0.0 }
 0x2c7   :  { %590 = vadd.xlane.f32.xlu1 %v589_v34 }
 0x2d8   :  { %866 = vrot.lane.b32.xlu1 %v5916_v18, %s5835_s24 }
 0x2da   :  { %779 = vrot.lane.b32.xlu0 %v5916_v18, %s5834_s23 }
 0x33e   :  { %v576_v39 = vpop.xlane.xlu0 %575 }
 0x33f   :  { %5687 = vrcp.f32 %v576_v39 }
 0x342   :  { %v573_v40 = vpop.xlane.xlu1 %572 }
 0x343   :  { %5689 = vrcp.f32 %v573_v40  ;;  %v582_v41 = vpop.xlane.xlu0 %581 }
 0x344   :  { %5691 = vrcp.f32 %v582_v41 }
 0x347   :  { %v588_v43 = vpop.xlane.xlu0 %587 }
 0x348   :  { %v579_v42 = vpop.xlane.xlu1 %578 }
 0x349   :  { %5693 = vrcp.f32 %v579_v42 }
 0x34a   :  { %5695 = vrcp.f32 %v588_v43 }
 0x34c   :  { %v585_v44 = vpop.xlane.xlu1 %584  ;;  %v5688_v47 = vpop.eup %5687 }
 0x34d   :  { %5697 = vrcp.f32 %v585_v44  ;;  %v594_v45 = vpop.xlane.xlu0 %593  ;;  %v604_v51 = vmul.f32 %v5688_v47, %v5672_v62 }
 0x34e   :  { %5699 = vrcp.f32 %v594_v45 }
 0x350   :  { %v5690_v48 = vpop.eup %5689  ;;  %v591_v49 = vpop.xlane.xlu1 %590 }
 0x351   :  { %5701 = vrcp.f32 %v591_v49  ;;  %v780_v18 = vpop.permute.xlu0 %779  ;;  %v603_v50 = vmul.f32 %v5690_v48, %v5674_v6  ;;  %v5692_v53 = vpop.eup %5691 }
 0x352   :  { %5208 = vmatprep.subr.mxu0 %v780_v18  ;;  %v606_v57 = vmul.f32 %v5692_v53, %v5676_v9  ;;  %v187_v9 = vld [vmem:[%s6041_s28 + $0x38] sm:$0xff] }
 0x353   :  { %5209 = vmatpush3.msra.mxu0 %v780_v18  ;;  %5196 = vmatprep.mubr.msk.f32.mxu1 %vm522_vm9, %v603_v50 }
 0x354   :  { %5197 = vmatmul.mubr.msk.f32.vlgmr.msra.gmra.mxu1 %vm522_vm9, %v604_v51  ;;  %v867_v17 = vpop.permute.xlu1 %866  ;;  %5220 = vmatprep.subr.mxu0 %v187_v9 }
 0x355   :  { %5200 = vmatpush3.msra.mxu1 %v695_v7 }
 0x356   :  { %v5694_v54 = vpop.eup %5693  ;;  %5201 = vmatprep.subr.mxu1 %v693_v37 }
 0x357   :  { %5202 = vmatpush3.msra.mxu1 %v693_v37  ;;  %v605_v55 = vmul.f32 %v5694_v54, %v5680_v20  ;;  %v5696_v58 = vpop.eup %5695  ;;  %v183_v20 = vld [vmem:[%s6041_s28 + $0x18] sm:$0xff] }
 0x358   :  { %5213 = vmatprep.subr.mxu1 %v869_v38  ;;  %v608_v52 = vmul.f32 %v5696_v58, %v6017_v12  ;;  %v185_v12 = vld [vmem:[%s6041_s28 + $0x28] sm:$0xff] }
 0x359   :  { %5203 = vmatprep.mubr.msk.f32.mxu1 %vm522_vm9, %v605_v55 }
 0x35a   :  { %v5698_v60 = vpop.eup %5697  ;;  %5204 = vmatmul.mubr.msk.f32.vlgmr.msra.gmra.mxu1 %vm522_vm9, %v606_v57 }
 0x35b   :  { %5214 = vmatpush3.msra.mxu1 %v869_v38  ;;  %v607_v61 = vmul.f32 %v5698_v60, %v5682_v24  ;;  %v5700_v63 = vpop.eup %5699  ;;  %v181_v24 = vld [vmem:[%s6041_s28 + $0x8] sm:$0xff] }
 0x35c   :  { %5215 = vmatprep.subr.mxu1 %v867_v17  ;;  %v610_v62 = vmul.f32 %v5700_v63, %v5684_v26  ;;  %v180_v26 = vld [vmem:[%s6041_s28] sm:$0xff] }
 0x35d   :  { %5216 = vmatpush3.msra.mxu1 %v867_v17  ;;  %5210 = vmatprep.mubr.msk.f32.mxu0 %vm522_vm9, %v607_v61  ;;  %v188_v17 = vld [vmem:[%s6060_s5] sm:$0xff] }
 0x35e   :  { %v5702_v0 = vpop.eup %5701  ;;  %5211 = vmatmul.mubr.msk.f32.vlgmr.msra.gmra.mxu0 %vm522_vm9, %v608_v52  ;;  %5239 = vmatprep.subr.mxu1 %v191_v27  ;;  %v192_v63 = vld [vmem:[%s4786_s10] sm:$0x1] }
 0x35f   :  { %v609_v1 = vmul.f32 %v5702_v0, %v5686_v33  ;;  %5221 = vmatpush3.msra.mxu0 %v187_v9  ;;  %v189_v33 = vld [vmem:[%s6060_s5 + $0x8] sm:$0xff] }
 0x360   :  { %5222 = vmatprep.subr.mxu0 %v186_v11 }
 0x361   :  { %5217 = vmatprep.mubr.msk.f32.mxu1 %vm522_vm9, %v609_v1  ;;  %5223 = vmatpush3.msra.mxu0 %v186_v11 }
 0x362   :  { %5218 = vmatmul.mubr.msk.f32.vlgmr.msra.gmra.mxu1 %vm522_vm9, %v610_v62  ;;  %5224 = vmatprep.subr.mxu0 %v185_v12 }
 0x363   :  { %5225 = vmatpush3.msra.mxu0 %v185_v12  ;;  %5240 = vmatpush3.msra.mxu1 %v191_v27 }
 0x364   :  { %5226 = vmatprep.subr.mxu0 %v184_v19  ;;  %5241 = vmatprep.subr.mxu1 %v190_v22 }
 0x365   :  { %5227 = vmatpush3.msra.mxu0 %v184_v19  ;;  %5242 = vmatpush3.msra.mxu1 %v190_v22 }
 0x366   :  { %5228 = vmatprep.subr.mxu0 %v183_v20  ;;  %5243 = vmatprep.subr.mxu1 %v189_v33 }
 0x367   :  { %5229 = vmatpush3.msra.mxu0 %v183_v20  ;;  %5244 = vmatpush3.msra.mxu1 %v189_v33 }
 0x368   :  { %5230 = vmatprep.subr.mxu0 %v182_v21  ;;  %5245 = vmatprep.subr.mxu1 %v188_v17 }
 0x369   :  { %5231 = vmatpush3.msra.mxu0 %v182_v21  ;;  %5246 = vmatpush3.msra.mxu1 %v188_v17 }
 0x36a   :  { %5232 = vmatprep.subr.mxu0 %v181_v24  ;;  %5250 = vmatprep.subr.mxu1 %v5825_v14 }
 0x36b   :  { %5233 = vmatpush3.msra.mxu0 %v181_v24 }
 0x36c   :  { %5234 = vmatprep.subr.mxu0 %v180_v26 }
 0x36d   :  { %5235 = vmatpush3.msra.mxu0 %v180_v26 }
 0x414   :  { %v5198_v56 = vpop.f32.mrf.mxu1 }
 0x416   :  { %v683_v3 = vpop.f32.mrf.mxu1 }
 0x41a   :  { %v5205_v4 = vpop.f32.mrf.mxu1 }
 0x41c   :  { %v770_v7 = vpop.f32.mrf.mxu1 }
 0x41e   :  { %v5212_v5 = vpop.f32.mrf.mxu0 }
 0x41f   :  { %965 = vrot.lane.b32.xlu1 %v5212_v5, %s5837_s29 }
 0x420   :  { %v857_v6 = vpop.f32.mrf.mxu0 }
 0x421   :  { %963 = vrot.lane.b32.xlu0 %v857_v6, %s5837_s29 }
 0x422   :  { %v5219_v10 = vpop.f32.mrf.mxu1 }
 0x423   :  { %957 = vrot.lane.b32.xlu1 %v5205_v4, %s5838_s30 }
 0x424   :  { %v944_v13 = vpop.f32.mrf.mxu1 }
 0x425   :  { %955 = vrot.lane.b32.xlu0 %v770_v7, %s5838_s30 }
 0x427   :  { %973 = vrot.lane.b32.xlu1 %v5219_v10, %s5839_s1 }
 0x429   :  { %971 = vrot.lane.b32.xlu0 %v944_v13, %s5839_s1 }
 0x491   :  { %v966_v34 = vpop.permute.xlu1 %965 }
 0x493   :  { %v964_v37 = vpop.permute.xlu0 %963 }
 0x495   :  { %v958_v38 = vpop.permute.xlu1 %957 }
 0x496   :  { %v978_v39 = vsel %vm522_vm9, %v5198_v56, %v958_v38 }
 0x497   :  { %v956_v40 = vpop.permute.xlu0 %955  ;;  %v980_v42 = vsel %vm193_vm0, %v978_v39, %v966_v34 }
 0x498   :  { %v977_v41 = vsel %vm522_vm9, %v683_v3, %v956_v40 }
 0x499   :  { %v974_v43 = vpop.permute.xlu1 %973  ;;  %v979_v47 = vsel %vm193_vm0, %v977_v41, %v964_v37  ;;  %v1361_v41 = vsel %vm522_vm9, %v5967_v36, 0.0 }
 0x49a   :  { %v983_v44 = vsel %vm981_vm7, %v980_v42, %v974_v43  ;;  %v1358_v42 = vsel %vm522_vm9, %v5975_v46, 0.0 }
 0x49b   :  { %v987_v45 = vmin.f32 %v983_v44, 0.0  ;;  %v972_v48 = vpop.permute.xlu0 %971  ;;  %vm985_vm10 = vcmp.gt.f32.partialorder %v983_v44, 0.0 }
 0x49c   :  { %v982_v49 = vsel %vm981_vm7, %v979_v47, %v972_v48 }
 0x49d   :  { %v990_v18 = vmul.f32 1.442695, %v987_v45  ;;  %v986_v50 = vmin.f32 %v982_v49, 0.0  ;;  %vm984_vm8 = vcmp.gt.f32.partialorder %v982_v49, 0.0 }
 0x49f   :  { %5703 = vpow2.f32 %v990_v18  ;;  %v988_v51 = vmul.f32 1.442695, %v986_v50 }
 0x4a1   :  { %5705 = vpow2.f32 %v988_v51 }
 0x4ac   :  { %v5704_v53 = vpop.eup %5703 }
 0x4ad   :  { %v4828_v55 = vadd.f32 -1.0, %v5704_v53 }
 0x4ae   :  { %v5706_v54 = vpop.eup %5705 }
 0x4af   :  { %v4827_v57 = vadd.f32 -1.0, %v5706_v54  ;;  %v995_v60 = vsel %vm985_vm10, %v983_v44, %v4828_v55 }
 0x4b1   :  { %v994_v58 = vsel %vm984_vm8, %v982_v49, %v4827_v57  ;;  %vm158_vm8 = vcmp.ge.s32.totalorder %v5945_v29, 13 }
 0x4b2   :  { %5236 = vmatprep.mubr.msk.f32.mxu0 %vm275_vm2, %v994_v58  ;;  %vm160_vm10 = vmor %vm157_vm5, %vm158_vm8 }
 0x4b3   :  { %5237 = vmatmul.mubr.msk.f32.vlgmr.msra.gmra.mxu0 %vm275_vm2, %v995_v60 }
 0x573   :  { %v5238_v61 = vpop.f32.mrf.mxu0 }
 0x574   :  { %5257 = vmatprep.subr.mxu0 %v5238_v61 }
 0x575   :  { %v1068_v52 = vpop.f32.mrf.mxu0  ;;  %5258 = vmatpush3.msra.mxu0 %v5238_v61 }
 0x576   :  { %5247 = vmatprep.mubr.msk.f32.mxu1 %vm193_vm0, %v1068_v52  ;;  %5259 = vmatprep.subr.mxu0 %v1068_v52 }
 0x577   :  { %5248 = vmatmul.mubr.msk.f32.vlgmr.msra.gmra.mxu1 %vm193_vm0, %v5238_v61  ;;  %5260 = vmatpush3.msra.mxu0 %v1068_v52 }
 0x578   :  { %5251 = vmatpush3.xpose.msk.msra.mxu1 %vm193_vm0, %v5238_v61  ;;  %5254 = vmatprep.mubr.msk.f32.mxu1 %vm5826_vm1, %v5825_v14 }
 0x579   :  { %5252 = vmatprep.subr.mxu1 %v5825_v14 }
 0x57c   :  { %5253 = vmatpush3.xpose.msk.msra.mxu1 %vm193_vm0, %v1068_v52 }
 0x57f   :  { %5255 = vmatmul.mubr.msk.f32.vlgmr.msra.gmra.mxu1 %vm193_vm0, %v192_v63 }
 0x637   :  { %v5249_v0 = vpop.f32.mrf.mxu1 }
 0x638   :  { %1238 = vperm.xlu1 %5661, %v5249_v0  }
 0x639   :  { %v1149_v1 = vpop.f32.mrf.mxu1 }
 0x63a   :  { %1233 = vperm.xlu0 %5660, %v1149_v1  }
 0x63c   :  { %5662 = vset.pattern.permute.xlu1 %v5827_v15 }
 0x63f   :  { %v1227_v62 = vpop.f32.mrf.mxu1 }
 0x640   :  { %v1244_v3 = vrot.slane %v1227_v62, %v5949_v31 }
 0x641   :  { %v5256_v56 = vpop.f32.mrf.mxu1 }
 0x6b3   :  { %v1239_v4 = vpop.permute.xlu1 %1238 }
 0x6b4   :  { %v1246_v5 = vadd.f32 %v1244_v3, %v1239_v4  ;;  %v1402_v4 = vld [vmem:[%s4787_s14 + $0x8] sm:$0xff] }
 0x6b5   :  { %v1234_v6 = vpop.permute.xlu0 %1233 }
 0x6b6   :  { %v1250_v7 = vmul.f32 0.2, %v1246_v5  ;;  %v1245_v9 = vadd.f32 %v1244_v3, %v1234_v6  ;;  %vm1248_vm12 = vcmp.ge.f32.partialorder %v1246_v5, 0.0  ;;  %v1403_v3 = vld [vmem:[%s4787_s14 + $0x10] sm:$0xff]  ;;  %v1412_v6 = vld [vmem:[%s6115_s18 + $0x38] sm:$0xff] }
 0x6b7   :  { %5275 = vmatprep.subr.mxu0 %v1412_v6 }
 0x6b8   :  { %v1249_v10 = vmul.f32 0.2, %v1245_v9  ;;  %v1252_v11 = vsel %vm1248_vm12, %v1246_v5, %v1250_v7  ;;  %vm1247_vm13 = vcmp.ge.f32.partialorder %v1245_v9, 0.0  ;;  %v1401_v5 = vld [vmem:[%s4787_s14] sm:$0xff]  ;;  %v1411_v7 = vld [vmem:[%s6115_s18 + $0x30] sm:$0xff] }
 0x6b9   :  { %v1254_v12 = vsel %vm513_vm6, -1e+09, %v1252_v11  ;;  %v1408_v11 = vld [vmem:[%s6115_s18 + $0x18] sm:$0xff] }
 0x6ba   :  { %v1258_v13 = vsel %vm522_vm9, %v1254_v12, -inf  ;;  %v1251_v19 = vsel %vm1247_vm13, %v1245_v9, %v1249_v10  ;;  %v1410_v9 = vld [vmem:[%s6115_s18 + $0x28] sm:$0xff]  ;;  %v1409_v10 = vld [vmem:[%s6115_s18 + $0x20] sm:$0xff] }
 0x6bb   :  { %1259 = vmax.xlane.f32.xlu0 %v1258_v13  ;;  %v1253_v20 = vsel %vm512_vm11, -1e+09, %v1251_v19 }
 0x6bc   :  { %v1255_v21 = vsel %vm522_vm9, %v1253_v20, -inf }
 0x6bd   :  { %1256 = vmax.xlane.f32.xlu1 %v1255_v21 }
 0x744   :  { %v1260_v24 = vpop.xlane.xlu0 %1259 }
 0x745   :  { %v1262_v26 = vsub.f32 %v1254_v12, %v1260_v24  ;;  %v1407_v12 = vld [vmem:[%s6115_s18 + $0x10] sm:$0xff] }
 0x746   :  { %v1257_v27 = vpop.xlane.xlu1 %1256 }
 0x747   :  { %v1265_v22 = vmul.f32 1.442695, %v1262_v26  ;;  %v1261_v33 = vsub.f32 %v1253_v20, %v1257_v27 }
 0x749   :  { %5707 = vpow2.f32 %v1265_v22  ;;  %v1263_v34 = vmul.f32 1.442695, %v1261_v33 }
 0x74b   :  { %5709 = vpow2.f32 %v1263_v34 }
 0x756   :  { %v5708_v37 = vpop.eup %5707 }
 0x757   :  { %v1270_v38 = vsel %vm522_vm9, %v5708_v37, 0.0 }
 0x758   :  { %v5710_v39 = vpop.eup %5709  ;;  %1271 = vadd.xlane.f32.xlu1 %v1270_v38  ;;  %v1405_v38 = vld [vmem:[%s6115_s18] sm:$0xff] }
 0x759   :  { %v1267_v40 = vsel %vm522_vm9, %v5710_v39, 0.0 }
 0x75a   :  { %1268 = vadd.xlane.f32.xlu0 %v1267_v40 }
 0x75c   :  { %1362 = vadd.xlane.f32.xlu1 %v1361_v41  ;;  %v1413_v41 = vld [vmem:[%s4789_s26] sm:$0xf] }
 0x75e   :  { %1359 = vadd.xlane.f32.xlu0 %v1358_v42 }
 0x7e1   :  { %v1272_v43 = vpop.xlane.xlu1 %1271 }
 0x7e2   :  { %5711 = vrcp.f32 %v1272_v43 }
 0x7e3   :  { %v1269_v44 = vpop.xlane.xlu0 %1268 }
 0x7e4   :  { %5713 = vrcp.f32 %v1269_v44 }
 0x7e5   :  { %v1363_v18 = vpop.xlane.xlu1 %1362 }
 0x7e6   :  { %vm1365_vm6 = vcmp.eq.f32.partialorder %v1363_v18, 0.0 }
 0x7e7   :  { %v1360_v50 = vpop.xlane.xlu0 %1359 }
 0x7e8   :  { %vm1364_vm11 = vcmp.eq.f32.partialorder %v1360_v50, 0.0  ;;  %v6177_v50 = vsel %vm160_vm10, 0.0, %v5954_v32 }
 0x7e9   :  { %vm1745_vm12 = vcmp.eq.f32.partialorder %v6177_v50, 0.0 }
 0x7ef   :  { %v5712_v45 = vpop.eup %5711 }
 0x7f0   :  { %v1276_v49 = vmul.f32 %v5712_v45, %v5708_v37  ;;  %v1406_v37 = vld [vmem:[%s6115_s18 + $0x8] sm:$0xff] }
 0x7f1   :  { %v5714_v47 = vpop.eup %5713 }
 0x7f2   :  { %v1275_v48 = vmul.f32 %v5714_v47, %v5710_v39  ;;  %v5845_v47 = vmov -inf  }
 0x7f4   :  { %5261 = vmatprep.mubr.msk.f32.mxu0 %vm522_vm9, %v1275_v48  ;;  %v6161_v48 = vsel %vm522_vm9, -1e+09, %v5845_v47 }
 0x7f5   :  { %5262 = vmatmul.mubr.msk.f32.vlgmr.msra.gmra.mxu0 %vm522_vm9, %v1276_v49 }
 0x7f6   :  { %5276 = vmatpush3.msra.mxu0 %v1412_v6 }
 0x7f7   :  { %5277 = vmatprep.subr.mxu0 %v1411_v7 }
 0x7f8   :  { %5278 = vmatpush3.msra.mxu0 %v1411_v7 }
 0x7f9   :  { %5279 = vmatprep.subr.mxu0 %v1410_v9 }
 0x7fa   :  { %5280 = vmatpush3.msra.mxu0 %v1410_v9 }
 0x7fb   :  { %5281 = vmatprep.subr.mxu0 %v1409_v10 }
 0x7fc   :  { %5282 = vmatpush3.msra.mxu0 %v1409_v10 }
 0x7fd   :  { %5283 = vmatprep.subr.mxu0 %v1408_v11 }
 0x7fe   :  { %5284 = vmatpush3.msra.mxu0 %v1408_v11 }
 0x7ff   :  { %5285 = vmatprep.subr.mxu0 %v1407_v12 }
 0x800   :  { %5286 = vmatpush3.msra.mxu0 %v1407_v12 }
 0x801   :  { %5287 = vmatprep.subr.mxu0 %v1406_v37 }
 0x802   :  { %5288 = vmatpush3.msra.mxu0 %v1406_v37 }
 0x803   :  { %5289 = vmatprep.subr.mxu0 %v1405_v38 }
 0x804   :  { %5290 = vmatpush3.msra.mxu0 %v1405_v38 }
 0x8b5   :  { %v5263_v36 = vpop.f32.mrf.mxu0 }
 0x8b6   :  { %v1371_v46 = vsel %vm1365_vm6, 0.0, %v5263_v36 }
 0x8b7   :  { %v1373_v51 = vadd.f32 %v1371_v46, %v5894_v8  ;;  %v1349_v53 = vpop.f32.mrf.mxu0 }
 0x8b8   :  { %v1370_v54 = vsel %vm1364_vm11, 0.0, %v1349_v53 }
 0x8b9   :  { %v1372_v55 = vadd.f32 %v1370_v54, %v5886_v2  ;;  %v1377_v57 = vsel %vm193_vm0, %v1373_v51, 0.0  ;;  %v1404_v2 = vld [vmem:[%s4787_s14 + $0x18] sm:$0xff] }
 0x8ba   :  { %1378 = vadd.xlane.f32.xlu1 %v1377_v57  ;;  %5264 = vmatprep.subr.mxu1 %v1404_v2 }
 0x8bb   :  { %v1374_v58 = vsel %vm193_vm0, %v1372_v55, 0.0  ;;  %5265 = vmatpush3.msra.mxu1 %v1404_v2 }
 0x8bc   :  { %1375 = vadd.xlane.f32.xlu0 %v1374_v58  ;;  %5266 = vmatprep.subr.mxu1 %v1403_v3 }
 0x8bd   :  { %5267 = vmatpush3.msra.mxu1 %v1403_v3 }
 0x8be   :  { %5268 = vmatprep.subr.mxu1 %v1402_v4 }
 0x8bf   :  { %5269 = vmatpush3.msra.mxu1 %v1402_v4 }
 0x8c0   :  { %5270 = vmatprep.subr.mxu1 %v1401_v5 }
 0x8c1   :  { %5271 = vmatpush3.msra.mxu1 %v1401_v5 }
 0x8c2   :  { %5294 = vmatprep.subr.mxu1 %v5825_v14 }
 0x943   :  { %v1379_v60 = vpop.xlane.xlu1 %1378 }
 0x944   :  { %v1382_v17 = vmul.f32 0.03125, %v1379_v60 }
 0x945   :  { %v1376_v61 = vpop.xlane.xlu0 %1375 }
 0x946   :  { %v1384_v52 = vsub.f32 %v1373_v51, %v1382_v17  ;;  %v1381_v63 = vmul.f32 0.03125, %v1376_v61 }
 0x948   :  { %v1383_v0 = vsub.f32 %v1372_v55, %v1381_v63  ;;  %v1386_v1 = vmul.f32 %v1384_v52, %v1384_v52 }
 0x94a   :  { %v1390_v62 = vsel %vm193_vm0, %v1386_v1, 0.0  ;;  %v1385_v8 = vmul.f32 %v1383_v0, %v1383_v0 }
 0x94b   :  { %1391 = vadd.xlane.f32.xlu1 %v1390_v62 }
 0x94c   :  { %v1387_v56 = vsel %vm193_vm0, %v1385_v8, 0.0 }
 0x94d   :  { %1388 = vadd.xlane.f32.xlu0 %v1387_v56 }
 0x9d4   :  { %v1392_v13 = vpop.xlane.xlu1 %1391 }
 0x9d5   :  { %v1394_v19 = vmul.f32 0.03125, %v1392_v13 }
 0x9d6   :  { %v1389_v20 = vpop.xlane.xlu0 %1388 }
 0x9d7   :  { %v1396_v21 = vadd.f32 1e-05, %v1394_v19  ;;  %v1393_v24 = vmul.f32 0.03125, %v1389_v20 }
 0x9d9   :  { %v1395_v26 = vadd.f32 1e-05, %v1393_v24  ;;  %5715 = vrsqrt.f32 %v1396_v21 }
 0x9db   :  { %5717 = vrsqrt.f32 %v1395_v26 }
 0x9e6   :  { %v5716_v27 = vpop.eup %5715 }
 0x9e7   :  { %v6125_v34 = vmul.f32 %v5716_v27, %v1384_v52 }
 0x9e8   :  { %v5718_v22 = vpop.eup %5717 }
 0x9e9   :  { %v6123_v33 = vmul.f32 %v5718_v22, %v1383_v0 }
 0x9eb   :  { %5272 = vmatprep.mubr.msk.f32.mxu1 %vm193_vm0, %v6123_v33 }
 0x9ec   :  { %5273 = vmatmul.mubr.msk.f32.vlgmr.msra.gmra.mxu1 %vm193_vm0, %v6125_v34 }
 0x9ed   :  { %5298 = vmatprep.mubr.msk.f32.mxu1 %vm5826_vm1, %v5825_v14 }
 0xaac   :  { %v6138_v39 = vpop.f32.mrf.mxu1 }
 0xaad   :  { %5295 = vmatpush3.xpose.msk.msra.mxu1 %vm275_vm2, %v6138_v39 }
 0xaae   :  { %v6142_v40 = vpop.f32.mrf.mxu1  ;;  %5296 = vmatprep.subr.mxu1 %v5825_v14 }
 0xaaf   :  { %5291 = vmatprep.mubr.msk.f32.mxu0 %vm275_vm2, %v6142_v40 }
 0xab0   :  { %5292 = vmatmul.mubr.msk.f32.vlgmr.msra.gmra.mxu0 %vm275_vm2, %v6138_v39 }
 0xab1   :  { %5297 = vmatpush3.xpose.msk.msra.mxu1 %vm275_vm2, %v6142_v40 }
 0xab2   :  { %5301 = vmatprep.subr.mxu1 %v6138_v39 }
 0xab4   :  { %5299 = vmatmul.mubr.msk.f32.vlgmr.msra.gmra.mxu1 %vm275_vm2, %v1413_v41 }
 0xab5   :  { %5302 = vmatpush3.msra.mxu1 %v6138_v39 }
 0xab6   :  { %5303 = vmatprep.subr.mxu1 %v6142_v40 }
 0xab7   :  { %5304 = vmatpush3.msra.mxu1 %v6142_v40 }
 0xb70   :  { %v5293_v42 = vpop.f32.mrf.mxu0 }
 0xb71   :  { %1683 = vperm.xlu1 %5662, %v5293_v42   ;;  %1669 = vperm.xlu0 %5660, %v5293_v42  }
 0xb72   :  { %v1580_v43 = vpop.f32.mrf.mxu0 }
 0xb74   :  { %v1658_v44 = vpop.f32.mrf.mxu1 }
 0xb75   :  { %5663 = vset.pattern.permute.xlu1 %v5830_v23  ;;  %5664 = vset.pattern.permute.xlu0 %v5831_v25  ;;  %v1689_v49 = vrot.slane %v1658_v44, %v5947_v30  ;;  %v1675_v18 = vrot.slane %v1658_v44, %v5949_v31  ;;  %v1703_v57 = vrot.slane %v1658_v44, %v5964_v35 }
 0xb76   :  { %1697 = vperm.xlu1 %5663, %v5293_v42   ;;  %1711 = vperm.xlu0 %5664, %v5293_v42   ;;  %v5300_v45 = vpop.f32.mrf.mxu1  ;;  %v1717_v58 = vrot.slane %v1658_v44, %v5983_v59 }
 0xb7a   :  { %5665 = vset.pattern.permute.xlu0 %v5828_v16  ;;  %5666 = vset.pattern.permute.xlu1 %v5828_v16 }
 0xb9a   :  { %1755 = vmax.xlane.f32.xlu1 %v6161_v48 }
 0xb9e   :  { %1761 = vmax.xlane.f32.xlu1 %v6161_v48 }
 0xba2   :  { %1767 = vmax.xlane.f32.xlu1 %v6161_v48 }
 0xba6   :  { %1773 = vmax.xlane.f32.xlu1 %v6161_v48 }
 0xbec   :  { %v1684_v36 = vpop.permute.xlu1 %1683  ;;  %v1670_v46 = vpop.permute.xlu0 %1669 }
 0xbed   :  { %v1691_v51 = vadd.f32 %v1689_v49, %v1684_v36  ;;  %v1677_v53 = vadd.f32 %v1675_v18, %v1670_v46 }
 0xbef   :  { %v1731_v54 = vmul.f32 0.2, %v1691_v51  ;;  %v1729_v55 = vmul.f32 0.2, %v1677_v53  ;;  %vm1721_vm13 = vcmp.ge.f32.partialorder %v1677_v53, 0.0  ;;  %vm1723_vm6 = vcmp.ge.f32.partialorder %v1691_v51, 0.0 }
 0xbf1   :  { %v1698_v60 = vpop.permute.xlu1 %1697  ;;  %v1712_v17 = vpop.permute.xlu0 %1711  ;;  %v1737_v61 = vsel %vm1721_vm13, %v1677_v53, %v1729_v55  ;;  %v1739_v52 = vsel %vm1723_vm6, %v1691_v51, %v1731_v54 }
 0xbf2   :  { %v1705_v32 = vadd.f32 %v1703_v57, %v1698_v60  ;;  %v1719_v63 = vadd.f32 %v1717_v58, %v1712_v17  ;;  %v1747_v0 = vsel %vm1745_vm12, -1e+09, %v1737_v61  ;;  %v1749_v8 = vsel %vm1745_vm12, -1e+09, %v1739_v52 }
 0xbf3   :  { %v1757_v1 = vsel %vm522_vm9, %v1747_v0, -inf  ;;  %v1763_v3 = vsel %vm522_vm9, %v1749_v8, -inf }
 0xbf4   :  { %v1733_v62 = vmul.f32 0.2, %v1705_v32  ;;  %1758 = vmax.xlane.f32.xlu0 %v1757_v1  ;;  %vm1725_vm11 = vcmp.ge.f32.partialorder %v1705_v32, 0.0  ;;  %v1735_v56 = vmul.f32 0.2, %v1719_v63  ;;  %vm1727_vm15 = vcmp.ge.f32.partialorder %v1719_v63, 0.0 }
 0xbf6   :  { %v1741_v2 = vsel %vm1725_vm11, %v1705_v32, %v1733_v62  ;;  %v1743_v5 = vsel %vm1727_vm15, %v1719_v63, %v1735_v56  ;;  %vm164_vm11 = vcmp.lt.s32.totalorder %v5943_v28, 13 }
 0xbf7   :  { %v1751_v4 = vsel %vm1745_vm12, -1e+09, %v1741_v2  ;;  %v1753_v7 = vsel %vm1745_vm12, -1e+09, %v1743_v5 }
 0xbf8   :  { %1764 = vmax.xlane.f32.xlu0 %v1763_v3  ;;  %v1769_v6 = vsel %vm522_vm9, %v1751_v4, -inf  ;;  %v1775_v9 = vsel %vm522_vm9, %v1753_v7, -inf }
 0xbfc   :  { %1770 = vmax.xlane.f32.xlu0 %v1769_v6 }
 0xc00   :  { %1776 = vmax.xlane.f32.xlu0 %v1775_v9 }
 0xc16   :  { %1923 = vrot.lane.b32.xlu0 %v6142_v40, %s5833_s22 }
 0xc23   :  { %v1756_v10 = vpop.xlane.xlu1 %1755 }
 0xc24   :  { %v1778_v11 = vsub.f32 -1e+09, %v1756_v10 }
 0xc26   :  { %v1786_v12 = vmul.f32 1.442695, %v1778_v11 }
 0xc27   :  { %v1762_v13 = vpop.xlane.xlu1 %1761 }
 0xc28   :  { %5719 = vpow2.f32 %v1786_v12  ;;  %v1780_v19 = vsub.f32 -1e+09, %v1762_v13 }
 0xc2a   :  { %v1790_v20 = vmul.f32 1.442695, %v1780_v19 }
 0xc2b   :  { %v1768_v21 = vpop.xlane.xlu1 %1767 }
 0xc2c   :  { %5721 = vpow2.f32 %v1790_v20  ;;  %v1782_v24 = vsub.f32 -1e+09, %v1768_v21 }
 0xc2e   :  { %v1794_v26 = vmul.f32 1.442695, %v1782_v24 }
 0xc2f   :  { %v1774_v27 = vpop.xlane.xlu1 %1773 }
 0xc30   :  { %5723 = vpow2.f32 %v1794_v26  ;;  %v1784_v22 = vsub.f32 -1e+09, %v1774_v27 }
 0xc32   :  { %v1798_v37 = vmul.f32 1.442695, %v1784_v22 }
 0xc34   :  { %5725 = vpow2.f32 %v1798_v37 }
 0xc35   :  { %v5720_v38 = vpop.eup %5719 }
 0xc36   :  { %v1802_v41 = vsel %vm522_vm9, %v5720_v38, 0.0 }
 0xc37   :  { %1803 = vadd.xlane.f32.xlu1 %v1802_v41 }
 0xc39   :  { %v5722_v42 = vpop.eup %5721 }
 0xc3a   :  { %v1808_v43 = vsel %vm522_vm9, %v5722_v42, 0.0 }
 0xc3b   :  { %1809 = vadd.xlane.f32.xlu1 %v1808_v43 }
 0xc3d   :  { %v6198_v44 = vpop.eup %5723 }
 0xc3e   :  { %v1814_v45 = vsel %vm522_vm9, %v6198_v44, 0.0 }
 0xc3f   :  { %1815 = vadd.xlane.f32.xlu1 %v1814_v45 }
 0xc41   :  { %v6202_v47 = vpop.eup %5725 }
 0xc42   :  { %v1820_v49 = vsel %vm522_vm9, %v6202_v47, 0.0 }
 0xc43   :  { %1821 = vadd.xlane.f32.xlu1 %v1820_v49 }
 0xc54   :  { %1925 = vrot.lane.b32.xlu1 %v6138_v39, %s5833_s22 }
 0xc58   :  { %2012 = vrot.lane.b32.xlu1 %v6138_v39, %s5834_s23 }
 0xc5c   :  { %2099 = vrot.lane.b32.xlu1 %v6138_v39, %s5835_s24 }
 0xc60   :  { %2097 = vrot.lane.b32.xlu1 %v6142_v40, %s5835_s24 }
 0xc7d   :  { %v1759_v18 = vpop.xlane.xlu0 %1758 }
 0xc7e   :  { %v1779_v36 = vsub.f32 %v1747_v0, %v1759_v18 }
 0xc80   :  { %v1788_v46 = vmul.f32 1.442695, %v1779_v36 }
 0xc81   :  { %v1765_v51 = vpop.xlane.xlu0 %1764 }
 0xc82   :  { %5727 = vpow2.f32 %v1788_v46  ;;  %v1781_v53 = vsub.f32 %v1749_v8, %v1765_v51 }
 0xc84   :  { %v1792_v54 = vmul.f32 1.442695, %v1781_v53 }
 0xc85   :  { %v1771_v55 = vpop.xlane.xlu0 %1770 }
 0xc86   :  { %5729 = vpow2.f32 %v1792_v54  ;;  %v1783_v57 = vsub.f32 %v1751_v4, %v1771_v55  ;;  %v1421_v55 = vld [vmem:[%s6233_s3 + $0x38] sm:$0xff] }
 0xc88   :  { %v1796_v58 = vmul.f32 1.442695, %v1783_v57 }
 0xc89   :  { %v1777_v60 = vpop.xlane.xlu0 %1776 }
 0xc8a   :  { %5731 = vpow2.f32 %v1796_v58  ;;  %v1785_v17 = vsub.f32 %v1753_v7, %v1777_v60  ;;  %v1420_v58 = vld [vmem:[%s6233_s3 + $0x30] sm:$0xff] }
 0xc8c   :  { %v1800_v61 = vmul.f32 1.442695, %v1785_v17  ;;  %v1419_v17 = vld [vmem:[%s6233_s3 + $0x28] sm:$0xff] }
 0xc8d   :  { %v1924_v10 = vpop.permute.xlu0 %1923 }
 0xc8e   :  { %5733 = vpow2.f32 %v1800_v61 }
 0xc8f   :  { %v5728_v39 = vpop.eup %5727 }
 0xc90   :  { %v1805_v52 = vsel %vm522_vm9, %v5728_v39, 0.0 }
 0xc91   :  { %1806 = vadd.xlane.f32.xlu0 %v1805_v52  ;;  %v1417_v52 = vld [vmem:[%s6233_s3 + $0x18] sm:$0xff] }
 0xc93   :  { %v5730_v32 = vpop.eup %5729 }
 0xc94   :  { %v1811_v63 = vsel %vm522_vm9, %v5730_v32, 0.0 }
 0xc95   :  { %1812 = vadd.xlane.f32.xlu0 %v1811_v63  ;;  %v1415_v63 = vld [vmem:[%s6233_s3 + $0x8] sm:$0xff] }
 0xc97   :  { %v5732_v0 = vpop.eup %5731 }
 0xc98   :  { %v1817_v1 = vsel %vm522_vm9, %v5732_v0, 0.0 }
 0xc99   :  { %1818 = vadd.xlane.f32.xlu0 %v1817_v1  ;;  %v1425_v1 = vld [vmem:[%s6252_s7 + $0x18] sm:$0xff] }
 0xc9b   :  { %v5734_v62 = vpop.eup %5733 }
 0xc9c   :  { %v1823_v8 = vsel %vm522_vm9, %v5734_v62, 0.0 }
 0xc9d   :  { %1824 = vadd.xlane.f32.xlu0 %v1823_v8  ;;  %v1423_v8 = vld [vmem:[%s6252_s7 + $0x8] sm:$0xff] }
 0xcb3   :  { %2010 = vrot.lane.b32.xlu0 %v6142_v40, %s5834_s23 }
 0xcc0   :  { %v1804_v56 = vpop.xlane.xlu1 %1803 }
 0xcc1   :  { %5735 = vrcp.f32 %v1804_v56 }
 0xcc4   :  { %v1810_v2 = vpop.xlane.xlu1 %1809 }
 0xcc5   :  { %5737 = vrcp.f32 %v1810_v2 }
 0xcc8   :  { %v1816_v3 = vpop.xlane.xlu1 %1815 }
 0xcc9   :  { %5739 = vrcp.f32 %v1816_v3 }
 0xccc   :  { %v1822_v4 = vpop.xlane.xlu1 %1821 }
 0xcce   :  { %v5736_v5 = vpop.eup %5735 }
 0xccf   :  { %v1834_v6 = vmul.f32 %v5736_v5, %v5720_v38 }
 0xcd0   :  { %v1926_v7 = vpop.permute.xlu1 %1925 }
 0xcd1   :  { %5305 = vmatprep.mubr.msk.f32.mxu1 %vm522_vm9, %v1834_v6  ;;  %5308 = vmatprep.subr.mxu0 %v1926_v7 }
 0xcd2   :  { %v5738_v9 = vpop.eup %5737  ;;  %5309 = vmatpush3.msra.mxu0 %v1926_v7 }
 0xcd3   :  { %5310 = vmatprep.subr.mxu0 %v1924_v10  ;;  %v1836_v11 = vmul.f32 %v5738_v9, %v5722_v42 }
 0xcd4   :  { %v2013_v12 = vpop.permute.xlu1 %2012  ;;  %5311 = vmatpush3.msra.mxu0 %v1924_v10 }
 0xcd5   :  { %5312 = vmatprep.mubr.msk.f32.mxu0 %vm522_vm9, %v1836_v11  ;;  %5315 = vmatprep.subr.mxu1 %v2013_v12 }
 0xcd6   :  { %v5740_v24 = vpop.eup %5739 }
 0xcd7   :  { %v1838_v37 = vmul.f32 %v5740_v24, %v6198_v44 }
 0xcd8   :  { %v2100_v40 = vpop.permute.xlu1 %2099 }
 0xcd9   :  { %5322 = vmatprep.subr.mxu0 %v2100_v40 }
 0xcdc   :  { %v2098_v49 = vpop.permute.xlu1 %2097 }
 0xd1a   :  { %v1807_v13 = vpop.xlane.xlu0 %1806 }
 0xd1b   :  { %5741 = vrcp.f32 %v1807_v13 }
 0xd1c   :  { %5743 = vrcp.f32 %v1822_v4 }
 0xd1e   :  { %v1813_v19 = vpop.xlane.xlu0 %1812 }
 0xd1f   :  { %5745 = vrcp.f32 %v1813_v19 }
 0xd22   :  { %v1819_v20 = vpop.xlane.xlu0 %1818 }
 0xd23   :  { %5747 = vrcp.f32 %v1819_v20 }
 0xd26   :  { %v1825_v21 = vpop.xlane.xlu0 %1824 }
 0xd27   :  { %5749 = vrcp.f32 %v1825_v21 }
 0xd28   :  { %v5742_v26 = vpop.eup %5741 }
 0xd29   :  { %v1835_v27 = vmul.f32 %v5742_v26, %v5728_v39  ;;  %v5744_v38 = vpop.eup %5743  ;;  %v1418_v39 = vld [vmem:[%s6233_s3 + $0x20] sm:$0xff] }
 0xd2a   :  { %v2011_v22 = vpop.permute.xlu0 %2010  ;;  %v1840_v43 = vmul.f32 %v5744_v38, %v6202_v47 }
 0xd2b   :  { %5306 = vmatmul.mubr.msk.f32.vlgmr.msra.gmra.mxu1 %vm522_vm9, %v1835_v27 }
 0xd2c   :  { %v5746_v41 = vpop.eup %5745  ;;  %5316 = vmatpush3.msra.mxu1 %v2013_v12  ;;  %5319 = vmatprep.mubr.msk.f32.mxu1 %vm522_vm9, %v1838_v37 }
 0xd2d   :  { %5317 = vmatprep.subr.mxu1 %v2011_v22  ;;  %v1837_v42 = vmul.f32 %v5746_v41, %v5730_v32  ;;  %v1416_v32 = vld [vmem:[%s6233_s3 + $0x10] sm:$0xff]  ;;  %v1422_v41 = vld [vmem:[%s6252_s7] sm:$0xff] }
 0xd2e   :  { %5318 = vmatpush3.msra.mxu1 %v2011_v22 }
 0xd2f   :  { %5313 = vmatmul.mubr.msk.f32.vlgmr.msra.gmra.mxu0 %vm522_vm9, %v1837_v42  ;;  %5329 = vmatprep.subr.mxu1 %v1421_v55 }
 0xd30   :  { %v5748_v45 = vpop.eup %5747  ;;  %5323 = vmatpush3.msra.mxu0 %v2100_v40  ;;  %5326 = vmatprep.mubr.msk.f32.mxu0 %vm522_vm9, %v1840_v43 }
 0xd31   :  { %5324 = vmatprep.subr.mxu0 %v2098_v49  ;;  %v1839_v44 = vmul.f32 %v5748_v45, %v5732_v0  ;;  %v1414_v0 = vld [vmem:[%s6233_s3] sm:$0xff]  ;;  %s4811_s3 = sld [smem:[%s6636_s0 + %s5837_s29]]  }
 0xd32   :  { %5325 = vmatpush3.msra.mxu0 %v2098_v49  ;;  %v1426_v45 = vld [vmem:[%s4792_s12] sm:$0x1]  ;;  %s6529_s12 = sld [smem:[%s6636_s0 + %s5855_s8]]  }
 0xd33   :  { %5320 = vmatmul.mubr.msk.f32.vlgmr.msra.gmra.mxu1 %vm522_vm9, %v1839_v44  ;;  %5348 = vmatprep.subr.mxu0 %v1425_v1 }
 0xd34   :  { %v5750_v18 = vpop.eup %5749  ;;  %5330 = vmatpush3.msra.mxu1 %v1421_v55 }
 0xd35   :  { %v1841_v36 = vmul.f32 %v5750_v18, %v5734_v62  ;;  %5331 = vmatprep.subr.mxu1 %v1420_v58  ;;  %v1424_v62 = vld [vmem:[%s6252_s7 + $0x10] sm:$0xff]  ;;  %s4798_s7 = sld [smem:[%s6636_s0 + %s5853_s4]]  }
 0xd36   :  { %5332 = vmatpush3.msra.mxu1 %v1420_v58  ;;  %s4804_s4 = sld [smem:[%s6636_s0 + %s5860_s2]]  }
 0xd37   :  { %5327 = vmatmul.mubr.msk.f32.vlgmr.msra.gmra.mxu0 %vm522_vm9, %v1841_v36  ;;  %5333 = vmatprep.subr.mxu1 %v1419_v17 }
 0xd38   :  { %5334 = vmatpush3.msra.mxu1 %v1419_v17  ;;  %5349 = vmatpush3.msra.mxu0 %v1425_v1 }
 0xd39   :  { %5335 = vmatprep.subr.mxu1 %v1418_v39  ;;  %5350 = vmatprep.subr.mxu0 %v1424_v62 }
 0xd3a   :  { %5336 = vmatpush3.msra.mxu1 %v1418_v39  ;;  %5351 = vmatpush3.msra.mxu0 %v1424_v62 }
 0xd3b   :  { %5337 = vmatprep.subr.mxu1 %v1417_v52  ;;  %5352 = vmatprep.subr.mxu0 %v1423_v8 }
 0xd3c   :  { %5338 = vmatpush3.msra.mxu1 %v1417_v52  ;;  %5353 = vmatpush3.msra.mxu0 %v1423_v8 }
 0xd3d   :  { %5339 = vmatprep.subr.mxu1 %v1416_v32  ;;  %5354 = vmatprep.subr.mxu0 %v1422_v41 }
 0xd3e   :  { %5340 = vmatpush3.msra.mxu1 %v1416_v32  ;;  %5355 = vmatpush3.msra.mxu0 %v1422_v41 }
 0xd3f   :  { %5341 = vmatprep.subr.mxu1 %v1415_v63  ;;  %5359 = vmatprep.subr.mxu0 %v5825_v14 }
 0xd40   :  { %5342 = vmatpush3.msra.mxu1 %v1415_v63 }
 0xd41   :  { %5343 = vmatprep.subr.mxu1 %v1414_v0 }
 0xd42   :  { %5344 = vmatpush3.msra.mxu1 %v1414_v0 }
 0xdeb   :  { %v5307_v46 = vpop.f32.mrf.mxu1 }
 0xded   :  { %v1914_v51 = vpop.f32.mrf.mxu1 }
 0xdef   :  { %v5314_v47 = vpop.f32.mrf.mxu0 }
 0xdf0   :  { %2188 = vrot.lane.b32.xlu1 %v5314_v47, %s5838_s30 }
 0xdf1   :  { %v2001_v53 = vpop.f32.mrf.mxu0 }
 0xdf2   :  { %2186 = vrot.lane.b32.xlu0 %v2001_v53, %s5838_s30 }
 0xdf3   :  { %v5321_v54 = vpop.f32.mrf.mxu1 }
 0xdf4   :  { %2196 = vrot.lane.b32.xlu1 %v5321_v54, %s5837_s29 }
 0xdf5   :  { %v2088_v57 = vpop.f32.mrf.mxu1 }
 0xdf6   :  { %2194 = vrot.lane.b32.xlu0 %v2088_v57, %s5837_s29 }
 0xdf7   :  { %v5328_v60 = vpop.f32.mrf.mxu0 }
 0xdf8   :  { %2204 = vrot.lane.b32.xlu1 %v5328_v60, %s5839_s1 }
 0xdf9   :  { %v2175_v61 = vpop.f32.mrf.mxu0 }
 0xdfa   :  { %2202 = vrot.lane.b32.xlu0 %v2175_v61, %s5839_s1 }
 0xe1c   :  { %2486 = vmax.xlane.f32.xlu1 %v6161_v48 }
 0xe62   :  { %v2189_v56 = vpop.permute.xlu1 %2188 }
 0xe63   :  { %v2209_v5 = vsel %vm522_vm9, %v5307_v46, %v2189_v56  ;;  %v2591_v56 = vsel %vm522_vm9, %v6177_v50, 0.0 }
 0xe64   :  { %v2187_v2 = vpop.permute.xlu0 %2186 }
 0xe65   :  { %v2208_v9 = vsel %vm522_vm9, %v1914_v51, %v2187_v2 }
 0xe66   :  { %v2197_v3 = vpop.permute.xlu1 %2196 }
 0xe67   :  { %v2211_v6 = vsel %vm193_vm0, %v2209_v5, %v2197_v3 }
 0xe68   :  { %v2195_v4 = vpop.permute.xlu0 %2194 }
 0xe69   :  { %v2210_v11 = vsel %vm193_vm0, %v2208_v9, %v2195_v4 }
 0xe6a   :  { %v2205_v7 = vpop.permute.xlu1 %2204 }
 0xe6b   :  { %v2213_v10 = vsel %vm981_vm7, %v2211_v6, %v2205_v7 }
 0xe6c   :  { %v2217_v12 = vmin.f32 %v2213_v10, 0.0  ;;  %v2203_v40 = vpop.permute.xlu0 %2202  ;;  %vm2215_vm10 = vcmp.gt.f32.partialorder %v2213_v10, 0.0 }
 0xe6d   :  { %v2212_v13 = vsel %vm981_vm7, %v2210_v11, %v2203_v40 }
 0xe6e   :  { %v2220_v19 = vmul.f32 1.442695, %v2217_v12  ;;  %v2216_v20 = vmin.f32 %v2212_v13, 0.0  ;;  %vm2214_vm5 = vcmp.gt.f32.partialorder %v2212_v13, 0.0 }
 0xe70   :  { %5751 = vpow2.f32 %v2220_v19  ;;  %v2218_v21 = vmul.f32 1.442695, %v2216_v20 }
 0xe72   :  { %5753 = vpow2.f32 %v2218_v21 }
 0xe7d   :  { %v5752_v24 = vpop.eup %5751 }
 0xe7e   :  { %v4854_v27 = vadd.f32 -1.0, %v5752_v24 }
 0xe7f   :  { %v5754_v26 = vpop.eup %5753 }
 0xe80   :  { %v4853_v22 = vadd.f32 -1.0, %v5754_v26  ;;  %v2225_v38 = vsel %vm2215_vm10, %v2213_v10, %v4854_v27 }
 0xe82   :  { %v2224_v37 = vsel %vm2214_vm5, %v2212_v13, %v4853_v22 }
 0xe83   :  { %5345 = vmatprep.mubr.msk.f32.mxu1 %vm275_vm2, %v2224_v37 }
 0xe84   :  { %5346 = vmatmul.mubr.msk.f32.vlgmr.msra.gmra.mxu1 %vm275_vm2, %v2225_v38 }
 0xea5   :  { %v2487_v49 = vpop.xlane.xlu1 %2486 }
 0xea6   :  { %v2491_v44 = vsub.f32 -1e+09, %v2487_v49  ;;  %v2630_v49 = vld [vmem:[%s4793_s16] sm:$0xff] }
 0xea8   :  { %v2493_v18 = vmul.f32 1.442695, %v2491_v44  ;;  %v2641_v44 = vld [vmem:[%s6304_s20 + $0x38] sm:$0xff] }
 0xeaa   :  { %5755 = vpow2.f32 %v2493_v18  ;;  %v2640_v18 = vld [vmem:[%s6304_s20 + $0x30] sm:$0xff] }
 0xeb7   :  { %v5756_v46 = vpop.eup %5755 }
 0xeb8   :  { %v2497_v51 = vsel %vm522_vm9, %v5756_v46, 0.0 }
 0xeb9   :  { %2498 = vadd.xlane.f32.xlu1 %v2497_v51  ;;  %v2636_v51 = vld [vmem:[%s6304_s20 + $0x10] sm:$0xff] }
 0xebd   :  { %2589 = vadd.xlane.f32.xlu1 %v5825_v14 }
 0xf42   :  { %v2499_v52 = vpop.xlane.xlu1 %2498 }
 0xf43   :  { %5757 = vrcp.f32 %v2499_v52 }
 0xf44   :  { %v5347_v42 = vpop.f32.mrf.mxu1 }
 0xf45   :  { %5366 = vmatprep.subr.mxu1 %v5347_v42 }
 0xf46   :  { %v2298_v43 = vpop.f32.mrf.mxu1  ;;  %5367 = vmatpush3.msra.mxu1 %v5347_v42  ;;  %v2590_v6 = vpop.xlane.xlu1 %2589 }
 0xf47   :  { %5356 = vmatprep.mubr.msk.f32.mxu0 %vm193_vm0, %v2298_v43  ;;  %5368 = vmatprep.subr.mxu1 %v2298_v43  ;;  %vm2594_vm6 = vcmp.eq.f32.partialorder %v2590_v6, 0.0 }
 0xf48   :  { %5357 = vmatmul.mubr.msk.f32.vlgmr.msra.gmra.mxu0 %vm193_vm0, %v5347_v42  ;;  %5369 = vmatpush3.msra.mxu1 %v2298_v43 }
 0xf49   :  { %5360 = vmatpush3.xpose.msk.msra.mxu0 %vm193_vm0, %v5347_v42  ;;  %5363 = vmatprep.mubr.msk.f32.mxu0 %vm5826_vm1, %v5825_v14  ;;  %v2633_v42 = vld [vmem:[%s4793_s16 + $0x18] sm:$0xff] }
 0xf4a   :  { %5361 = vmatprep.subr.mxu0 %v5825_v14  ;;  %5384 = vmatprep.subr.mxu1 %v2641_v44 }
 0xf4d   :  { %5362 = vmatpush3.xpose.msk.msra.mxu0 %vm193_vm0, %v2298_v43  ;;  %v2632_v43 = vld [vmem:[%s4793_s16 + $0x10] sm:$0xff] }
 0xf4e   :  { %5373 = vmatprep.subr.mxu0 %v2633_v42 }
 0xf50   :  { %5364 = vmatmul.mubr.msk.f32.vlgmr.msra.gmra.mxu0 %vm193_vm0, %v1426_v45  ;;  %v2631_v45 = vld [vmem:[%s4793_s16 + $0x8] sm:$0xff]  ;;  %s6550_s16 = sld [smem:[%s6636_s0 + %s5856_s13]]  }
 0xf51   :  { %5374 = vmatpush3.msra.mxu0 %v2633_v42 }
 0xf52   :  { %5375 = vmatprep.subr.mxu0 %v2632_v43 }
 0xf53   :  { %5376 = vmatpush3.msra.mxu0 %v2632_v43 }
 0xf54   :  { %5377 = vmatprep.subr.mxu0 %v2631_v45 }
 0xf55   :  { %5378 = vmatpush3.msra.mxu0 %v2631_v45 }
 0xf56   :  { %5379 = vmatprep.subr.mxu0 %v2630_v49  ;;  %v4250_v28 = vld [vmem:[%s6550_s16 + $0x10] sm:$0xff] }
 0xf57   :  { %5380 = vmatpush3.msra.mxu0 %v2630_v49 }
 0xf58   :  { %5403 = vmatprep.subr.mxu0 %v5825_v14 }
0x1008   :  { %v5358_v36 = vpop.f32.mrf.mxu0 }
0x1009   :  { %2468 = vperm.xlu0 %5665, %v5358_v36   ;;  %v2639_v36 = vld [vmem:[%s6304_s20 + $0x28] sm:$0xff] }
0x100a   :  { %v2379_v47 = vpop.f32.mrf.mxu0 }
0x100b   :  { %v2637_v47 = vld [vmem:[%s6304_s20 + $0x18] sm:$0xff] }
0x100d   :  { %5667 = vset.pattern.permute.xlu0 %v5827_v15  ;;  %v5758_v15 = vpop.eup %5757 }
0x100e   :  { %v2505_v32 = vmul.f32 %v5758_v15, %v5756_v46  ;;  %v2638_v46 = vld [vmem:[%s6304_s20 + $0x20] sm:$0xff]  ;;  %v2635_v15 = vld [vmem:[%s6304_s20 + $0x8] sm:$0xff] }
0x1010   :  { %v2457_v53 = vpop.f32.mrf.mxu0  ;;  %5370 = vmatprep.mubr.msk.f32.mxu1 %vm522_vm9, %v2505_v32  ;;  %v2634_v32 = vld [vmem:[%s6304_s20] sm:$0xff]  ;;  %s6569_s20 = sld [smem:[%s6636_s0 + %s5857_s17]]  }
0x1011   :  { %v2474_v55 = vrot.slane %v2457_v53, %v5949_v31 }
0x1012   :  { %v5365_v54 = vpop.f32.mrf.mxu0 }
0x1084   :  { %v2469_v57 = vpop.permute.xlu0 %2468 }
0x1085   :  { %v2476_v58 = vadd.f32 %v2474_v55, %v2469_v57 }
0x1087   :  { %v2480_v60 = vmul.f32 0.2, %v2476_v58  ;;  %vm2478_vm13 = vcmp.ge.f32.partialorder %v2476_v58, 0.0 }
0x1089   :  { %v2482_v17 = vsel %vm2478_vm13, %v2476_v58, %v2480_v60 }
0x108a   :  { %v2484_v61 = vsel %vm1745_vm12, -1e+09, %v2482_v17 }
0x108b   :  { %v2488_v39 = vsel %vm522_vm9, %v2484_v61, -inf }
0x108c   :  { %2489 = vmax.xlane.f32.xlu0 %v2488_v39 }
0x1115   :  { %v2490_v63 = vpop.xlane.xlu0 %2489 }
0x1116   :  { %v2492_v0 = vsub.f32 %v2484_v61, %v2490_v63 }
0x1118   :  { %v2495_v1 = vmul.f32 1.442695, %v2492_v0 }
0x111a   :  { %5759 = vpow2.f32 %v2495_v1  ;;  %v2642_v1 = vld [vmem:[%s4795_s27] sm:$0xf] }
0x1127   :  { %v5760_v62 = vpop.eup %5759 }
0x1128   :  { %v2500_v8 = vsel %vm522_vm9, %v5760_v62, 0.0 }
0x1129   :  { %2501 = vadd.xlane.f32.xlu0 %v2500_v8 }
0x112d   :  { %2592 = vadd.xlane.f32.xlu0 %v2591_v56 }
0x11b2   :  { %v2502_v2 = vpop.xlane.xlu0 %2501 }
0x11b3   :  { %5761 = vrcp.f32 %v2502_v2 }
0x11b6   :  { %v2593_v5 = vpop.xlane.xlu0 %2592 }
0x11b7   :  { %vm2595_vm12 = vcmp.eq.f32.partialorder %v2593_v5, 0.0 }
0x11c0   :  { %v5762_v3 = vpop.eup %5761 }
0x11c1   :  { %v2506_v4 = vmul.f32 %v5762_v3, %v5760_v62 }
0x11c3   :  { %5371 = vmatmul.mubr.msk.f32.vlgmr.msra.gmra.mxu1 %vm522_vm9, %v2506_v4 }
0x11c4   :  { %5385 = vmatpush3.msra.mxu1 %v2641_v44 }
0x11c5   :  { %5386 = vmatprep.subr.mxu1 %v2640_v18 }
0x11c6   :  { %5387 = vmatpush3.msra.mxu1 %v2640_v18 }
0x11c7   :  { %5388 = vmatprep.subr.mxu1 %v2639_v36 }
0x11c8   :  { %5389 = vmatpush3.msra.mxu1 %v2639_v36 }
0x11c9   :  { %5390 = vmatprep.subr.mxu1 %v2638_v46 }
0x11ca   :  { %5391 = vmatpush3.msra.mxu1 %v2638_v46 }
0x11cb   :  { %5392 = vmatprep.subr.mxu1 %v2637_v47 }
0x11cc   :  { %5393 = vmatpush3.msra.mxu1 %v2637_v47 }
0x11cd   :  { %5394 = vmatprep.subr.mxu1 %v2636_v51 }
0x11ce   :  { %5395 = vmatpush3.msra.mxu1 %v2636_v51 }
0x11cf   :  { %5396 = vmatprep.subr.mxu1 %v2635_v15 }
0x11d0   :  { %5397 = vmatpush3.msra.mxu1 %v2635_v15 }
0x11d1   :  { %5398 = vmatprep.subr.mxu1 %v2634_v32 }
0x11d2   :  { %5399 = vmatpush3.msra.mxu1 %v2634_v32 }
0x1283   :  { %v5372_v7 = vpop.f32.mrf.mxu1 }
0x1284   :  { %v2601_v9 = vsel %vm2595_vm12, 0.0, %v5372_v7 }
0x1285   :  { %v2603_v10 = vadd.f32 %v2601_v9, %v6125_v34  ;;  %v2579_v11 = vpop.f32.mrf.mxu1 }
0x1286   :  { %v2600_v12 = vsel %vm2594_vm6, 0.0, %v2579_v11 }
0x1287   :  { %v2602_v40 = vadd.f32 %v2600_v12, %v6123_v33  ;;  %v2607_v50 = vsel %vm193_vm0, %v2603_v10, 0.0 }
0x1288   :  { %2608 = vadd.xlane.f32.xlu0 %v2607_v50 }
0x1289   :  { %v2604_v13 = vsel %vm193_vm0, %v2602_v40, 0.0 }
0x128a   :  { %2605 = vadd.xlane.f32.xlu1 %v2604_v13 }
0x1311   :  { %v2609_v19 = vpop.xlane.xlu0 %2608 }
0x1312   :  { %v2611_v20 = vmul.f32 0.03125, %v2609_v19 }
0x1313   :  { %v2606_v21 = vpop.xlane.xlu1 %2605 }
0x1314   :  { %v2613_v24 = vsub.f32 %v2603_v10, %v2611_v20  ;;  %v2610_v26 = vmul.f32 0.03125, %v2606_v21 }
0x1316   :  { %v2612_v27 = vsub.f32 %v2602_v40, %v2610_v26  ;;  %v2615_v22 = vmul.f32 %v2613_v24, %v2613_v24 }
0x1318   :  { %v2619_v37 = vsel %vm193_vm0, %v2615_v22, 0.0  ;;  %v2614_v38 = vmul.f32 %v2612_v27, %v2612_v27 }
0x1319   :  { %2620 = vadd.xlane.f32.xlu0 %v2619_v37 }
0x131a   :  { %v2616_v41 = vsel %vm193_vm0, %v2614_v38, 0.0 }
0x131b   :  { %2617 = vadd.xlane.f32.xlu1 %v2616_v41 }
0x13a2   :  { %v2621_v53 = vpop.xlane.xlu0 %2620 }
0x13a3   :  { %v2623_v54 = vmul.f32 0.03125, %v2621_v53 }
0x13a4   :  { %v2618_v55 = vpop.xlane.xlu1 %2617 }
0x13a5   :  { %v2625_v57 = vadd.f32 1e-05, %v2623_v54  ;;  %v2622_v58 = vmul.f32 0.03125, %v2618_v55 }
0x13a7   :  { %v2624_v60 = vadd.f32 1e-05, %v2622_v58  ;;  %5763 = vrsqrt.f32 %v2625_v57 }
0x13a9   :  { %5765 = vrsqrt.f32 %v2624_v60 }
0x13b4   :  { %v5764_v17 = vpop.eup %5763 }
0x13b5   :  { %v6314_v52 = vmul.f32 %v5764_v17, %v2613_v24 }
0x13b6   :  { %v5766_v61 = vpop.eup %5765 }
0x13b7   :  { %v6312_v39 = vmul.f32 %v5766_v61, %v2612_v27 }
0x13b9   :  { %5381 = vmatprep.mubr.msk.f32.mxu0 %vm193_vm0, %v6312_v39 }
0x13ba   :  { %5382 = vmatmul.mubr.msk.f32.vlgmr.msra.gmra.mxu0 %vm193_vm0, %v6314_v52 }
0x13bb   :  { %5407 = vmatprep.mubr.msk.f32.mxu0 %vm5826_vm1, %v5825_v14 }
0x147a   :  { %v6328_v63 = vpop.f32.mrf.mxu0 }
0x147b   :  { %5404 = vmatpush3.xpose.msk.msra.mxu0 %vm275_vm2, %v6328_v63 }
0x147c   :  { %v6332_v0 = vpop.f32.mrf.mxu0  ;;  %5405 = vmatprep.subr.mxu0 %v5825_v14 }
0x147d   :  { %5400 = vmatprep.mubr.msk.f32.mxu1 %vm275_vm2, %v6332_v0 }
0x147e   :  { %5401 = vmatmul.mubr.msk.f32.vlgmr.msra.gmra.mxu1 %vm275_vm2, %v6328_v63 }
0x147f   :  { %5406 = vmatpush3.xpose.msk.msra.mxu0 %vm275_vm2, %v6332_v0 }
0x1480   :  { %5410 = vmatprep.subr.mxu0 %v6328_v63 }
0x1482   :  { %5408 = vmatmul.mubr.msk.f32.vlgmr.msra.gmra.mxu0 %vm275_vm2, %v2642_v1 }
0x1483   :  { %5411 = vmatpush3.msra.mxu0 %v6328_v63 }
0x1484   :  { %5412 = vmatprep.subr.mxu0 %v6332_v0 }
0x1485   :  { %5413 = vmatpush3.msra.mxu0 %v6332_v0 }
0x153e   :  { %v5402_v62 = vpop.f32.mrf.mxu1 }
0x153f   :  { %2912 = vperm.xlu0 %5667, %v5402_v62   ;;  %2898 = vperm.xlu1 %5666, %v5402_v62  }
0x1540   :  { %v2809_v8 = vpop.f32.mrf.mxu1 }
0x1542   :  { %v2887_v56 = vpop.f32.mrf.mxu0 }
0x1543   :  { %5668 = vset.pattern.permute.xlu1 %v5830_v23  ;;  %5670 = vset.pattern.permute.xlu0 %v5828_v16  ;;  %v2918_v3 = vrot.slane %v2887_v56, %v5947_v30  ;;  %v2904_v4 = vrot.slane %v2887_v56, %v5949_v31  ;;  %v6356_v23 = vld [vmem:[%s5941_s21 + $0x8] sm:$0xff]  ;;  %v2932_v30 = vrot.slane %v2887_v56, %v5964_v35 }
0x1544   :  { %2926 = vperm.xlu1 %5668, %v5402_v62   ;;  %v5409_v2 = vpop.f32.mrf.mxu0  ;;  %v6361_v16 = vsel %vm164_vm11, 0.0, %v6356_v23  ;;  %v2946_v35 = vrot.slane %v2887_v56, %v5983_v59 }
0x1545   :  { %vm2974_vm15 = vcmp.eq.f32.partialorder %v6361_v16, 0.0 }
0x1548   :  { %5669 = vset.pattern.permute.xlu1 %v5831_v25 }
0x1549   :  { %2940 = vperm.xlu1 %5669, %v5402_v62  }
0x156d   :  { %2984 = vmax.xlane.f32.xlu1 %v6161_v48 }
0x1571   :  { %2990 = vmax.xlane.f32.xlu1 %v6161_v48 }
0x1575   :  { %2996 = vmax.xlane.f32.xlu1 %v6161_v48 }
0x15ba   :  { %v2913_v25 = vpop.permute.xlu0 %2912  ;;  %v2899_v5 = vpop.permute.xlu1 %2898 }
0x15bb   :  { %v2920_v6 = vadd.f32 %v2918_v3, %v2913_v25  ;;  %v2906_v7 = vadd.f32 %v2904_v4, %v2899_v5 }
0x15bd   :  { %vm2952_vm5 = vcmp.ge.f32.partialorder %v2920_v6, 0.0  ;;  %v2960_v9 = vmul.f32 0.2, %v2920_v6  ;;  %v2958_v10 = vmul.f32 0.2, %v2906_v7  ;;  %vm2950_vm10 = vcmp.ge.f32.partialorder %v2906_v7, 0.0 }
0x15bf   :  { %v2927_v11 = vpop.permute.xlu1 %2926  ;;  %v2968_v12 = vsel %vm2952_vm5, %v2920_v6, %v2960_v9  ;;  %v2966_v40 = vsel %vm2950_vm10, %v2906_v7, %v2958_v10  ;;  %vm3860_vm10 = vmand %vm153_vm14, %vm147_vm4 }
0x15c0   :  { %v2934_v50 = vadd.f32 %v2932_v30, %v2927_v11  ;;  %v2978_v13 = vsel %vm2974_vm15, -1e+09, %v2968_v12  ;;  %v2976_v19 = vsel %vm2974_vm15, -1e+09, %v2966_v40 }
0x15c1   :  { %v2992_v20 = vsel %vm522_vm9, %v2978_v13, -inf  ;;  %v2986_v21 = vsel %vm522_vm9, %v2976_v19, -inf }
0x15c2   :  { %vm2954_vm13 = vcmp.ge.f32.partialorder %v2934_v50, 0.0  ;;  %v2962_v24 = vmul.f32 0.2, %v2934_v50  ;;  %2993 = vmax.xlane.f32.xlu1 %v2992_v20  ;;  %2987 = vmax.xlane.f32.xlu0 %v2986_v21 }
0x15c4   :  { %v2941_v26 = vpop.permute.xlu1 %2940  ;;  %v2970_v27 = vsel %vm2954_vm13, %v2934_v50, %v2962_v24 }
0x15c5   :  { %v2948_v22 = vadd.f32 %v2946_v35, %v2941_v26  ;;  %v2980_v37 = vsel %vm2974_vm15, -1e+09, %v2970_v27 }
0x15c6   :  { %v2998_v38 = vsel %vm522_vm9, %v2980_v37, -inf }
0x15c7   :  { %v2964_v41 = vmul.f32 0.2, %v2948_v22  ;;  %2999 = vmax.xlane.f32.xlu1 %v2998_v38  ;;  %vm2956_vm12 = vcmp.ge.f32.partialorder %v2948_v22, 0.0 }
0x15c9   :  { %v2972_v42 = vsel %vm2956_vm12, %v2948_v22, %v2964_v41 }
0x15ca   :  { %v2982_v43 = vsel %vm2974_vm15, -1e+09, %v2972_v42 }
0x15cb   :  { %3002 = vmax.xlane.f32.xlu1 %v6161_v48  ;;  %v3004_v45 = vsel %vm522_vm9, %v2982_v43, -inf }
0x15cc   :  { %3005 = vmax.xlane.f32.xlu0 %v3004_v45 }
0x15e2   :  { %3152 = vrot.lane.b32.xlu0 %v6332_v0, %s5833_s22 }
0x15f6   :  { %v2985_v59 = vpop.xlane.xlu1 %2984 }
0x15f7   :  { %v3007_v49 = vsub.f32 -1e+09, %v2985_v59 }
0x15f9   :  { %v3015_v44 = vmul.f32 1.442695, %v3007_v49 }
0x15fa   :  { %v2991_v18 = vpop.xlane.xlu1 %2990 }
0x15fb   :  { %5767 = vpow2.f32 %v3015_v44  ;;  %v3009_v36 = vsub.f32 -1e+09, %v2991_v18 }
0x15fd   :  { %v3019_v46 = vmul.f32 1.442695, %v3009_v36 }
0x15fe   :  { %v2997_v47 = vpop.xlane.xlu1 %2996 }
0x15ff   :  { %5769 = vpow2.f32 %v3019_v46  ;;  %v3011_v51 = vsub.f32 -1e+09, %v2997_v47 }
0x1601   :  { %v3023_v53 = vmul.f32 1.442695, %v3011_v51 }
0x1603   :  { %5771 = vpow2.f32 %v3023_v53 }
0x1608   :  { %v5768_v54 = vpop.eup %5767 }
0x1609   :  { %v3031_v55 = vsel %vm522_vm9, %v5768_v54, 0.0 }
0x160a   :  { %3032 = vadd.xlane.f32.xlu1 %v3031_v55 }
0x160c   :  { %v5770_v57 = vpop.eup %5769 }
0x160d   :  { %v3037_v58 = vsel %vm522_vm9, %v5770_v57, 0.0 }
0x160e   :  { %3038 = vadd.xlane.f32.xlu1 %v3037_v58 }
0x1610   :  { %v6383_v60 = vpop.eup %5771 }
0x1611   :  { %v3043_v17 = vsel %vm522_vm9, %v6383_v60, 0.0 }
0x1612   :  { %3044 = vadd.xlane.f32.xlu1 %v3043_v17 }
0x164b   :  { %v2988_v61 = vpop.xlane.xlu0 %2987  ;;  %v2994_v15 = vpop.xlane.xlu1 %2993 }
0x164c   :  { %v3008_v32 = vsub.f32 %v2976_v19, %v2988_v61  ;;  %v3010_v1 = vsub.f32 %v2978_v13, %v2994_v15 }
0x164e   :  { %v3017_v62 = vmul.f32 1.442695, %v3008_v32  ;;  %v3021_v8 = vmul.f32 1.442695, %v3010_v1 }
0x1650   :  { %5773 = vpow2.f32 %v3017_v62  ;;  %v3000_v56 = vpop.xlane.xlu1 %2999 }
0x1651   :  { %v3012_v2 = vsub.f32 %v2980_v37, %v3000_v56  ;;  %5775 = vpow2.f32 %v3021_v8 }
0x1653   :  { %v3025_v3 = vmul.f32 1.442695, %v3012_v2 }
0x1654   :  { %v3003_v4 = vpop.xlane.xlu1 %3002 }
0x1655   :  { %v3013_v25 = vsub.f32 -1e+09, %v3003_v4  ;;  %v3006_v5 = vpop.xlane.xlu0 %3005  ;;  %5777 = vpow2.f32 %v3025_v3 }
0x1656   :  { %v3014_v6 = vsub.f32 %v2982_v43, %v3006_v5 }
0x1657   :  { %v3027_v7 = vmul.f32 1.442695, %v3013_v25 }
0x1658   :  { %v3029_v9 = vmul.f32 1.442695, %v3014_v6 }
0x1659   :  { %5779 = vpow2.f32 %v3027_v7  ;;  %v3153_v38 = vpop.permute.xlu0 %3152 }
0x165a   :  { %5781 = vpow2.f32 %v3029_v9 }
0x165d   :  { %v5774_v10 = vpop.eup %5773 }
0x165e   :  { %v3034_v30 = vsel %vm522_vm9, %v5774_v10, 0.0  ;;  %v5776_v11 = vpop.eup %5775 }
0x165f   :  { %3035 = vadd.xlane.f32.xlu0 %v3034_v30  ;;  %v3040_v12 = vsel %vm522_vm9, %v5776_v11, 0.0 }
0x1662   :  { %v6389_v40 = vpop.eup %5777 }
0x1663   :  { %3041 = vadd.xlane.f32.xlu0 %v3040_v12  ;;  %v3046_v13 = vsel %vm522_vm9, %v6389_v40, 0.0 }
0x1666   :  { %v5780_v50 = vpop.eup %5779 }
0x1667   :  { %v6393_v19 = vpop.eup %5781  ;;  %3047 = vadd.xlane.f32.xlu0 %v3046_v13  ;;  %v3049_v20 = vsel %vm522_vm9, %v5780_v50, 0.0 }
0x1668   :  { %3050 = vadd.xlane.f32.xlu1 %v3049_v20  ;;  %v3052_v21 = vsel %vm522_vm9, %v6393_v19, 0.0 }
0x166b   :  { %3053 = vadd.xlane.f32.xlu0 %v3052_v21 }
0x1679   :  { %3154 = vrot.lane.b32.xlu1 %v6328_v63, %s5833_s22  ;;  %s5851_s22 = smov 17  }
0x167a   :  { %s6422_s28 = sld [smem:[%s6636_s0 + %s5851_s22]]  }
0x167b   :  { %s4800_s22 = sld [smem:[%s6636_s0 + %s5858_s25]]  }
0x167d   :  { %3241 = vrot.lane.b32.xlu1 %v6328_v63, %s5834_s23 }
0x1680   :  { %v2650_v2 = vld [vmem:[%s6422_s28 + $0x38] sm:$0xff]  ;;  %v2649_v4 = vld [vmem:[%s6422_s28 + $0x30] sm:$0xff]  ;;  %v2648_v5 = vld [vmem:[%s6422_s28 + $0x28] sm:$0xff] }
0x1681   :  { %3239 = vrot.lane.b32.xlu0 %v6332_v0, %s5834_s23  ;;  %3328 = vrot.lane.b32.xlu1 %v6328_v63, %s5835_s24  ;;  %v2647_v7 = vld [vmem:[%s6422_s28 + $0x20] sm:$0xff]  ;;  %v2646_v9 = vld [vmem:[%s6422_s28 + $0x18] sm:$0xff]  ;;  %s5859_s23 = smov 23  }
0x1682   :  { %v2644_v30 = vld [vmem:[%s6422_s28 + $0x8] sm:$0xff] }
0x1685   :  { %3326 = vrot.lane.b32.xlu1 %v6332_v0, %s5835_s24 }
0x1693   :  { %v3033_v24 = vpop.xlane.xlu1 %3032 }
0x1694   :  { %5783 = vrcp.f32 %v3033_v24 }
0x1697   :  { %v3039_v35 = vpop.xlane.xlu1 %3038 }
0x1698   :  { %5785 = vrcp.f32 %v3039_v35 }
0x169b   :  { %v3045_v41 = vpop.xlane.xlu1 %3044 }
0x169c   :  { %5787 = vrcp.f32 %v3045_v41 }
0x16a1   :  { %v5784_v26 = vpop.eup %5783 }
0x16a2   :  { %v3063_v27 = vmul.f32 %v5784_v26, %v5768_v54 }
0x16a4   :  { %5414 = vmatprep.mubr.msk.f32.mxu0 %vm522_vm9, %v3063_v27 }
0x16a5   :  { %v5786_v22 = vpop.eup %5785 }
0x16a6   :  { %v3065_v37 = vmul.f32 %v5786_v22, %v5770_v57 }
0x16a8   :  { %5421 = vmatprep.mubr.msk.f32.mxu1 %vm522_vm9, %v3065_v37 }
0x16a9   :  { %v5788_v59 = vpop.eup %5787 }
0x16aa   :  { %v3067_v36 = vmul.f32 %v5788_v59, %v6383_v60 }
0x16e8   :  { %v3036_v42 = vpop.xlane.xlu0 %3035 }
0x16e9   :  { %5789 = vrcp.f32 %v3036_v42 }
0x16ec   :  { %v3042_v63 = vpop.xlane.xlu0 %3041 }
0x16ed   :  { %5791 = vrcp.f32 %v3042_v63 }
0x16f0   :  { %v3048_v0 = vpop.xlane.xlu0 %3047 }
0x16f1   :  { %5793 = vrcp.f32 %v3048_v0  ;;  %v3051_v43 = vpop.xlane.xlu1 %3050 }
0x16f2   :  { %5795 = vrcp.f32 %v3051_v43 }
0x16f4   :  { %v3054_v45 = vpop.xlane.xlu0 %3053 }
0x16f5   :  { %5797 = vrcp.f32 %v3054_v45  ;;  %v3155_v49 = vpop.permute.xlu1 %3154 }
0x16f6   :  { %v5790_v44 = vpop.eup %5789  ;;  %5417 = vmatprep.subr.mxu1 %v3155_v49 }
0x16f7   :  { %5418 = vmatpush3.msra.mxu1 %v3155_v49  ;;  %v3064_v18 = vmul.f32 %v5790_v44, %v5774_v10  ;;  %v2645_v10 = vld [vmem:[%s6422_s28 + $0x10] sm:$0xff] }
0x16f8   :  { %5419 = vmatprep.subr.mxu1 %v3153_v38  ;;  %v3240_v51 = vpop.permute.xlu0 %3239 }
0x16f9   :  { %5415 = vmatmul.mubr.msk.f32.vlgmr.msra.gmra.mxu0 %vm522_vm9, %v3064_v18  ;;  %5420 = vmatpush3.msra.mxu1 %v3153_v38  ;;  %v3242_v46 = vpop.permute.xlu1 %3241 }
0x16fa   :  { %v5792_v47 = vpop.eup %5791  ;;  %5424 = vmatprep.subr.mxu0 %v3242_v46  ;;  %5428 = vmatprep.mubr.msk.f32.mxu0 %vm522_vm9, %v3067_v36 }
0x16fb   :  { %5425 = vmatpush3.msra.mxu0 %v3242_v46  ;;  %v3066_v53 = vmul.f32 %v5792_v47, %v5776_v11  ;;  %v2643_v11 = vld [vmem:[%s6422_s28] sm:$0xff] }
0x16fc   :  { %5426 = vmatprep.subr.mxu0 %v3240_v51 }
0x16fd   :  { %5422 = vmatmul.mubr.msk.f32.vlgmr.msra.gmra.mxu1 %vm522_vm9, %v3066_v53  ;;  %5427 = vmatpush3.msra.mxu0 %v3240_v51  ;;  %v3329_v54 = vpop.permute.xlu1 %3328  ;;  %v2655_v51 = vld [vmem:[%s4798_s7] sm:$0x1] }
0x16fe   :  { %v5794_v55 = vpop.eup %5793  ;;  %5431 = vmatprep.subr.mxu1 %v3329_v54  ;;  %5438 = vmatprep.subr.mxu0 %v2650_v2  ;;  %v5820_v53 = vld [vmem:[%s5941_s21] sm:$0xff]  ;;  %s5854_s21 = smov 64  }
0x16ff   :  { %v5796_v57 = vpop.eup %5795  ;;  %5432 = vmatpush3.msra.mxu1 %v3329_v54  ;;  %v3068_v58 = vmul.f32 %v5794_v55, %v6389_v40 }
0x1700   :  { %v3069_v60 = vmul.f32 %v5796_v57, %v5780_v50 }
0x1701   :  { %5429 = vmatmul.mubr.msk.f32.vlgmr.msra.gmra.mxu0 %vm522_vm9, %v3068_v58  ;;  %v3327_v17 = vpop.permute.xlu1 %3326 }
0x1702   :  { %v5798_v61 = vpop.eup %5797  ;;  %5433 = vmatprep.subr.mxu1 %v3327_v17  ;;  %5435 = vmatprep.mubr.msk.f32.mxu1 %vm522_vm9, %v3069_v60 }
0x1703   :  { %5434 = vmatpush3.msra.mxu1 %v3327_v17  ;;  %v3070_v15 = vmul.f32 %v5798_v61, %v6393_v19  ;;  %5439 = vmatpush3.msra.mxu0 %v2650_v2 }
0x1704   :  { %5440 = vmatprep.subr.mxu0 %v2649_v4 }
0x1705   :  { %5436 = vmatmul.mubr.msk.f32.vlgmr.msra.gmra.mxu1 %vm522_vm9, %v3070_v15  ;;  %5441 = vmatpush3.msra.mxu0 %v2649_v4 }
0x1706   :  { %5442 = vmatprep.subr.mxu0 %v2648_v5 }
0x1707   :  { %5443 = vmatpush3.msra.mxu0 %v2648_v5 }
0x1708   :  { %5444 = vmatprep.subr.mxu0 %v2647_v7 }
0x1709   :  { %5445 = vmatpush3.msra.mxu0 %v2647_v7 }
0x170a   :  { %5446 = vmatprep.subr.mxu0 %v2646_v9 }
0x170b   :  { %5447 = vmatpush3.msra.mxu0 %v2646_v9 }
0x170c   :  { %5448 = vmatprep.subr.mxu0 %v2645_v10 }
0x170d   :  { %5449 = vmatpush3.msra.mxu0 %v2645_v10 }
0x170e   :  { %5450 = vmatprep.subr.mxu0 %v2644_v30 }
0x170f   :  { %5451 = vmatpush3.msra.mxu0 %v2644_v30 }
0x1710   :  { %5452 = vmatprep.subr.mxu0 %v2643_v11 }
0x1711   :  { %5453 = vmatpush3.msra.mxu0 %v2643_v11 }
0x17b9   :  { %v5416_v32 = vpop.f32.mrf.mxu0 }
0x17bb   :  { %v3143_v62 = vpop.f32.mrf.mxu0 }
0x17bd   :  { %v5423_v1 = vpop.f32.mrf.mxu1 }
0x17be   :  { %3417 = vrot.lane.b32.xlu1 %v5423_v1, %s5838_s30 }
0x17bf   :  { %v3230_v8 = vpop.f32.mrf.mxu1 }
0x17c0   :  { %3415 = vrot.lane.b32.xlu0 %v3230_v8, %s5838_s30  ;;  %s5852_s30 = smov 18  }
0x17c1   :  { %v5430_v56 = vpop.f32.mrf.mxu0 }
0x17c2   :  { %3425 = vrot.lane.b32.xlu1 %v5430_v56, %s5837_s29 }
0x17c3   :  { %v3317_v3 = vpop.f32.mrf.mxu0 }
0x17c4   :  { %3423 = vrot.lane.b32.xlu0 %v3317_v3, %s5837_s29 }
0x17c5   :  { %v5437_v25 = vpop.f32.mrf.mxu1 }
0x17c6   :  { %3433 = vrot.lane.b32.xlu1 %v5437_v25, %s5839_s1 }
0x17c7   :  { %v3404_v6 = vpop.f32.mrf.mxu1 }
0x17c8   :  { %3431 = vrot.lane.b32.xlu0 %v3404_v6, %s5839_s1  ;;  %s6441_s1 = sld [smem:[%s6636_s0 + %s5852_s30]]  }
0x17c9   :  { %s4802_s30 = sld [smem:[%s6636_s0 + %s5859_s23]]  }
0x17ce   :  { %v2654_v12 = vld [vmem:[%s6441_s1 + $0x18] sm:$0xff]  ;;  %v2653_v40 = vld [vmem:[%s6441_s1 + $0x10] sm:$0xff]  ;;  %v2652_v50 = vld [vmem:[%s6441_s1 + $0x8] sm:$0xff] }
0x17cf   :  { %5457 = vmatprep.subr.mxu1 %v2654_v12  ;;  %v2651_v36 = vld [vmem:[%s6441_s1] sm:$0xff] }
0x17d0   :  { %5458 = vmatpush3.msra.mxu1 %v2654_v12 }
0x17d1   :  { %5459 = vmatprep.subr.mxu1 %v2653_v40 }
0x17d2   :  { %5460 = vmatpush3.msra.mxu1 %v2653_v40  ;;  %v3820_v40 = vsel %vm522_vm9, %v6361_v16, 0.0 }
0x17d3   :  { %5461 = vmatprep.subr.mxu1 %v2652_v50 }
0x17d4   :  { %5462 = vmatpush3.msra.mxu1 %v2652_v50 }
0x17d5   :  { %5463 = vmatprep.subr.mxu1 %v2651_v36 }
0x17d6   :  { %5464 = vmatpush3.msra.mxu1 %v2651_v36 }
0x17d7   :  { %5468 = vmatprep.subr.mxu1 %v5825_v14 }
0x17ea   :  { %3715 = vmax.xlane.f32.xlu1 %v6161_v48 }
0x1830   :  { %v3418_v13 = vpop.permute.xlu1 %3417 }
0x1831   :  { %v3438_v24 = vsel %vm522_vm9, %v5416_v32, %v3418_v13 }
0x1832   :  { %v3416_v19 = vpop.permute.xlu0 %3415 }
0x1833   :  { %v3437_v27 = vsel %vm522_vm9, %v3143_v62, %v3416_v19 }
0x1834   :  { %v3426_v20 = vpop.permute.xlu1 %3425 }
0x1835   :  { %v3440_v35 = vsel %vm193_vm0, %v3438_v24, %v3426_v20 }
0x1836   :  { %v3424_v21 = vpop.permute.xlu0 %3423 }
0x1837   :  { %v3439_v37 = vsel %vm193_vm0, %v3437_v27, %v3424_v21 }
0x1838   :  { %v3434_v26 = vpop.permute.xlu1 %3433 }
0x1839   :  { %v3442_v22 = vsel %vm981_vm7, %v3440_v35, %v3434_v26 }
0x183a   :  { %v3446_v38 = vmin.f32 %v3442_v22, 0.0  ;;  %v3432_v41 = vpop.permute.xlu0 %3431  ;;  %vm3444_vm5 = vcmp.gt.f32.partialorder %v3442_v22, 0.0 }
0x183b   :  { %v3441_v42 = vsel %vm981_vm7, %v3439_v37, %v3432_v41  ;;  %vm3861_vm7 = vcmp.lt.s32.totalorder %v5945_v29, 13  ;;  %v4152_v29 = vld [vmem:[%s6529_s12 + $0x58] sm:$0xff] }
0x183c   :  { %v3449_v48 = vmul.f32 1.442695, %v3446_v38  ;;  %v3445_v63 = vmin.f32 %v3441_v42, 0.0  ;;  %vm3443_vm6 = vcmp.gt.f32.partialorder %v3441_v42, 0.0  ;;  %vm3862_vm13 = vmand %vm147_vm4, %vm3861_vm7 }
0x183d   :  { %vm3863_vm12 = vmand %vm3860_vm10, %vm3861_vm7  ;;  %v3864_v54 = vsel %vm3862_vm13, %v5820_v53, 0.0 }
0x183e   :  { %5799 = vpow2.f32 %v3449_v48  ;;  %v3447_v0 = vmul.f32 1.442695, %v3445_v63  ;;  %v6480_v55 = vsel %vm3863_vm12, %v6356_v23, 0.0 }
0x1840   :  { %5801 = vpow2.f32 %v3447_v0 }
0x184b   :  { %v5800_v43 = vpop.eup %5799 }
0x184c   :  { %v4880_v59 = vadd.f32 -1.0, %v5800_v43 }
0x184d   :  { %v5802_v45 = vpop.eup %5801 }
0x184e   :  { %v4879_v49 = vadd.f32 -1.0, %v5802_v45  ;;  %v3454_v18 = vsel %vm3444_vm5, %v3442_v22, %v4880_v59 }
0x1850   :  { %v3453_v44 = vsel %vm3443_vm6, %v3441_v42, %v4879_v49  ;;  %vm6516_vm6 = vmand %vm146_vm3, %vm164_vm11  ;;  %vm4160_vm3 = vcmask 785408  }
0x1851   :  { %5454 = vmatprep.mubr.msk.f32.mxu0 %vm275_vm2, %v3453_v44  ;;  %vm3869_vm5 = vmand %vm6516_vm6, %vm158_vm8 }
0x1852   :  { %5455 = vmatmul.mubr.msk.f32.vlgmr.msra.gmra.mxu0 %vm275_vm2, %v3454_v18 }
0x1873   :  { %v3716_v57 = vpop.xlane.xlu1 %3715 }
0x1874   :  { %v3720_v58 = vsub.f32 -1e+09, %v3716_v57 }
0x1876   :  { %v3722_v60 = vmul.f32 1.442695, %v3720_v58 }
0x1878   :  { %5803 = vpow2.f32 %v3722_v60  ;;  %v3871_v60 = vsel %vm3869_vm5, %v6356_v23, 0.0  ;;  %v4150_v23 = vld [vmem:[%s6529_s12 + $0x48] sm:$0xff] }
0x1885   :  { %v5804_v61 = vpop.eup %5803 }
0x1886   :  { %v3726_v32 = vsel %vm522_vm9, %v5804_v61, 0.0 }
0x1887   :  { %3727 = vadd.xlane.f32.xlu1 %v3726_v32  ;;  %v4147_v32 = vld [vmem:[%s6529_s12 + $0x30] sm:$0xff] }
0x188b   :  { %3821 = vadd.xlane.f32.xlu1 %v3820_v40 }
0x1910   :  { %v3728_v6 = vpop.xlane.xlu1 %3727 }
0x1911   :  { %5805 = vrcp.f32 %v3728_v6  ;;  %v4254_v6 = vld [vmem:[%s6550_s16 + $0x30] sm:$0xff] }
0x1912   :  { %v5456_v46 = vpop.f32.mrf.mxu0 }
0x1913   :  { %5475 = vmatprep.subr.mxu0 %v5456_v46 }
0x1914   :  { %v3527_v47 = vpop.f32.mrf.mxu0  ;;  %5476 = vmatpush3.msra.mxu0 %v5456_v46  ;;  %v3822_v20 = vpop.xlane.xlu1 %3821 }
0x1915   :  { %5465 = vmatprep.mubr.msk.f32.mxu1 %vm193_vm0, %v3527_v47  ;;  %5477 = vmatprep.subr.mxu0 %v3527_v47  ;;  %vm3824_vm4 = vcmp.eq.f32.partialorder %v3822_v20, 0.0 }
0x1916   :  { %5466 = vmatmul.mubr.msk.f32.vlgmr.msra.gmra.mxu1 %vm193_vm0, %v5456_v46  ;;  %5478 = vmatpush3.msra.mxu0 %v3527_v47 }
0x1917   :  { %5469 = vmatpush3.xpose.msk.msra.mxu1 %vm193_vm0, %v5456_v46  ;;  %5472 = vmatprep.mubr.msk.f32.mxu1 %vm5826_vm1, %v5825_v14 }
0x1918   :  { %5470 = vmatprep.subr.mxu1 %v5825_v14 }
0x191b   :  { %5471 = vmatpush3.xpose.msk.msra.mxu1 %vm193_vm0, %v3527_v47 }
0x191c   :  { %5482 = vmatprep.subr.mxu1 %v6314_v52 }
0x191e   :  { %5473 = vmatmul.mubr.msk.f32.vlgmr.msra.gmra.mxu1 %vm193_vm0, %v2655_v51  ;;  %v5806_v7 = vpop.eup %5805 }
0x191f   :  { %5483 = vmatpush3.msra.mxu1 %v6314_v52  ;;  %5486 = vmatprep.mubr.msk.f32.mxu1 %vm522_vm9, %v3864_v54  ;;  %v3734_v9 = vmul.f32 %v5806_v7, %v5804_v61  ;;  %v4149_v61 = vld [vmem:[%s6529_s12 + $0x40] sm:$0xff]  ;;  %v4253_v7 = vld [vmem:[%s6550_s16 + $0x28] sm:$0xff] }
0x1920   :  { %5484 = vmatprep.subr.mxu1 %v6312_v39 }
0x1921   :  { %5485 = vmatpush3.msra.mxu1 %v6312_v39  ;;  %5479 = vmatprep.mubr.msk.f32.mxu0 %vm522_vm9, %v3734_v9  ;;  %v4252_v9 = vld [vmem:[%s6550_s16 + $0x20] sm:$0xff] }
0x1922   :  { %5487 = vmatmul.mubr.msk.f32.vlgmr.msra.gmra.mxu1 %vm522_vm9, %v6480_v55 }
0x1923   :  { %5500 = vmatprep.mubr.msk.f32.mxu1 %vm522_vm9, %v3864_v54 }
0x19d6   :  { %v5467_v17 = vpop.f32.mrf.mxu1 }
0x19d7   :  { %3697 = vperm.xlu0 %5670, %v5467_v17   ;;  %v4151_v17 = vld [vmem:[%s6529_s12 + $0x50] sm:$0xff] }
0x19d8   :  { %v3608_v15 = vpop.f32.mrf.mxu1 }
0x19d9   :  { %v4148_v15 = vld [vmem:[%s6529_s12 + $0x38] sm:$0xff] }
0x19de   :  { %v3686_v1 = vpop.f32.mrf.mxu1 }
0x19df   :  { %v3703_v8 = vrot.slane %v3686_v1, %v5949_v31  ;;  %v4146_v1 = vld [vmem:[%s6529_s12 + $0x28] sm:$0xff] }
0x19e0   :  { %v5474_v62 = vpop.f32.mrf.mxu1 }
0x19e1   :  { %v4145_v62 = vld [vmem:[%s6529_s12 + $0x20] sm:$0xff] }
0x1a52   :  { %v3698_v56 = vpop.permute.xlu0 %3697 }
0x1a53   :  { %v3705_v2 = vadd.f32 %v3703_v8, %v3698_v56  ;;  %v4144_v8 = vld [vmem:[%s6529_s12 + $0x18] sm:$0xff] }
0x1a55   :  { %vm3707_vm1 = vcmp.ge.f32.partialorder %v3705_v2, 0.0  ;;  %v3709_v3 = vmul.f32 0.2, %v3705_v2 }
0x1a57   :  { %v3711_v4 = vsel %vm3707_vm1, %v3705_v2, %v3709_v3 }
0x1a58   :  { %v3713_v25 = vsel %vm2974_vm15, -1e+09, %v3711_v4  ;;  %v4143_v4 = vld [vmem:[%s6529_s12 + $0x10] sm:$0xff] }
0x1a59   :  { %v3717_v5 = vsel %vm522_vm9, %v3713_v25, -inf }
0x1a5a   :  { %3718 = vmax.xlane.f32.xlu0 %v3717_v5  ;;  %v4141_v5 = vld [vmem:[%s6529_s12] sm:$0xff] }
0x1ae3   :  { %v3719_v10 = vpop.xlane.xlu0 %3718 }
0x1ae4   :  { %v3721_v30 = vsub.f32 %v3713_v25, %v3719_v10  ;;  %v4142_v25 = vld [vmem:[%s6529_s12 + $0x8] sm:$0xff]  ;;  %s5863_s12 = smov 27  }
0x1ae5   :  { %s4806_s15 = sld [smem:[%s6636_s0 + %s5863_s12]]  }
0x1ae6   :  { %v3724_v31 = vmul.f32 1.442695, %v3721_v30 }
0x1ae8   :  { %5807 = vpow2.f32 %v3724_v31 }
0x1af5   :  { %v5808_v11 = vpop.eup %5807 }
0x1af6   :  { %v3729_v12 = vsel %vm522_vm9, %v5808_v11, 0.0 }
0x1af7   :  { %3730 = vadd.xlane.f32.xlu0 %v3729_v12 }
0x1afb   :  { %3818 = vadd.xlane.f32.xlu0 %v5825_v14 }
0x1b80   :  { %v3731_v50 = vpop.xlane.xlu0 %3730 }
0x1b81   :  { %5809 = vrcp.f32 %v3731_v50 }
0x1b84   :  { %v3819_v21 = vpop.xlane.xlu0 %3818 }
0x1b85   :  { %vm3823_vm15 = vcmp.eq.f32.partialorder %v3819_v21, 0.0 }
0x1b8e   :  { %v5810_v13 = vpop.eup %5809 }
0x1b8f   :  { %v3735_v19 = vmul.f32 %v5810_v13, %v5808_v11 }
0x1b91   :  { %5480 = vmatmul.mubr.msk.f32.vlgmr.msra.gmra.mxu0 %vm522_vm9, %v3735_v19 }
0x1b92   :  { %5493 = vmatprep.mubr.f32.mxu0 %v5825_v14 }
0x1c51   :  { %v5481_v24 = vpop.f32.mrf.mxu0 }
0x1c52   :  { %v3830_v35 = vsel %vm3824_vm4, 0.0, %v5481_v24  ;;  %v4251_v24 = vld [vmem:[%s6550_s16 + $0x18] sm:$0xff]  ;;  %vm4774_vm4 = vcmask 1024  }
0x1c53   :  { %v3832_v26 = vadd.f32 %v3830_v35, %v6314_v52  ;;  %v3808_v27 = vpop.f32.mrf.mxu0  ;;  %v4249_v35 = vld [vmem:[%s6550_s16 + $0x8] sm:$0xff] }
0x1c54   :  { %v3829_v22 = vsel %vm3823_vm15, 0.0, %v3808_v27  ;;  %v4357_v27 = vld [vmem:[%s6569_s20 + $0x38] sm:$0xff]  ;;  %vm4772_vm15 = vcmask 7168  }
0x1c55   :  { %v3831_v16 = vadd.f32 %v3829_v22, %v6312_v39  ;;  %v3836_v37 = vsel %vm193_vm0, %v3832_v26, 0.0  ;;  %v5488_v39 = vpop.f32.mrf.mxu1  ;;  %v4895_v22 = vld [vmem:[%s4800_s22] ss:$0 sm:$0xff]  ;;  %s5866_s22 = smov 29  }
0x1c56   :  { %3837 = vadd.xlane.f32.xlu1 %v3836_v37  ;;  %v3958_v18 = vsel %vm153_vm14, %v5488_v39, %v6314_v52  ;;  %v4351_v39 = vld [vmem:[%s6569_s20 + $0x8] sm:$0xff]  ;;  %s4808_s28 = sld [smem:[%s6636_s0 + %s5866_s22]]  }
0x1c57   :  { %v3833_v38 = vsel %vm193_vm0, %v3831_v16, 0.0  ;;  %v3944_v44 = vpop.f32.mrf.mxu1 }
0x1c58   :  { %3834 = vadd.xlane.f32.xlu0 %v3833_v38 }
0x1cdf   :  { %v3838_v41 = vpop.xlane.xlu1 %3837 }
0x1ce0   :  { %v3840_v14 = vmul.f32 0.03125, %v3838_v41 }
0x1ce1   :  { %v3835_v42 = vpop.xlane.xlu0 %3834 }
0x1ce2   :  { %v3842_v48 = vsub.f32 %v3832_v26, %v3840_v14  ;;  %v3839_v63 = vmul.f32 0.03125, %v3835_v42  ;;  %v4248_v26 = vld [vmem:[%s6550_s16] sm:$0xff] }
0x1ce4   :  { %v3841_v0 = vsub.f32 %v3831_v16, %v3839_v63  ;;  %v3844_v43 = vmul.f32 %v3842_v48, %v3842_v48 }
0x1ce6   :  { %v3848_v45 = vsel %vm193_vm0, %v3844_v43, 0.0  ;;  %v3843_v59 = vmul.f32 %v3841_v0, %v3841_v0  ;;  %v4355_v43 = vld [vmem:[%s6569_s20 + $0x28] sm:$0xff] }
0x1ce7   :  { %3849 = vadd.xlane.f32.xlu1 %v3848_v45  ;;  %v4354_v45 = vld [vmem:[%s6569_s20 + $0x20] sm:$0xff] }
0x1ce8   :  { %v3845_v49 = vsel %vm193_vm0, %v3843_v59, 0.0  ;;  %v4353_v59 = vld [vmem:[%s6569_s20 + $0x18] sm:$0xff] }
0x1ce9   :  { %3846 = vadd.xlane.f32.xlu0 %v3845_v49  ;;  %v4352_v49 = vld [vmem:[%s6569_s20 + $0x10] sm:$0xff] }
0x1cf8   :  { %4125 = vrot.lane.b32.xlu1 %v3944_v44, %s5837_s29  ;;  %v4350_v44 = vld [vmem:[%s6569_s20] sm:$0xff] }
0x1cfc   :  { %4131 = vrot.lane.b32.xlu1 %v6123_v33, %s5854_s21 }
0x1cff   :  { %4127 = vrot.lane.b32.xlu0 %v3958_v18, %s5837_s29  ;;  %v4898_v18 = vld [vmem:[%s4802_s30] ss:$0 sm:$0xff] }
0x1d00   :  { %4133 = vrot.lane.b32.xlu1 %v6125_v34, %s5854_s21  ;;  %s5862_s21 = smov 28  }
0x1d01   :  { %s6604_s11 = sld [smem:[%s6636_s0 + %s5862_s21]]  }
0x1d70   :  { %v3850_v36 = vpop.xlane.xlu1 %3849 }
0x1d71   :  { %v3852_v46 = vmul.f32 0.03125, %v3850_v36 }
0x1d72   :  { %v3847_v47 = vpop.xlane.xlu0 %3846 }
0x1d73   :  { %v3854_v51 = vadd.f32 1e-05, %v3852_v46  ;;  %v3851_v53 = vmul.f32 0.03125, %v3847_v47 }
0x1d74   :  { %v4126_v10 = vpop.permute.xlu1 %4125 }
0x1d75   :  { %5811 = vrsqrt.f32 %v3854_v51  ;;  %v3853_v54 = vadd.f32 1e-05, %v3851_v53 }
0x1d76   :  { %v4128_v11 = vpop.permute.xlu0 %4127 }
0x1d77   :  { %5813 = vrsqrt.f32 %v3853_v54 }
0x1d78   :  { %v4132_v30 = vpop.permute.xlu1 %4131 }
0x1d7c   :  { %v4134_v19 = vpop.permute.xlu1 %4133 }
0x1d82   :  { %v5812_v52 = vpop.eup %5811 }
0x1d83   :  { %v3858_v57 = vmul.f32 %v5812_v52, %v3842_v48 }
0x1d84   :  { %v5814_v34 = vpop.eup %5813 }
0x1d85   :  { %5489 = vmatprep.subr.mxu0 %v3858_v57  ;;  %v3857_v58 = vmul.f32 %v5814_v34, %v3841_v0  ;;  %v4356_v0 = vld [vmem:[%s6569_s20 + $0x30] sm:$0xff]  ;;  %s5865_s20 = smov 31  }
0x1d86   :  { %5490 = vmatpush3.msra.mxu0 %v3858_v57  ;;  %s4810_s27 = sld [smem:[%s6636_s0 + %s5865_s20]]  }
0x1d87   :  { %5491 = vmatprep.subr.mxu0 %v3857_v58 }
0x1d88   :  { %5492 = vmatpush3.msra.mxu0 %v3857_v58 }
0x1d89   :  { %5494 = vmatmul.mubr.msk.f32.vlgmr.msra.gmra.mxu0 %vm522_vm9, %v3871_v60  ;;  %5503 = vmatprep.subr.mxu0 %v4152_v29 }
0x1d8a   :  { %5504 = vmatpush3.msra.mxu0 %v4152_v29 }
0x1d8b   :  { %5505 = vmatprep.subr.mxu0 %v4151_v17 }
0x1d8c   :  { %5506 = vmatpush3.msra.mxu0 %v4151_v17 }
0x1d8d   :  { %5507 = vmatprep.subr.mxu0 %v4150_v23 }
0x1d8e   :  { %5508 = vmatpush3.msra.mxu0 %v4150_v23 }
0x1d8f   :  { %5509 = vmatprep.subr.mxu0 %v4149_v61 }
0x1d90   :  { %5510 = vmatpush3.msra.mxu0 %v4149_v61 }
0x1d91   :  { %5511 = vmatprep.subr.mxu0 %v4148_v15 }
0x1d92   :  { %5512 = vmatpush3.msra.mxu0 %v4148_v15  ;;  %v5821_v15 = vld [vmem:[%s5878_s9 + $0x8] sm:$0xff] }
0x1d93   :  { %5513 = vmatprep.subr.mxu0 %v4147_v32 }
0x1d94   :  { %5514 = vmatpush3.msra.mxu0 %v4147_v32 }
0x1d95   :  { %5515 = vmatprep.subr.mxu0 %v4146_v1 }
0x1d96   :  { %5516 = vmatpush3.msra.mxu0 %v4146_v1 }
0x1d97   :  { %5517 = vmatprep.subr.mxu0 %v4145_v62 }
0x1d98   :  { %5518 = vmatpush3.msra.mxu0 %v4145_v62 }
0x1d99   :  { %5519 = vmatprep.subr.mxu0 %v4144_v8 }
0x1d9a   :  { %5520 = vmatpush3.msra.mxu0 %v4144_v8  ;;  %v5822_v8 = vld [vmem:[%s5878_s9] sm:$0xff]  ;;  %s5861_s9 = smov 26  }
0x1d9b   :  { %5521 = vmatprep.subr.mxu0 %v4143_v4  ;;  %s4805_s7 = sld [smem:[%s6636_s0 + %s5861_s9]]  }
0x1d9c   :  { %5522 = vmatpush3.msra.mxu0 %v4143_v4 }
0x1d9d   :  { %5523 = vmatprep.subr.mxu0 %v4142_v25 }
0x1d9e   :  { %5524 = vmatpush3.msra.mxu0 %v4142_v25 }
0x1d9f   :  { %5525 = vmatprep.subr.mxu0 %v4141_v5 }
0x1da0   :  { %5526 = vmatpush3.msra.mxu0 %v4141_v5 }
0x1e49   :  { %v5495_v56 = vpop.f32.mrf.mxu0 }
0x1e4a   :  { %v4045_v2 = vsel %vm6516_vm6, %v5495_v56, %v3858_v57  ;;  %v4901_v57 = vld [vmem:[%s4804_s4] ss:$0 sm:$0xff] }
0x1e4b   :  { %v4031_v3 = vpop.f32.mrf.mxu0  ;;  %5496 = vmatprep.subr.mxu1 %v4045_v2 }
0x1e4c   :  { %5497 = vmatpush3.msra.mxu1 %v4045_v2 }
0x1e4d   :  { %5498 = vmatprep.subr.mxu1 %v3857_v58 }
0x1e4e   :  { %5499 = vmatpush3.msra.mxu1 %v3857_v58 }
0x1e4f   :  { %5501 = vmatmul.mubr.msk.f32.vlgmr.msra.gmra.mxu1 %vm522_vm9, %v6480_v55  ;;  %v4255_v55 = vld [vmem:[%s6550_s16 + $0x38] sm:$0xff]  ;;  %s5864_s16 = smov 30  }
0x1e50   :  { %5530 = vmatprep.subr.mxu1 %v4255_v55  ;;  %s4809_s19 = sld [smem:[%s6636_s0 + %s5864_s16]]  }
0x1e51   :  { %5531 = vmatpush3.msra.mxu1 %v4255_v55 }
0x1e52   :  { %5532 = vmatprep.subr.mxu1 %v4254_v6 }
0x1e53   :  { %5533 = vmatpush3.msra.mxu1 %v4254_v6 }
0x1e54   :  { %5534 = vmatprep.subr.mxu1 %v4253_v7 }
0x1e55   :  { %5535 = vmatpush3.msra.mxu1 %v4253_v7 }
0x1e56   :  { %5536 = vmatprep.subr.mxu1 %v4252_v9 }
0x1e57   :  { %5537 = vmatpush3.msra.mxu1 %v4252_v9 }
0x1e58   :  { %5538 = vmatprep.subr.mxu1 %v4251_v24 }
0x1e59   :  { %5539 = vmatpush3.msra.mxu1 %v4251_v24 }
0x1e5a   :  { %5540 = vmatprep.subr.mxu1 %v4250_v28 }
0x1e5b   :  { %5541 = vmatpush3.msra.mxu1 %v4250_v28 }
0x1e5c   :  { %5542 = vmatprep.subr.mxu1 %v4249_v35 }
0x1e5d   :  { %5543 = vmatpush3.msra.mxu1 %v4249_v35 }
0x1e5e   :  { %5544 = vmatprep.subr.mxu1 %v4248_v26 }
0x1e5f   :  { %5545 = vmatpush3.msra.mxu1 %v4248_v26 }
0x1e60   :  { %5549 = vmatprep.subr.mxu1 %v4357_v27 }
0x1f0f   :  { %v5502_v31 = vpop.f32.mrf.mxu1 }
0x1f10   :  { %v4122_v12 = vsel %vm153_vm14, %v5502_v31, %v4045_v2  ;;  %v4483_v31 = vld [vmem:[%s4805_s7 + $0x18] sm:$0xff] }
0x1f11   :  { %v4138_v40 = vsel %vm193_vm0, %v4122_v12, %v4128_v11  ;;  %v4112_v50 = vpop.f32.mrf.mxu1  ;;  %v4482_v11 = vld [vmem:[%s4805_s7 + $0x10] sm:$0xff]  ;;  %5568 = vmatprep.subr.mxu0 %v4483_v31  ;;  %v4481_v12 = vld [vmem:[%s4805_s7 + $0x8] sm:$0xff] }
0x1f12   :  { %v4137_v13 = vsel %vm193_vm0, %v4112_v50, %v4126_v10  ;;  %v4140_v21 = vsel %vm275_vm2, %v4138_v40, %v4134_v19  ;;  %v4480_v40 = vld [vmem:[%s4805_s7] sm:$0xff]  ;;  %v4585_v50 = vld [vmem:[%s6604_s11 + $0x38] sm:$0xff] }
0x1f13   :  { %v4139_v20 = vsel %vm275_vm2, %v4137_v13, %v4132_v30 }
0x1f14   :  { %5527 = vmatprep.mubr.msk.f32.mxu0 %vm4160_vm3, %v4139_v20 }
0x1f15   :  { %5528 = vmatmul.mubr.msk.f32.vlgmr.msra.gmra.mxu0 %vm4160_vm3, %v4140_v21 }
0x1f16   :  { %5569 = vmatpush3.msra.mxu0 %v4483_v31 }
0x1f17   :  { %5570 = vmatprep.subr.mxu0 %v4482_v11 }
0x1f18   :  { %5571 = vmatpush3.msra.mxu0 %v4482_v11 }
0x1f19   :  { %5572 = vmatprep.subr.mxu0 %v4481_v12 }
0x1f1a   :  { %5573 = vmatpush3.msra.mxu0 %v4481_v12 }
0x1f1b   :  { %5574 = vmatprep.subr.mxu0 %v4480_v40 }
0x1f1c   :  { %5575 = vmatpush3.msra.mxu0 %v4480_v40 }
0x1f1d   :  { %5579 = vmatprep.subr.mxu0 %v4585_v50 }
0x1fd5   :  { %v5529_v16 = vpop.f32.mrf.mxu0 }
0x1fd6   :  { %v4239_v37 = vadd.f32 %v5529_v16, %v4895_v22  ;;  %v4584_v16 = vld [vmem:[%s6604_s11 + $0x30] sm:$0xff] }
0x1fd7   :  { %v4233_v38 = vpop.f32.mrf.mxu0 }
0x1fd8   :  { %v4234_v41 = vadd.f32 %v4895_v22, %v4233_v38  ;;  %v4245_v14 = vmul.f32 0.01, %v4239_v37  ;;  %vm4243_vm9 = vcmp.ge.f32.partialorder %v4239_v37, 0.0  ;;  %v4582_v38 = vld [vmem:[%s6604_s11 + $0x20] sm:$0xff] }
0x1fda   :  { %vm4242_vm14 = vcmp.ge.f32.partialorder %v4234_v41, 0.0  ;;  %v4244_v42 = vmul.f32 0.01, %v4234_v41  ;;  %v4247_v63 = vsel %vm4243_vm9, %v4239_v37, %v4245_v14  ;;  %v4583_v37 = vld [vmem:[%s6604_s11 + $0x28] sm:$0xff]  ;;  %v4580_v14 = vld [vmem:[%s6604_s11 + $0x10] sm:$0xff] }
0x1fdc   :  { %v4246_v48 = vsel %vm4242_vm14, %v4234_v41, %v4244_v42  ;;  %v4581_v41 = vld [vmem:[%s6604_s11 + $0x18] sm:$0xff]  ;;  %v4579_v42 = vld [vmem:[%s6604_s11 + $0x8] sm:$0xff] }
0x1fdd   :  { %5546 = vmatprep.mubr.msk.f32.mxu1 %vm275_vm2, %v4246_v48  ;;  %v4578_v48 = vld [vmem:[%s6604_s11] sm:$0xff] }
0x1fde   :  { %5547 = vmatmul.mubr.msk.f32.vlgmr.msra.gmra.mxu1 %vm275_vm2, %v4247_v63  ;;  %v4904_v63 = vld [vmem:[%s4806_s15] ss:$0 sm:$0xff] }
0x1fdf   :  { %5550 = vmatpush3.msra.mxu1 %v4357_v27 }
0x1fe0   :  { %5551 = vmatprep.subr.mxu1 %v4356_v0 }
0x1fe1   :  { %5552 = vmatpush3.msra.mxu1 %v4356_v0 }
0x1fe2   :  { %5553 = vmatprep.subr.mxu1 %v4355_v43 }
0x1fe3   :  { %5554 = vmatpush3.msra.mxu1 %v4355_v43 }
0x1fe4   :  { %5555 = vmatprep.subr.mxu1 %v4354_v45 }
0x1fe5   :  { %5556 = vmatpush3.msra.mxu1 %v4354_v45 }
0x1fe6   :  { %5557 = vmatprep.subr.mxu1 %v4353_v59 }
0x1fe7   :  { %5558 = vmatpush3.msra.mxu1 %v4353_v59 }
0x1fe8   :  { %5559 = vmatprep.subr.mxu1 %v4352_v49 }
0x1fe9   :  { %5560 = vmatpush3.msra.mxu1 %v4352_v49 }
0x1fea   :  { %5561 = vmatprep.subr.mxu1 %v4351_v39 }
0x1feb   :  { %5562 = vmatpush3.msra.mxu1 %v4351_v39 }
0x1fec   :  { %5563 = vmatprep.subr.mxu1 %v4350_v44 }
0x1fed   :  { %5564 = vmatpush3.msra.mxu1 %v4350_v44 }
0x209e   :  { %v5548_v36 = vpop.f32.mrf.mxu1 }
0x209f   :  { %v4341_v46 = vadd.f32 %v5548_v36, %v4898_v18  ;;  %v4683_v36 = vld [vmem:[%s4809_s19 + $0x18] sm:$0xff] }
0x20a0   :  { %v4335_v47 = vpop.f32.mrf.mxu1  ;;  %5598 = vmatprep.subr.mxu1 %v4683_v36 }
0x20a1   :  { %v4336_v51 = vadd.f32 %v4898_v18, %v4335_v47  ;;  %v4347_v53 = vmul.f32 0.01, %v4341_v46  ;;  %vm4345_vm8 = vcmp.ge.f32.partialorder %v4341_v46, 0.0  ;;  %v4681_v47 = vld [vmem:[%s4809_s19 + $0x8] sm:$0xff] }
0x20a3   :  { %vm4344_vm11 = vcmp.ge.f32.partialorder %v4336_v51, 0.0  ;;  %v4346_v54 = vmul.f32 0.01, %v4336_v51  ;;  %v4349_v52 = vsel %vm4345_vm8, %v4341_v46, %v4347_v53  ;;  %v4682_v46 = vld [vmem:[%s4809_s19 + $0x10] sm:$0xff]  ;;  %v70_v53 = vstv %s4810_s27 }
0x20a4   :  { %71 = vst [vmem:[#allocation2] sm:$0x1] %v70_v53 }
0x20a5   :  { %v4348_v33 = vsel %vm4344_vm11, %v4336_v51, %v4346_v54  ;;  %v4680_v51 = vld [vmem:[%s4809_s19] sm:$0xff] }
0x20a6   :  { %5565 = vmatprep.mubr.msk.f32.mxu1 %vm275_vm2, %v4348_v33  ;;  %v4907_v54 = vld [vmem:[%s4808_s28] ss:$0 sm:$0xff] }
0x20a7   :  { %5566 = vmatmul.mubr.msk.f32.vlgmr.msra.gmra.mxu1 %vm275_vm2, %v4349_v52 }
0x20a8   :  { %5599 = vmatpush3.msra.mxu1 %v4683_v36 }
0x20a9   :  { %5600 = vmatprep.subr.mxu1 %v4682_v46 }
0x20aa   :  { %5601 = vmatpush3.msra.mxu1 %v4682_v46 }
0x20ab   :  { %5602 = vmatprep.subr.mxu1 %v4681_v47 }
0x20ac   :  { %5603 = vmatpush3.msra.mxu1 %v4681_v47 }
0x20ad   :  { %5604 = vmatprep.subr.mxu1 %v4680_v51 }
0x20ae   :  { %5605 = vmatpush3.msra.mxu1 %v4680_v51 }
0x2167   :  { %v5567_v34 = vpop.f32.mrf.mxu1 }
0x2168   :  { %v4443_v58 = vadd.f32 %v5567_v34, %v4901_v57 }
0x2169   :  { %v4437_v60 = vpop.f32.mrf.mxu1 }
0x216a   :  { %vm4447_vm7 = vcmp.ge.f32.partialorder %v4443_v58, 0.0  ;;  %v4449_v29 = vmul.f32 0.01, %v4443_v58  ;;  %v4438_v17 = vadd.f32 %v4901_v57, %v4437_v60 }
0x216c   :  { %vm4446_vm10 = vcmp.ge.f32.partialorder %v4438_v17, 0.0  ;;  %v4448_v23 = vmul.f32 0.01, %v4438_v17  ;;  %v4451_v61 = vsel %vm4447_vm7, %v4443_v58, %v4449_v29 }
0x216d   :  { %v4453_v32 = vadd.f32 %v5821_v15, %v4451_v61 }
0x216e   :  { %v4450_v1 = vsel %vm4446_vm10, %v4438_v17, %v4448_v23  ;;  %v4910_v23 = vld [vmem:[#allocation2] ss:$0 sm:$0xff] }
0x216f   :  { %v4457_v62 = vsel %vm193_vm0, %v4453_v32, 0.0  ;;  %v4452_v56 = vadd.f32 %v5822_v8, %v4450_v1 }
0x2170   :  { %4458 = vadd.xlane.f32.xlu1 %v4457_v62 }
0x2171   :  { %v4454_v2 = vsel %vm193_vm0, %v4452_v56, 0.0 }
0x2172   :  { %4455 = vadd.xlane.f32.xlu0 %v4454_v2 }
0x21f9   :  { %v4459_v3 = vpop.xlane.xlu1 %4458 }
0x21fa   :  { %v4461_v4 = vmul.f32 0.03125, %v4459_v3 }
0x21fb   :  { %v4456_v25 = vpop.xlane.xlu0 %4455 }
0x21fc   :  { %v4460_v5 = vmul.f32 0.03125, %v4456_v25  ;;  %v4463_v55 = vsub.f32 %v4453_v32, %v4461_v4 }
0x21fe   :  { %v4462_v6 = vsub.f32 %v4452_v56, %v4460_v5  ;;  %v4465_v10 = vmul.f32 %v4463_v55, %v4463_v55 }
0x2200   :  { %v4464_v7 = vmul.f32 %v4462_v6, %v4462_v6  ;;  %v4469_v30 = vsel %vm193_vm0, %v4465_v10, 0.0 }
0x2202   :  { %v4466_v9 = vsel %vm193_vm0, %v4464_v7, 0.0 }
0x2203   :  { %4467 = vadd.xlane.f32.xlu0 %v4466_v9 }
0x2207   :  { %4470 = vadd.xlane.f32.xlu0 %v4469_v30 }
0x228c   :  { %v4468_v13 = vpop.xlane.xlu0 %4467 }
0x228d   :  { %v4472_v19 = vmul.f32 0.03125, %v4468_v13 }
0x228f   :  { %v4474_v20 = vadd.f32 1e-05, %v4472_v19 }
0x2290   :  { %v4471_v21 = vpop.xlane.xlu0 %4470 }
0x2291   :  { %5815 = vrsqrt.f32 %v4474_v20  ;;  %v4473_v24 = vmul.f32 0.03125, %v4471_v21 }
0x2293   :  { %v4475_v28 = vadd.f32 1e-05, %v4473_v24 }
0x2295   :  { %5817 = vrsqrt.f32 %v4475_v28 }
0x229e   :  { %v5816_v35 = vpop.eup %5815 }
0x229f   :  { %v4478_v26 = vmul.f32 %v5816_v35, %v4462_v6 }
0x22a1   :  { %5576 = vmatprep.mubr.msk.f32.mxu0 %vm193_vm0, %v4478_v26 }
0x22a2   :  { %v5818_v27 = vpop.eup %5817 }
0x22a3   :  { %v4479_v22 = vmul.f32 %v5818_v27, %v4463_v55 }
0x22a5   :  { %5577 = vmatmul.mubr.msk.f32.vlgmr.msra.gmra.mxu0 %vm193_vm0, %v4479_v22 }
0x22a6   :  { %5580 = vmatpush3.msra.mxu0 %v4585_v50 }
0x22a7   :  { %5581 = vmatprep.subr.mxu0 %v4584_v16 }
0x22a8   :  { %5582 = vmatpush3.msra.mxu0 %v4584_v16 }
0x22a9   :  { %5583 = vmatprep.subr.mxu0 %v4583_v37 }
0x22aa   :  { %5584 = vmatpush3.msra.mxu0 %v4583_v37 }
0x22ab   :  { %5585 = vmatprep.subr.mxu0 %v4582_v38 }
0x22ac   :  { %5586 = vmatpush3.msra.mxu0 %v4582_v38 }
0x22ad   :  { %5587 = vmatprep.subr.mxu0 %v4581_v41 }
0x22ae   :  { %5588 = vmatpush3.msra.mxu0 %v4581_v41 }
0x22af   :  { %5589 = vmatprep.subr.mxu0 %v4580_v14 }
0x22b0   :  { %5590 = vmatpush3.msra.mxu0 %v4580_v14 }
0x22b1   :  { %5591 = vmatprep.subr.mxu0 %v4579_v42 }
0x22b2   :  { %5592 = vmatpush3.msra.mxu0 %v4579_v42 }
0x22b3   :  { %5593 = vmatprep.subr.mxu0 %v4578_v48 }
0x22b4   :  { %5594 = vmatpush3.msra.mxu0 %v4578_v48 }
0x2365   :  { %v5578_v0 = vpop.f32.mrf.mxu0 }
0x2366   :  { %v4569_v43 = vadd.f32 %v5578_v0, %v4904_v63 }
0x2367   :  { %v4563_v45 = vpop.f32.mrf.mxu0 }
0x2368   :  { %v4564_v59 = vadd.f32 %v4904_v63, %v4563_v45  ;;  %v4575_v49 = vmul.f32 0.1, %v4569_v43  ;;  %vm4573_vm13 = vcmp.ge.f32.partialorder %v4569_v43, 0.0 }
0x236a   :  { %vm4572_vm12 = vcmp.ge.f32.partialorder %v4564_v59, 0.0  ;;  %v4574_v39 = vmul.f32 0.1, %v4564_v59  ;;  %v4577_v18 = vsel %vm4573_vm13, %v4569_v43, %v4575_v49 }
0x236c   :  { %v4576_v44 = vsel %vm4572_vm12, %v4564_v59, %v4574_v39 }
0x236d   :  { %5595 = vmatprep.mubr.msk.f32.mxu0 %vm275_vm2, %v4576_v44 }
0x236e   :  { %5596 = vmatmul.mubr.msk.f32.vlgmr.msra.gmra.mxu0 %vm275_vm2, %v4577_v18 }
0x242e   :  { %v5597_v33 = vpop.f32.mrf.mxu0 }
0x242f   :  { %v4671_v52 = vadd.f32 %v5597_v33, %v4907_v54 }
0x2430   :  { %v4665_v57 = vpop.f32.mrf.mxu0 }
0x2431   :  { %v4666_v34 = vadd.f32 %v4907_v54, %v4665_v57  ;;  %v4677_v58 = vmul.f32 0.1, %v4671_v52  ;;  %vm4675_vm2 = vcmp.ge.f32.partialorder %v4671_v52, 0.0 }
0x2433   :  { %vm4674_vm1 = vcmp.ge.f32.partialorder %v4666_v34, 0.0  ;;  %v4676_v60 = vmul.f32 0.1, %v4666_v34  ;;  %v4679_v17 = vsel %vm4675_vm2, %v4671_v52, %v4677_v58 }
0x2435   :  { %v4678_v29 = vsel %vm4674_vm1, %v4666_v34, %v4676_v60 }
0x2436   :  { %5606 = vmatprep.mubr.msk.f32.mxu1 %vm193_vm0, %v4678_v29 }
0x2437   :  { %5607 = vmatmul.mubr.msk.f32.vlgmr.msra.gmra.mxu1 %vm193_vm0, %v4679_v17 }
0x24f7   :  { %v5608_v61 = vpop.f32.mrf.mxu1 }
0x24f8   :  { %v4769_v15 = vadd.f32 %v5608_v61, %v4910_v23 }
0x24f9   :  { %v4763_v32 = vpop.f32.mrf.mxu1 }
0x24fa   :  { %4775 = vst.msk [vmem:[%s4811_s3 + $0x8] sm:$0x3] %vm4774_vm4, %v4769_v15  ;;  %v4764_v1 = vadd.f32 %v4910_v23, %v4763_v32 }
0x24fc   :  { %4773 = vst.msk [vmem:[%s4811_s3] sm:$0xff] %vm4772_vm15, %v4764_v1 }

</bundles_post_ra>
